<compile_context>
chip_gen: v7x
topology: tpu7x:2x2x1
jax: 0.10.0
libtpu: 0.0.40
codegen_flags: <defaults>
</compile_context>

<pallas_src>
import functools
import numpy as np
import jax
import jax.numpy as jnp
from jax.experimental import pallas as pl
from jax.experimental.pallas import tpu as pltpu

EPS = 1e-5

# depthwise-conv slab order: input-path DWCBR depthwise, dw_conv1, dw_conv2
DW_IP, DW_D1, DW_D2 = 0, 1, 2

# the 8 off-centre 3x3 taps as (dy, dx); the centre tap is handled separately
_OFF_TAPS = ((-1, -1), (-1, 0), (-1, 1), (0, -1), (0, 1), (1, -1), (1, 0), (1, 1))


def air_block_kernel(x_ref, masks_ref, pool_ref, bcast_ref,
                     dw_w_ref, dw_b_ref, so_dw_w_ref, so_dw_b_ref,
                     so_pw_ref, so_pb_ref, wc_ref, bc_ref, wi_ref, bi_ref,
                     o_ref, *, C, c2, W, L, offs_c, offs_i, cdt):
    f32 = jnp.float32
    o_ip_pw, o_ip_w2, o_sp, o_co, o_out = offs_c
    o_ip1, o_r = offs_i

    relu = lambda t: jnp.maximum(t, 0.0)

    x = x_ref[0].astype(cdt)                       # (Cin, L)
    masks = masks_ref[...].astype(cdt)             # (8, L) combined tap-validity
    pool = pool_ref[...].astype(cdt)               # (L, n) per-image mean weights
    bcast = bcast_ref[...].astype(cdt)             # (n, L) per-image broadcast
    w_co = wc_ref[pl.ds(o_co, C), :].astype(cdt)   # hoisted: CO weight used twice

    def conv_c(t, off, cout):
        # 1x1 conv, Cin = C: (cout, C) @ (C, L) -> (cout, L), f32 accumulate
        w = wc_ref[pl.ds(off, cout), :].astype(cdt)
        return jnp.dot(w, t, preferred_element_type=f32) + bc_ref[pl.ds(off, cout), :]

    def dwconv3x3(t, wk, b):
        # Depthwise 3x3, padding=1, on (rows, L) with rows in {C, 2C}.
        # All 8 off-centre taps are independent XLU rolls of the same `t`
        # (no roll-of-a-roll dependency chain), masked with host-precomputed
        # combined boundary masks; the accumulator starts as centre tap + bias.
        acc = (t * wk[:, 4:5]).astype(f32) + b
        for k, (dy, dx) in enumerate(_OFF_TAPS):
            shift = (-(dy * W + dx)) % L           # read element at (i+dy, j+dx)
            tap = (dy + 1) * 3 + (dx + 1)
            s = pltpu.roll(t, shift, axis=1) * masks[k:k + 1, :]
            acc = acc + (s * wk[:, tap:tap + 1]).astype(f32)
        return acc                                  # (rows, L) f32

    def channel_op(t):
        # x * sigmoid(Conv1x1(GlobalAvgPool(x))); pooling / broadcast are done
        # per image along the lane axis via the pool / bcast matrices.
        pooled = jnp.dot(t, pool, preferred_element_type=f32)               # (C, n)
        gate = jax.nn.sigmoid(
            jnp.dot(w_co, pooled.astype(cdt), preferred_element_type=f32))  # (C, n)
        gate_full = jnp.dot(gate.astype(cdt), bcast,
                            preferred_element_type=f32)                     # (C, L)
        return t * gate_full.astype(cdt)

    # ---- fused input-path first 1x1 + residual 1x1: single MXU pass over x ----
    yi = (jnp.dot(wi_ref[...].astype(cdt), x, preferred_element_type=f32)
          + bi_ref[...])                                                     # (ri, L)
    t = relu(yi[o_ip1:o_ip1 + C]).astype(cdt)
    resid = yi[o_r:o_r + c2]              # residual branch, kept f32 until the end

    # ---- rest of input_path: DWCBR, then 1x1+BN (no ReLU) ----
    t = relu(dwconv3x3(t, dw_w_ref[DW_IP].astype(cdt), dw_b_ref[DW_IP])).astype(cdt)
    t = relu(conv_c(t, o_ip_pw, C)).astype(cdt)
    x1 = conv_c(t, o_ip_w2, C).astype(cdt)

    # ---- split_conv: one fused (3C, C) matmul, branches sliced on sublanes ----
    split = conv_c(x1, o_sp, 3 * C).astype(cdt)
    b1 = split[0:C]
    b2 = split[C:2 * C]
    b3 = split[2 * C:3 * C]

    # ---- channel_op(b2) first, then ONE fused SpatialOperation over
    #      [b1 ; co(b2)] stacked on sublanes (2C rows): a single dwconv
    #      traversal and a single (2, 2C) block-diagonal gate matmul.
    cb2 = channel_op(b2)
    stk = jnp.concatenate([b1, cb2], axis=0)                                 # (2C, L)
    a = relu(dwconv3x3(stk, so_dw_w_ref[...].astype(cdt),
                       so_dw_b_ref[...])).astype(cdt)
    g = jax.nn.sigmoid(jnp.dot(so_pw_ref[...].astype(cdt), a,
                               preferred_element_type=f32)
                       + so_pb_ref[...]).astype(cdt)                         # (2, L)
    so_b1 = b1 * g[0:1, :]
    so_cb2 = cb2 * g[1:2, :]

    b1f = channel_op(so_b1)
    merged = dwconv3x3(b1f + so_cb2, dw_w_ref[DW_D1].astype(cdt),
                       dw_b_ref[DW_D1]).astype(cdt)                          # dw_conv1
    merged = (merged * b3).astype(cdt)
    merged = dwconv3x3(merged, dw_w_ref[DW_D2].astype(cdt), dw_b_ref[DW_D2]) # dw_conv2

    out = relu(conv_c(merged.astype(cdt), o_out, c2)) + resid
    o_ref[0] = out.astype(o_ref.dtype)


def init_params(key, in_channels, c2):
    """Random parameters with BatchNorm (inference mode) folded into convs.

    1x1 weights are stored as (Cout, Cin); depthwise 3x3 as (C, 9); biases (Cout,).
    """
    C = in_channels // 2
    it = iter(jax.random.split(key, 80))

    def conv_w(co, ci, kh=1, kw=1):
        fan_in = ci * kh * kw
        return jax.random.normal(next(it), (co, ci, kh, kw),
                                 jnp.float32) / np.sqrt(fan_in)

    def conv_b(co):
        return 0.05 * jax.random.normal(next(it), (co,), jnp.float32)

    def bn(c):
        gamma = 1.0 + 0.1 * jax.random.normal(next(it), (c,), jnp.float32)
        beta = 0.1 * jax.random.normal(next(it), (c,), jnp.float32)
        mean = 0.1 * jax.random.normal(next(it), (c,), jnp.float32)
        var = jax.random.uniform(next(it), (c,), jnp.float32,
                                 minval=0.5, maxval=1.5)
        return gamma, beta, mean, var

    def fold(w, b, bn_p):
        gamma, beta, mean, var = bn_p
        s = gamma / jnp.sqrt(var + EPS)
        return w * s.reshape(-1, 1, 1, 1), (b - mean) * s + beta

    def as1x1(w):      # (Cout, Cin, 1, 1) -> (Cout, Cin)
        return w[:, :, 0, 0]

    def asdw(w):       # (C, 1, 3, 3) -> (C, 9)
        return w[:, 0].reshape(w.shape[0], 9)

    p = {}
    # input_path
    w, b = fold(conv_w(C, in_channels), conv_b(C), bn(C))
    p['ip_w1'], p['ip_b1'] = as1x1(w), b
    w, b = fold(conv_w(C, 1, 3, 3), conv_b(C), bn(C))        # DWCBR depthwise
    p['ip_dww'], p['ip_dwb'] = asdw(w), b
    w, b = fold(conv_w(C, C), conv_b(C), bn(C))              # DWCBR pointwise
    p['ip_pww'], p['ip_pwb'] = as1x1(w), b
    w, b = fold(conv_w(C, C), conv_b(C), bn(C))              # trailing 1x1+BN
    p['ip_w2'], p['ip_b2'] = as1x1(w), b
    # split_conv (C -> 3C), plain conv with bias
    p['sp_w'], p['sp_b'] = as1x1(conv_w(3 * C, C)), conv_b(3 * C)
    # SpatialOperation
    w, b = fold(conv_w(C, 1, 3, 3), conv_b(C), bn(C))
    p['so_dww'], p['so_dwb'] = asdw(w), b
    w, b = fold(conv_w(1, C), jnp.zeros((1,), jnp.float32), bn(1))  # bias=False
    p['so_pww'], p['so_pwb'] = as1x1(w), b
    # ChannelOperation (1x1, bias=False, no BN)
    p['co_w'] = as1x1(conv_w(C, C))
    # dw_conv1 / dw_conv2
    w, b = fold(conv_w(C, 1, 3, 3), conv_b(C), bn(C))
    p['d1_w'], p['d1_b'] = asdw(w), b
    w, b = fold(conv_w(C, 1, 3, 3), conv_b(C), bn(C))
    p['d2_w'], p['d2_b'] = asdw(w), b
    # output_conv + residual r
    w, b = fold(conv_w(c2, C), conv_b(c2), bn(c2))
    p['out_w'], p['out_b'] = as1x1(w), b
    p['r_w'], p['r_b'] = as1x1(conv_w(c2, in_channels)), conv_b(c2)
    return p


def _pack_rows(blocks, mult=8):
    """Concatenate blocks along rows, zero-padding each section to a multiple of
    `mult` rows so every packed section starts on a sublane-tile boundary."""
    parts, offs, cur = [], [], 0
    for b in blocks:
        offs.append(cur)
        pad = (-b.shape[0]) % mult
        if pad:
            b = jnp.concatenate(
                [b, jnp.zeros((pad,) + b.shape[1:], b.dtype)], axis=0)
        parts.append(b)
        cur += b.shape[0]
    return jnp.concatenate(parts, axis=0), tuple(offs)


def pack_params(p):
    """Pack the per-layer arrays into a handful of slabs (fewer DMA blocks)."""
    C = p['ip_pww'].shape[0]
    col = lambda v: v.reshape(-1, 1)

    # depthwise 3x3 convs that act on C rows
    dw_w = jnp.stack([p['ip_dww'], p['d1_w'], p['d2_w']])                 # (3, C, 9)
    dw_b = jnp.stack([p['ip_dwb'], p['d1_b'], p['d2_b']])[..., None]      # (3, C, 1)

    # fused SpatialOperation (acts on the [b1 ; co(b2)] 2C-row stack)
    so_dw_w = jnp.tile(p['so_dww'], (2, 1))                               # (2C, 9)
    so_dw_b = jnp.tile(col(p['so_dwb']), (2, 1))                          # (2C, 1)
    z = jnp.zeros_like(p['so_pww'])
    so_pw = jnp.concatenate(
        [jnp.concatenate([p['so_pww'], z], axis=1),
         jnp.concatenate([z, p['so_pww']], axis=1)], axis=0)              # (2, 2C)
    so_pb = jnp.tile(col(p['so_pwb']), (2, 1))                            # (2, 1)

    # 1x1 convs with Cin = C (sections padded to multiples of 8 rows)
    wc, offs_c = _pack_rows([p['ip_pww'], p['ip_w2'], p['sp_w'],
                             p['co_w'], p['out_w']])
    bc, _ = _pack_rows([col(p['ip_pwb']), col(p['ip_b2']), col(p['sp_b']),
                        jnp.zeros((C, 1), jnp.float32), col(p['out_b'])])

    # 1x1 convs with Cin = in_channels (input_path first conv + residual r)
    wi, offs_i = _pack_rows([p['ip_w1'], p['r_w']])
    bi, _ = _pack_rows([col(p['ip_b1']), col(p['r_b'])])

    slabs = (dw_w, dw_b, so_dw_w, so_dw_b, so_pw, so_pb, wc, bc, wi, bi)
    return slabs, offs_c, offs_i


def air_block_forward(x_nchw, params, *, compute_dtype=jnp.float32,
                      images_per_step=None):
    # compute_dtype=jnp.bfloat16 is the recommended setting on v6e/v7x (the
    # dwconv/gating chain is VALU-bound and bf16 doubles packing per vreg);
    # matmul accumulation, biases, gates and pooled means stay f32 in-kernel.
    # Default stays f32 so the tight tolerance vs the reference holds on every
    # generation (v5e has no bf16 VPU anyway).
    B, Cin, H, W = x_nchw.shape
    HW = H * W
    C = params['ip_pww'].shape[0]
    c2 = params['out_w'].shape[0]
    cdt = compute_dtype

    # ---- images per grid step (lane batching) --------------------------------
    # Concatenating n images along the 128-lane axis amortizes per-instruction
    # and per-grid-step (~0.35 us) overhead and improves MXU N-fill.  Keep >= 2
    # grid steps when possible so both v7x TensorCores get work; at very small
    # batches the lane batching wins and we accept grid=(1,).
    if images_per_step is None:
        limit = max(1, 1024 // HW)
        divs = [d for d in range(1, B + 1) if B % d == 0 and d <= limit]
        pref = [d for d in divs if B // d >= 2]
        n = max(pref or divs)
        if n == 1 and 1 < B <= limit:
            n = B
    else:
        n = images_per_step
    assert 1 <= n <= B and B % n == 0, (B, n)
    G = B // n
    L = n * HW

    slabs, offs_c, offs_i = pack_params(params)
    dw_w, dw_b, so_dw_w, so_dw_b, so_pw, so_pb, wc, bc, wi, bi = slabs

    # ---- host-built lookup tables --------------------------------------------
    pos = np.arange(L)
    pp = pos % HW
    row, col = pp // W, pp % W
    mrows = []
    for dy, dx in _OFF_TAPS:                       # combined boundary masks
        ok = np.ones(L, np.bool_)
        if dy == 1:
            ok &= row < H - 1
        elif dy == -1:
            ok &= row > 0
        if dx == 1:
            ok &= col < W - 1
        elif dx == -1:
            ok &= col > 0
        mrows.append(ok)
    masks = jnp.asarray(np.stack(mrows).astype(np.float32), dtype=cdt)     # (8, L)
    img = pos // HW
    bcast_np = (img[None, :] == np.arange(n)[:, None]).astype(np.float32)  # (n, L)
    pool = jnp.asarray(bcast_np.T / HW, dtype=cdt)                         # (L, n)
    bcast = jnp.asarray(bcast_np, dtype=cdt)

    # NCHW flattens to (B, Cin, HW); group n images along lanes -> (G, Cin, L).
    x = (x_nchw.reshape(G, n, Cin, HW).transpose(0, 2, 1, 3)
         .reshape(G, Cin, L).astype(cdt))

    kernel = functools.partial(air_block_kernel, C=C, c2=c2, W=W, L=L,
                               offs_c=offs_c, offs_i=offs_i, cdt=cdt)
    weights = [masks, pool, bcast, dw_w, dw_b, so_dw_w, so_dw_b,
               so_pw, so_pb, wc, bc, wi, bi]

    def _const_spec(a):
        nd = a.ndim
        return pl.BlockSpec(a.shape, lambda g, _nd=nd: (0,) * _nd)

    # NOTE(v7x): at production CAS-ViT sizes (H,W >= 56, large C) add a spatial
    # grid axis with a 1-row halo and set vmem_limit_bytes via CompilerParams so
    # the live (C, L_tile) intermediates fit the 64 MiB VMEM; at the test shapes
    # one grid step fits with large margin.
    out = pl.pallas_call(
        kernel,
        out_shape=jax.ShapeDtypeStruct((G, c2, L), jnp.float32),
        grid=(G,),
        in_specs=[pl.BlockSpec((1, Cin, L), lambda g: (g, 0, 0))]
                 + [_const_spec(a) for a in weights],
        out_specs=pl.BlockSpec((1, c2, L), lambda g: (g, 0, 0)),
        compiler_params=pltpu.CompilerParams(
            dimension_semantics=("parallel",)),
    )(x, *weights)
    return (out.reshape(G, c2, n, HW).transpose(0, 2, 1, 3)
            .reshape(B, c2, H, W))


def air_block_reference(x, p):
    """Pure-JAX (lax.conv) reference in NCHW, same folded parameters."""
    x = x.astype(jnp.float32)
    relu = lambda t: jnp.maximum(t, 0.0)

    def c1(t, w, b=None):                           # w: (Cout, Cin)
        y = jnp.einsum('oc,bchw->bohw', w, t)
        return y if b is None else y + b.reshape(1, -1, 1, 1)

    def dw(t, w, b):                                # w: (C, 9)
        C = t.shape[1]
        f = w.reshape(C, 1, 3, 3)
        y = jax.lax.conv_general_dilated(
            t, f, (1, 1), 'SAME',
            dimension_numbers=('NCHW', 'OIHW', 'NCHW'),
            feature_group_count=C)
        return y + b.reshape(1, -1, 1, 1)

    def so(t):
        a = relu(dw(t, p['so_dww'], p['so_dwb']))
        return t * jax.nn.sigmoid(c1(a, p['so_pww'], p['so_pwb']))

    def co(t):
        pooled = jnp.mean(t, axis=(2, 3), keepdims=True)
        return t * jax.nn.sigmoid(c1(pooled, p['co_w']))

    t = relu(c1(x, p['ip_w1'], p['ip_b1']))
    t = relu(dw(t, p['ip_dww'], p['ip_dwb']))
    t = relu(c1(t, p['ip_pww'], p['ip_pwb']))
    x1 = c1(t, p['ip_w2'], p['ip_b2'])
    split = c1(x1, p['sp_w'], p['sp_b'])
    C = x1.shape[1]
    b1, b2, b3 = split[:, :C], split[:, C:2 * C], split[:, 2 * C:]
    b1 = co(so(b1))
    b2 = so(co(b2))
    merged = dw(b1 + b2, p['d1_w'], p['d1_b'])
    merged = merged * b3
    merged = dw(merged, p['d2_w'], p['d2_b'])
    return relu(c1(merged, p['out_w'], p['out_b'])) + c1(x, p['r_w'], p['r_b'])


if __name__ == "__main__":
    key = jax.random.PRNGKey(0)
    k_x, k_p = jax.random.split(key)

    B, in_channels, H, W = 2, 16, 16, 16
    c2 = 8   # interpretation of the (undefined) `c2` in the source module

    x = jax.random.normal(k_x, (B, in_channels, H, W), jnp.float32)
    params = init_params(k_p, in_channels, c2)

    out = jax.block_until_ready(air_block_forward(x, params))
    ref = jax.block_until_ready(air_block_reference(x, params))

    assert out.shape == (B, c2, H, W), out.shape
    err = float(jnp.max(jnp.abs(out - ref)))
    assert err < 1e-3, f"mismatch vs pure-JAX reference: max abs err = {err}"
    print("KERNEL_OK")
</pallas_src>

<mosaic_0001>
module attributes {stable_mosaic.version = 11 : i64} {
  func.func @air_block_kernel(%arg0: i32, %arg1: memref<1x16x512xf32, #tpu.memory_space<vmem>>, %arg2: memref<8x512xf32, #tpu.memory_space<vmem>>, %arg3: memref<512x2xf32, #tpu.memory_space<vmem>>, %arg4: memref<2x512xf32, #tpu.memory_space<vmem>>, %arg5: memref<3x8x9xf32, #tpu.memory_space<vmem>>, %arg6: memref<3x8x1xf32, #tpu.memory_space<vmem>>, %arg7: memref<16x9xf32, #tpu.memory_space<vmem>>, %arg8: memref<16x1xf32, #tpu.memory_space<vmem>>, %arg9: memref<2x16xf32, #tpu.memory_space<vmem>>, %arg10: memref<2x1xf32, #tpu.memory_space<vmem>>, %arg11: memref<56x8xf32, #tpu.memory_space<vmem>>, %arg12: memref<56x1xf32, #tpu.memory_space<vmem>>, %arg13: memref<16x16xf32, #tpu.memory_space<vmem>>, %arg14: memref<16x1xf32, #tpu.memory_space<vmem>>, %arg15: memref<1x8x512xf32, #tpu.memory_space<vmem>>) attributes {dimension_semantics = [#tpu.dimension_semantics<parallel>], iteration_bounds = array<i64: 1>, scalar_prefetch = 0 : i64, scratch_operands = 0 : i64, tpu.core_type = #tpu.core_type<tc>, window_params = [{transform_indices = @transform_0, window_bounds = array<i64: 1, 16, 512>}, {pipeline_mode = #tpu.pipeline_mode<synchronous>, transform_indices = @transform_1, window_bounds = array<i64: 8, 512>}, {pipeline_mode = #tpu.pipeline_mode<synchronous>, transform_indices = @transform_2, window_bounds = array<i64: 512, 2>}, {pipeline_mode = #tpu.pipeline_mode<synchronous>, transform_indices = @transform_3, window_bounds = array<i64: 2, 512>}, {pipeline_mode = #tpu.pipeline_mode<synchronous>, transform_indices = @transform_4, window_bounds = array<i64: 3, 8, 9>}, {pipeline_mode = #tpu.pipeline_mode<synchronous>, transform_indices = @transform_5, window_bounds = array<i64: 3, 8, 1>}, {pipeline_mode = #tpu.pipeline_mode<synchronous>, transform_indices = @transform_6, window_bounds = array<i64: 16, 9>}, {pipeline_mode = #tpu.pipeline_mode<synchronous>, transform_indices = @transform_7, window_bounds = array<i64: 16, 1>}, {pipeline_mode = #tpu.pipeline_mode<synchronous>, transform_indices = @transform_8, window_bounds = array<i64: 2, 16>}, {pipeline_mode = #tpu.pipeline_mode<synchronous>, transform_indices = @transform_9, window_bounds = array<i64: 2, 1>}, {pipeline_mode = #tpu.pipeline_mode<synchronous>, transform_indices = @transform_10, window_bounds = array<i64: 56, 8>}, {pipeline_mode = #tpu.pipeline_mode<synchronous>, transform_indices = @transform_11, window_bounds = array<i64: 56, 1>}, {pipeline_mode = #tpu.pipeline_mode<synchronous>, transform_indices = @transform_12, window_bounds = array<i64: 16, 16>}, {pipeline_mode = #tpu.pipeline_mode<synchronous>, transform_indices = @transform_13, window_bounds = array<i64: 16, 1>}, {transform_indices = @transform_14, window_bounds = array<i64: 1, 8, 512>}]} {
    %c0 = arith.constant 0 : index
    %c0_0 = arith.constant 0 : index
    %c0_1 = arith.constant 0 : index
    %0 = vector.load %arg1[%c0, %c0_0, %c0_1] : memref<1x16x512xf32, #tpu.memory_space<vmem>>, vector<1x16x512xf32>
    %1 = vector.shape_cast %0 : vector<1x16x512xf32> to vector<16x512xf32>
    %c0_2 = arith.constant 0 : index
    %c0_3 = arith.constant 0 : index
    %2 = vector.load %arg2[%c0_2, %c0_3] : memref<8x512xf32, #tpu.memory_space<vmem>>, vector<8x512xf32>
    %c0_4 = arith.constant 0 : index
    %c0_5 = arith.constant 0 : index
    %3 = vector.load %arg3[%c0_4, %c0_5] : memref<512x2xf32, #tpu.memory_space<vmem>>, vector<512x2xf32>
    %c0_6 = arith.constant 0 : index
    %c0_7 = arith.constant 0 : index
    %4 = vector.load %arg4[%c0_6, %c0_7] : memref<2x512xf32, #tpu.memory_space<vmem>>, vector<2x512xf32>
    %c40 = arith.constant 40 : index
    %c0_8 = arith.constant 0 : index
    %5 = vector.load %arg11[%c40, %c0_8] : memref<56x8xf32, #tpu.memory_space<vmem>>, vector<8x8xf32>
    %c0_9 = arith.constant 0 : index
    %c0_10 = arith.constant 0 : index
    %6 = vector.load %arg13[%c0_9, %c0_10] : memref<16x16xf32, #tpu.memory_space<vmem>>, vector<16x16xf32>
    %cst = arith.constant dense<0.000000e+00> : vector<16x512xf32>
    %7 = tpu.matmul %6, %1, %cst {dimension_numbers = #tpu.dot_dimension_numbers<[1], [0], [0], [1], [0, 0, 1, 1], [], []>} : vector<16x16xf32>, vector<16x512xf32>, vector<16x512xf32> -> vector<16x512xf32>
    %c0_11 = arith.constant 0 : index
    %c0_12 = arith.constant 0 : index
    %8 = vector.load %arg14[%c0_11, %c0_12] : memref<16x1xf32, #tpu.memory_space<vmem>>, vector<16x1xf32>
    %9 = vector.broadcast %8 : vector<16x1xf32> to vector<16x512xf32>
    %10 = arith.addf %7, %9 : vector<16x512xf32>
    %11 = vector.extract_strided_slice %10 {offsets = [0, 0], sizes = [8, 512], strides = [1, 1]} : vector<16x512xf32> to vector<8x512xf32>
    %cst_13 = arith.constant 0.000000e+00 : f32
    %12 = vector.broadcast %cst_13 : f32 to vector<8x512xf32>
    %13 = arith.maximumf %11, %12 : vector<8x512xf32>
    %14 = vector.extract_strided_slice %10 {offsets = [8, 0], sizes = [8, 512], strides = [1, 1]} : vector<16x512xf32> to vector<8x512xf32>
    %c0_14 = arith.constant 0 : index
    %c0_15 = arith.constant 0 : index
    %c0_16 = arith.constant 0 : index
    %15 = vector.load %arg5[%c0_14, %c0_15, %c0_16] : memref<3x8x9xf32, #tpu.memory_space<vmem>>, vector<1x8x9xf32>
    %16 = vector.shape_cast %15 : vector<1x8x9xf32> to vector<8x9xf32>
    %c0_17 = arith.constant 0 : index
    %c0_18 = arith.constant 0 : index
    %c0_19 = arith.constant 0 : index
    %17 = vector.load %arg6[%c0_17, %c0_18, %c0_19] : memref<3x8x1xf32, #tpu.memory_space<vmem>>, vector<1x8x1xf32>
    %18 = vector.shape_cast %17 : vector<1x8x1xf32> to vector<8x1xf32>
    %19 = vector.extract_strided_slice %16 {offsets = [0, 4], sizes = [8, 1], strides = [1, 1]} : vector<8x9xf32> to vector<8x1xf32>
    %20 = vector.broadcast %19 : vector<8x1xf32> to vector<8x512xf32>
    %21 = arith.mulf %13, %20 : vector<8x512xf32>
    %22 = vector.broadcast %18 : vector<8x1xf32> to vector<8x512xf32>
    %23 = arith.addf %21, %22 : vector<8x512xf32>
    %c17_i32 = arith.constant 17 : i32
    %24 = tpu.dynamic_rotate %13 by %c17_i32 dim 1 : vector<8x512xf32>, i32 -> vector<8x512xf32>
    %25 = vector.extract_strided_slice %2 {offsets = [0, 0], sizes = [1, 512], strides = [1, 1]} : vector<8x512xf32> to vector<1x512xf32>
    %26 = vector.broadcast %25 : vector<1x512xf32> to vector<8x512xf32>
    %27 = arith.mulf %24, %26 : vector<8x512xf32>
    %28 = vector.extract_strided_slice %16 {offsets = [0, 0], sizes = [8, 1], strides = [1, 1]} : vector<8x9xf32> to vector<8x1xf32>
    %29 = vector.broadcast %28 : vector<8x1xf32> to vector<8x512xf32>
    %30 = arith.mulf %27, %29 : vector<8x512xf32>
    %31 = arith.addf %23, %30 : vector<8x512xf32>
    %c16_i32 = arith.constant 16 : i32
    %32 = tpu.dynamic_rotate %13 by %c16_i32 dim 1 : vector<8x512xf32>, i32 -> vector<8x512xf32>
    %33 = vector.extract_strided_slice %2 {offsets = [1, 0], sizes = [1, 512], strides = [1, 1]} : vector<8x512xf32> to vector<1x512xf32>
    %34 = vector.broadcast %33 : vector<1x512xf32> to vector<8x512xf32>
    %35 = arith.mulf %32, %34 : vector<8x512xf32>
    %36 = vector.extract_strided_slice %16 {offsets = [0, 1], sizes = [8, 1], strides = [1, 1]} : vector<8x9xf32> to vector<8x1xf32>
    %37 = vector.broadcast %36 : vector<8x1xf32> to vector<8x512xf32>
    %38 = arith.mulf %35, %37 : vector<8x512xf32>
    %39 = arith.addf %31, %38 : vector<8x512xf32>
    %c15_i32 = arith.constant 15 : i32
    %40 = tpu.dynamic_rotate %13 by %c15_i32 dim 1 : vector<8x512xf32>, i32 -> vector<8x512xf32>
    %41 = vector.extract_strided_slice %2 {offsets = [2, 0], sizes = [1, 512], strides = [1, 1]} : vector<8x512xf32> to vector<1x512xf32>
    %42 = vector.broadcast %41 : vector<1x512xf32> to vector<8x512xf32>
    %43 = arith.mulf %40, %42 : vector<8x512xf32>
    %44 = vector.extract_strided_slice %16 {offsets = [0, 2], sizes = [8, 1], strides = [1, 1]} : vector<8x9xf32> to vector<8x1xf32>
    %45 = vector.broadcast %44 : vector<8x1xf32> to vector<8x512xf32>
    %46 = arith.mulf %43, %45 : vector<8x512xf32>
    %47 = arith.addf %39, %46 : vector<8x512xf32>
    %c1_i32 = arith.constant 1 : i32
    %48 = tpu.dynamic_rotate %13 by %c1_i32 dim 1 : vector<8x512xf32>, i32 -> vector<8x512xf32>
    %49 = vector.extract_strided_slice %2 {offsets = [3, 0], sizes = [1, 512], strides = [1, 1]} : vector<8x512xf32> to vector<1x512xf32>
    %50 = vector.broadcast %49 : vector<1x512xf32> to vector<8x512xf32>
    %51 = arith.mulf %48, %50 : vector<8x512xf32>
    %52 = vector.extract_strided_slice %16 {offsets = [0, 3], sizes = [8, 1], strides = [1, 1]} : vector<8x9xf32> to vector<8x1xf32>
    %53 = vector.broadcast %52 : vector<8x1xf32> to vector<8x512xf32>
    %54 = arith.mulf %51, %53 : vector<8x512xf32>
    %55 = arith.addf %47, %54 : vector<8x512xf32>
    %c511_i32 = arith.constant 511 : i32
    %56 = tpu.dynamic_rotate %13 by %c511_i32 dim 1 : vector<8x512xf32>, i32 -> vector<8x512xf32>
    %57 = vector.extract_strided_slice %2 {offsets = [4, 0], sizes = [1, 512], strides = [1, 1]} : vector<8x512xf32> to vector<1x512xf32>
    %58 = vector.broadcast %57 : vector<1x512xf32> to vector<8x512xf32>
    %59 = arith.mulf %56, %58 : vector<8x512xf32>
    %60 = vector.extract_strided_slice %16 {offsets = [0, 5], sizes = [8, 1], strides = [1, 1]} : vector<8x9xf32> to vector<8x1xf32>
    %61 = vector.broadcast %60 : vector<8x1xf32> to vector<8x512xf32>
    %62 = arith.mulf %59, %61 : vector<8x512xf32>
    %63 = arith.addf %55, %62 : vector<8x512xf32>
    %c497_i32 = arith.constant 497 : i32
    %64 = tpu.dynamic_rotate %13 by %c497_i32 dim 1 : vector<8x512xf32>, i32 -> vector<8x512xf32>
    %65 = vector.extract_strided_slice %2 {offsets = [5, 0], sizes = [1, 512], strides = [1, 1]} : vector<8x512xf32> to vector<1x512xf32>
    %66 = vector.broadcast %65 : vector<1x512xf32> to vector<8x512xf32>
    %67 = arith.mulf %64, %66 : vector<8x512xf32>
    %68 = vector.extract_strided_slice %16 {offsets = [0, 6], sizes = [8, 1], strides = [1, 1]} : vector<8x9xf32> to vector<8x1xf32>
    %69 = vector.broadcast %68 : vector<8x1xf32> to vector<8x512xf32>
    %70 = arith.mulf %67, %69 : vector<8x512xf32>
    %71 = arith.addf %63, %70 : vector<8x512xf32>
    %c496_i32 = arith.constant 496 : i32
    %72 = tpu.dynamic_rotate %13 by %c496_i32 dim 1 : vector<8x512xf32>, i32 -> vector<8x512xf32>
    %73 = vector.extract_strided_slice %2 {offsets = [6, 0], sizes = [1, 512], strides = [1, 1]} : vector<8x512xf32> to vector<1x512xf32>
    %74 = vector.broadcast %73 : vector<1x512xf32> to vector<8x512xf32>
    %75 = arith.mulf %72, %74 : vector<8x512xf32>
    %76 = vector.extract_strided_slice %16 {offsets = [0, 7], sizes = [8, 1], strides = [1, 1]} : vector<8x9xf32> to vector<8x1xf32>
    %77 = vector.broadcast %76 : vector<8x1xf32> to vector<8x512xf32>
    %78 = arith.mulf %75, %77 : vector<8x512xf32>
    %79 = arith.addf %71, %78 : vector<8x512xf32>
    %c495_i32 = arith.constant 495 : i32
    %80 = tpu.dynamic_rotate %13 by %c495_i32 dim 1 : vector<8x512xf32>, i32 -> vector<8x512xf32>
    %81 = vector.extract_strided_slice %2 {offsets = [7, 0], sizes = [1, 512], strides = [1, 1]} : vector<8x512xf32> to vector<1x512xf32>
    %82 = vector.broadcast %81 : vector<1x512xf32> to vector<8x512xf32>
    %83 = arith.mulf %80, %82 : vector<8x512xf32>
    %84 = vector.extract_strided_slice %16 {offsets = [0, 8], sizes = [8, 1], strides = [1, 1]} : vector<8x9xf32> to vector<8x1xf32>
    %85 = vector.broadcast %84 : vector<8x1xf32> to vector<8x512xf32>
    %86 = arith.mulf %83, %85 : vector<8x512xf32>
    %87 = arith.addf %79, %86 : vector<8x512xf32>
    %cst_20 = arith.constant 0.000000e+00 : f32
    %88 = vector.broadcast %cst_20 : f32 to vector<8x512xf32>
    %89 = arith.maximumf %87, %88 : vector<8x512xf32>
    %c0_21 = arith.constant 0 : index
    %c0_22 = arith.constant 0 : index
    %90 = vector.load %arg11[%c0_21, %c0_22] : memref<56x8xf32, #tpu.memory_space<vmem>>, vector<8x8xf32>
    %cst_23 = arith.constant dense<0.000000e+00> : vector<8x512xf32>
    %91 = tpu.matmul %90, %89, %cst_23 {dimension_numbers = #tpu.dot_dimension_numbers<[1], [0], [0], [1], [0, 0, 1, 1], [], []>} : vector<8x8xf32>, vector<8x512xf32>, vector<8x512xf32> -> vector<8x512xf32>
    %c0_24 = arith.constant 0 : index
    %c0_25 = arith.constant 0 : index
    %92 = vector.load %arg12[%c0_24, %c0_25] : memref<56x1xf32, #tpu.memory_space<vmem>>, vector<8x1xf32>
    %93 = vector.broadcast %92 : vector<8x1xf32> to vector<8x512xf32>
    %94 = arith.addf %91, %93 : vector<8x512xf32>
    %cst_26 = arith.constant 0.000000e+00 : f32
    %95 = vector.broadcast %cst_26 : f32 to vector<8x512xf32>
    %96 = arith.maximumf %94, %95 : vector<8x512xf32>
    %c8 = arith.constant 8 : index
    %c0_27 = arith.constant 0 : index
    %97 = vector.load %arg11[%c8, %c0_27] : memref<56x8xf32, #tpu.memory_space<vmem>>, vector<8x8xf32>
    %cst_28 = arith.constant dense<0.000000e+00> : vector<8x512xf32>
    %98 = tpu.matmul %97, %96, %cst_28 {dimension_numbers = #tpu.dot_dimension_numbers<[1], [0], [0], [1], [0, 0, 1, 1], [], []>} : vector<8x8xf32>, vector<8x512xf32>, vector<8x512xf32> -> vector<8x512xf32>
    %c8_29 = arith.constant 8 : index
    %c0_30 = arith.constant 0 : index
    %99 = vector.load %arg12[%c8_29, %c0_30] : memref<56x1xf32, #tpu.memory_space<vmem>>, vector<8x1xf32>
    %100 = vector.broadcast %99 : vector<8x1xf32> to vector<8x512xf32>
    %101 = arith.addf %98, %100 : vector<8x512xf32>
    %c16 = arith.constant 16 : index
    %c0_31 = arith.constant 0 : index
    %102 = vector.load %arg11[%c16, %c0_31] : memref<56x8xf32, #tpu.memory_space<vmem>>, vector<24x8xf32>
    %cst_32 = arith.constant dense<0.000000e+00> : vector<24x512xf32>
    %103 = tpu.matmul %102, %101, %cst_32 {dimension_numbers = #tpu.dot_dimension_numbers<[1], [0], [0], [1], [0, 0, 1, 1], [], []>} : vector<24x8xf32>, vector<8x512xf32>, vector<24x512xf32> -> vector<24x512xf32>
    %c16_33 = arith.constant 16 : index
    %c0_34 = arith.constant 0 : index
    %104 = vector.load %arg12[%c16_33, %c0_34] : memref<56x1xf32, #tpu.memory_space<vmem>>, vector<24x1xf32>
    %105 = vector.broadcast %104 : vector<24x1xf32> to vector<24x512xf32>
    %106 = arith.addf %103, %105 : vector<24x512xf32>
    %107 = vector.extract_strided_slice %106 {offsets = [0, 0], sizes = [8, 512], strides = [1, 1]} : vector<24x512xf32> to vector<8x512xf32>
    %108 = vector.extract_strided_slice %106 {offsets = [8, 0], sizes = [8, 512], strides = [1, 1]} : vector<24x512xf32> to vector<8x512xf32>
    %109 = vector.extract_strided_slice %106 {offsets = [16, 0], sizes = [8, 512], strides = [1, 1]} : vector<24x512xf32> to vector<8x512xf32>
    %cst_35 = arith.constant dense<0.000000e+00> : vector<8x2xf32>
    %110 = tpu.matmul %108, %3, %cst_35 {dimension_numbers = #tpu.dot_dimension_numbers<[1], [0], [0], [1], [0, 0, 1, 1], [], []>} : vector<8x512xf32>, vector<512x2xf32>, vector<8x2xf32> -> vector<8x2xf32>
    %cst_36 = arith.constant dense<0.000000e+00> : vector<8x2xf32>
    %111 = tpu.matmul %5, %110, %cst_36 {dimension_numbers = #tpu.dot_dimension_numbers<[1], [0], [0], [1], [0, 0, 1, 1], [], []>} : vector<8x8xf32>, vector<8x2xf32>, vector<8x2xf32> -> vector<8x2xf32>
    %112 = arith.negf %111 : vector<8x2xf32>
    %113 = math.exp %112 : vector<8x2xf32>
    %cst_37 = arith.constant 1.000000e+00 : f32
    %114 = vector.broadcast %cst_37 : f32 to vector<8x2xf32>
    %115 = arith.addf %114, %113 : vector<8x2xf32>
    %116 = arith.divf %114, %115 : vector<8x2xf32>
    %cst_38 = arith.constant dense<0.000000e+00> : vector<8x512xf32>
    %117 = tpu.matmul %116, %4, %cst_38 {dimension_numbers = #tpu.dot_dimension_numbers<[1], [0], [0], [1], [0, 0, 1, 1], [], []>} : vector<8x2xf32>, vector<2x512xf32>, vector<8x512xf32> -> vector<8x512xf32>
    %118 = arith.mulf %108, %117 : vector<8x512xf32>
    %119 = tpu.concatenate %107, %118 in 0 : vector<8x512xf32>, vector<8x512xf32> -> vector<16x512xf32>
    %c0_39 = arith.constant 0 : index
    %c0_40 = arith.constant 0 : index
    %120 = vector.load %arg7[%c0_39, %c0_40] : memref<16x9xf32, #tpu.memory_space<vmem>>, vector<16x9xf32>
    %c0_41 = arith.constant 0 : index
    %c0_42 = arith.constant 0 : index
    %121 = vector.load %arg8[%c0_41, %c0_42] : memref<16x1xf32, #tpu.memory_space<vmem>>, vector<16x1xf32>
    %122 = vector.extract_strided_slice %120 {offsets = [0, 4], sizes = [16, 1], strides = [1, 1]} : vector<16x9xf32> to vector<16x1xf32>
    %123 = vector.broadcast %122 : vector<16x1xf32> to vector<16x512xf32>
    %124 = arith.mulf %119, %123 : vector<16x512xf32>
    %125 = vector.broadcast %121 : vector<16x1xf32> to vector<16x512xf32>
    %126 = arith.addf %124, %125 : vector<16x512xf32>
    %c17_i32_43 = arith.constant 17 : i32
    %127 = tpu.dynamic_rotate %119 by %c17_i32_43 dim 1 : vector<16x512xf32>, i32 -> vector<16x512xf32>
    %128 = vector.extract_strided_slice %2 {offsets = [0, 0], sizes = [1, 512], strides = [1, 1]} : vector<8x512xf32> to vector<1x512xf32>
    %129 = vector.broadcast %128 : vector<1x512xf32> to vector<16x512xf32>
    %130 = arith.mulf %127, %129 : vector<16x512xf32>
    %131 = vector.extract_strided_slice %120 {offsets = [0, 0], sizes = [16, 1], strides = [1, 1]} : vector<16x9xf32> to vector<16x1xf32>
    %132 = vector.broadcast %131 : vector<16x1xf32> to vector<16x512xf32>
    %133 = arith.mulf %130, %132 : vector<16x512xf32>
    %134 = arith.addf %126, %133 : vector<16x512xf32>
    %c16_i32_44 = arith.constant 16 : i32
    %135 = tpu.dynamic_rotate %119 by %c16_i32_44 dim 1 : vector<16x512xf32>, i32 -> vector<16x512xf32>
    %136 = vector.extract_strided_slice %2 {offsets = [1, 0], sizes = [1, 512], strides = [1, 1]} : vector<8x512xf32> to vector<1x512xf32>
    %137 = vector.broadcast %136 : vector<1x512xf32> to vector<16x512xf32>
    %138 = arith.mulf %135, %137 : vector<16x512xf32>
    %139 = vector.extract_strided_slice %120 {offsets = [0, 1], sizes = [16, 1], strides = [1, 1]} : vector<16x9xf32> to vector<16x1xf32>
    %140 = vector.broadcast %139 : vector<16x1xf32> to vector<16x512xf32>
    %141 = arith.mulf %138, %140 : vector<16x512xf32>
    %142 = arith.addf %134, %141 : vector<16x512xf32>
    %c15_i32_45 = arith.constant 15 : i32
    %143 = tpu.dynamic_rotate %119 by %c15_i32_45 dim 1 : vector<16x512xf32>, i32 -> vector<16x512xf32>
    %144 = vector.extract_strided_slice %2 {offsets = [2, 0], sizes = [1, 512], strides = [1, 1]} : vector<8x512xf32> to vector<1x512xf32>
    %145 = vector.broadcast %144 : vector<1x512xf32> to vector<16x512xf32>
    %146 = arith.mulf %143, %145 : vector<16x512xf32>
    %147 = vector.extract_strided_slice %120 {offsets = [0, 2], sizes = [16, 1], strides = [1, 1]} : vector<16x9xf32> to vector<16x1xf32>
    %148 = vector.broadcast %147 : vector<16x1xf32> to vector<16x512xf32>
    %149 = arith.mulf %146, %148 : vector<16x512xf32>
    %150 = arith.addf %142, %149 : vector<16x512xf32>
    %c1_i32_46 = arith.constant 1 : i32
    %151 = tpu.dynamic_rotate %119 by %c1_i32_46 dim 1 : vector<16x512xf32>, i32 -> vector<16x512xf32>
    %152 = vector.extract_strided_slice %2 {offsets = [3, 0], sizes = [1, 512], strides = [1, 1]} : vector<8x512xf32> to vector<1x512xf32>
    %153 = vector.broadcast %152 : vector<1x512xf32> to vector<16x512xf32>
    %154 = arith.mulf %151, %153 : vector<16x512xf32>
    %155 = vector.extract_strided_slice %120 {offsets = [0, 3], sizes = [16, 1], strides = [1, 1]} : vector<16x9xf32> to vector<16x1xf32>
    %156 = vector.broadcast %155 : vector<16x1xf32> to vector<16x512xf32>
    %157 = arith.mulf %154, %156 : vector<16x512xf32>
    %158 = arith.addf %150, %157 : vector<16x512xf32>
    %c511_i32_47 = arith.constant 511 : i32
    %159 = tpu.dynamic_rotate %119 by %c511_i32_47 dim 1 : vector<16x512xf32>, i32 -> vector<16x512xf32>
    %160 = vector.extract_strided_slice %2 {offsets = [4, 0], sizes = [1, 512], strides = [1, 1]} : vector<8x512xf32> to vector<1x512xf32>
    %161 = vector.broadcast %160 : vector<1x512xf32> to vector<16x512xf32>
    %162 = arith.mulf %159, %161 : vector<16x512xf32>
    %163 = vector.extract_strided_slice %120 {offsets = [0, 5], sizes = [16, 1], strides = [1, 1]} : vector<16x9xf32> to vector<16x1xf32>
    %164 = vector.broadcast %163 : vector<16x1xf32> to vector<16x512xf32>
    %165 = arith.mulf %162, %164 : vector<16x512xf32>
    %166 = arith.addf %158, %165 : vector<16x512xf32>
    %c497_i32_48 = arith.constant 497 : i32
    %167 = tpu.dynamic_rotate %119 by %c497_i32_48 dim 1 : vector<16x512xf32>, i32 -> vector<16x512xf32>
    %168 = vector.extract_strided_slice %2 {offsets = [5, 0], sizes = [1, 512], strides = [1, 1]} : vector<8x512xf32> to vector<1x512xf32>
    %169 = vector.broadcast %168 : vector<1x512xf32> to vector<16x512xf32>
    %170 = arith.mulf %167, %169 : vector<16x512xf32>
    %171 = vector.extract_strided_slice %120 {offsets = [0, 6], sizes = [16, 1], strides = [1, 1]} : vector<16x9xf32> to vector<16x1xf32>
    %172 = vector.broadcast %171 : vector<16x1xf32> to vector<16x512xf32>
    %173 = arith.mulf %170, %172 : vector<16x512xf32>
    %174 = arith.addf %166, %173 : vector<16x512xf32>
    %c496_i32_49 = arith.constant 496 : i32
    %175 = tpu.dynamic_rotate %119 by %c496_i32_49 dim 1 : vector<16x512xf32>, i32 -> vector<16x512xf32>
    %176 = vector.extract_strided_slice %2 {offsets = [6, 0], sizes = [1, 512], strides = [1, 1]} : vector<8x512xf32> to vector<1x512xf32>
    %177 = vector.broadcast %176 : vector<1x512xf32> to vector<16x512xf32>
    %178 = arith.mulf %175, %177 : vector<16x512xf32>
    %179 = vector.extract_strided_slice %120 {offsets = [0, 7], sizes = [16, 1], strides = [1, 1]} : vector<16x9xf32> to vector<16x1xf32>
    %180 = vector.broadcast %179 : vector<16x1xf32> to vector<16x512xf32>
    %181 = arith.mulf %178, %180 : vector<16x512xf32>
    %182 = arith.addf %174, %181 : vector<16x512xf32>
    %c495_i32_50 = arith.constant 495 : i32
    %183 = tpu.dynamic_rotate %119 by %c495_i32_50 dim 1 : vector<16x512xf32>, i32 -> vector<16x512xf32>
    %184 = vector.extract_strided_slice %2 {offsets = [7, 0], sizes = [1, 512], strides = [1, 1]} : vector<8x512xf32> to vector<1x512xf32>
    %185 = vector.broadcast %184 : vector<1x512xf32> to vector<16x512xf32>
    %186 = arith.mulf %183, %185 : vector<16x512xf32>
    %187 = vector.extract_strided_slice %120 {offsets = [0, 8], sizes = [16, 1], strides = [1, 1]} : vector<16x9xf32> to vector<16x1xf32>
    %188 = vector.broadcast %187 : vector<16x1xf32> to vector<16x512xf32>
    %189 = arith.mulf %186, %188 : vector<16x512xf32>
    %190 = arith.addf %182, %189 : vector<16x512xf32>
    %cst_51 = arith.constant 0.000000e+00 : f32
    %191 = vector.broadcast %cst_51 : f32 to vector<16x512xf32>
    %192 = arith.maximumf %190, %191 : vector<16x512xf32>
    %c0_52 = arith.constant 0 : index
    %c0_53 = arith.constant 0 : index
    %193 = vector.load %arg9[%c0_52, %c0_53] : memref<2x16xf32, #tpu.memory_space<vmem>>, vector<2x16xf32>
    %cst_54 = arith.constant dense<0.000000e+00> : vector<2x512xf32>
    %194 = tpu.matmul %193, %192, %cst_54 {dimension_numbers = #tpu.dot_dimension_numbers<[1], [0], [0], [1], [0, 0, 1, 1], [], []>} : vector<2x16xf32>, vector<16x512xf32>, vector<2x512xf32> -> vector<2x512xf32>
    %c0_55 = arith.constant 0 : index
    %c0_56 = arith.constant 0 : index
    %195 = vector.load %arg10[%c0_55, %c0_56] : memref<2x1xf32, #tpu.memory_space<vmem>>, vector<2x1xf32>
    %196 = vector.broadcast %195 : vector<2x1xf32> to vector<2x512xf32>
    %197 = arith.addf %194, %196 : vector<2x512xf32>
    %198 = arith.negf %197 : vector<2x512xf32>
    %199 = math.exp %198 : vector<2x512xf32>
    %cst_57 = arith.constant 1.000000e+00 : f32
    %200 = vector.broadcast %cst_57 : f32 to vector<2x512xf32>
    %201 = arith.addf %200, %199 : vector<2x512xf32>
    %202 = arith.divf %200, %201 : vector<2x512xf32>
    %203 = vector.extract_strided_slice %202 {offsets = [0, 0], sizes = [1, 512], strides = [1, 1]} : vector<2x512xf32> to vector<1x512xf32>
    %204 = vector.broadcast %203 : vector<1x512xf32> to vector<8x512xf32>
    %205 = arith.mulf %107, %204 : vector<8x512xf32>
    %206 = vector.extract_strided_slice %202 {offsets = [1, 0], sizes = [1, 512], strides = [1, 1]} : vector<2x512xf32> to vector<1x512xf32>
    %207 = vector.broadcast %206 : vector<1x512xf32> to vector<8x512xf32>
    %208 = arith.mulf %118, %207 : vector<8x512xf32>
    %cst_58 = arith.constant dense<0.000000e+00> : vector<8x2xf32>
    %209 = tpu.matmul %205, %3, %cst_58 {dimension_numbers = #tpu.dot_dimension_numbers<[1], [0], [0], [1], [0, 0, 1, 1], [], []>} : vector<8x512xf32>, vector<512x2xf32>, vector<8x2xf32> -> vector<8x2xf32>
    %cst_59 = arith.constant dense<0.000000e+00> : vector<8x2xf32>
    %210 = tpu.matmul %5, %209, %cst_59 {dimension_numbers = #tpu.dot_dimension_numbers<[1], [0], [0], [1], [0, 0, 1, 1], [], []>} : vector<8x8xf32>, vector<8x2xf32>, vector<8x2xf32> -> vector<8x2xf32>
    %211 = arith.negf %210 : vector<8x2xf32>
    %212 = math.exp %211 : vector<8x2xf32>
    %cst_60 = arith.constant 1.000000e+00 : f32
    %213 = vector.broadcast %cst_60 : f32 to vector<8x2xf32>
    %214 = arith.addf %213, %212 : vector<8x2xf32>
    %215 = arith.divf %213, %214 : vector<8x2xf32>
    %cst_61 = arith.constant dense<0.000000e+00> : vector<8x512xf32>
    %216 = tpu.matmul %215, %4, %cst_61 {dimension_numbers = #tpu.dot_dimension_numbers<[1], [0], [0], [1], [0, 0, 1, 1], [], []>} : vector<8x2xf32>, vector<2x512xf32>, vector<8x512xf32> -> vector<8x512xf32>
    %217 = arith.mulf %205, %216 : vector<8x512xf32>
    %218 = arith.addf %217, %208 : vector<8x512xf32>
    %c1 = arith.constant 1 : index
    %c0_62 = arith.constant 0 : index
    %c0_63 = arith.constant 0 : index
    %219 = vector.load %arg5[%c1, %c0_62, %c0_63] : memref<3x8x9xf32, #tpu.memory_space<vmem>>, vector<1x8x9xf32>
    %220 = vector.shape_cast %219 : vector<1x8x9xf32> to vector<8x9xf32>
    %c1_64 = arith.constant 1 : index
    %c0_65 = arith.constant 0 : index
    %c0_66 = arith.constant 0 : index
    %221 = vector.load %arg6[%c1_64, %c0_65, %c0_66] : memref<3x8x1xf32, #tpu.memory_space<vmem>>, vector<1x8x1xf32>
    %222 = vector.shape_cast %221 : vector<1x8x1xf32> to vector<8x1xf32>
    %223 = vector.extract_strided_slice %220 {offsets = [0, 4], sizes = [8, 1], strides = [1, 1]} : vector<8x9xf32> to vector<8x1xf32>
    %224 = vector.broadcast %223 : vector<8x1xf32> to vector<8x512xf32>
    %225 = arith.mulf %218, %224 : vector<8x512xf32>
    %226 = vector.broadcast %222 : vector<8x1xf32> to vector<8x512xf32>
    %227 = arith.addf %225, %226 : vector<8x512xf32>
    %c17_i32_67 = arith.constant 17 : i32
    %228 = tpu.dynamic_rotate %218 by %c17_i32_67 dim 1 : vector<8x512xf32>, i32 -> vector<8x512xf32>
    %229 = vector.extract_strided_slice %2 {offsets = [0, 0], sizes = [1, 512], strides = [1, 1]} : vector<8x512xf32> to vector<1x512xf32>
    %230 = vector.broadcast %229 : vector<1x512xf32> to vector<8x512xf32>
    %231 = arith.mulf %228, %230 : vector<8x512xf32>
    %232 = vector.extract_strided_slice %220 {offsets = [0, 0], sizes = [8, 1], strides = [1, 1]} : vector<8x9xf32> to vector<8x1xf32>
    %233 = vector.broadcast %232 : vector<8x1xf32> to vector<8x512xf32>
    %234 = arith.mulf %231, %233 : vector<8x512xf32>
    %235 = arith.addf %227, %234 : vector<8x512xf32>
    %c16_i32_68 = arith.constant 16 : i32
    %236 = tpu.dynamic_rotate %218 by %c16_i32_68 dim 1 : vector<8x512xf32>, i32 -> vector<8x512xf32>
    %237 = vector.extract_strided_slice %2 {offsets = [1, 0], sizes = [1, 512], strides = [1, 1]} : vector<8x512xf32> to vector<1x512xf32>
    %238 = vector.broadcast %237 : vector<1x512xf32> to vector<8x512xf32>
    %239 = arith.mulf %236, %238 : vector<8x512xf32>
    %240 = vector.extract_strided_slice %220 {offsets = [0, 1], sizes = [8, 1], strides = [1, 1]} : vector<8x9xf32> to vector<8x1xf32>
    %241 = vector.broadcast %240 : vector<8x1xf32> to vector<8x512xf32>
    %242 = arith.mulf %239, %241 : vector<8x512xf32>
    %243 = arith.addf %235, %242 : vector<8x512xf32>
    %c15_i32_69 = arith.constant 15 : i32
    %244 = tpu.dynamic_rotate %218 by %c15_i32_69 dim 1 : vector<8x512xf32>, i32 -> vector<8x512xf32>
    %245 = vector.extract_strided_slice %2 {offsets = [2, 0], sizes = [1, 512], strides = [1, 1]} : vector<8x512xf32> to vector<1x512xf32>
    %246 = vector.broadcast %245 : vector<1x512xf32> to vector<8x512xf32>
    %247 = arith.mulf %244, %246 : vector<8x512xf32>
    %248 = vector.extract_strided_slice %220 {offsets = [0, 2], sizes = [8, 1], strides = [1, 1]} : vector<8x9xf32> to vector<8x1xf32>
    %249 = vector.broadcast %248 : vector<8x1xf32> to vector<8x512xf32>
    %250 = arith.mulf %247, %249 : vector<8x512xf32>
    %251 = arith.addf %243, %250 : vector<8x512xf32>
    %c1_i32_70 = arith.constant 1 : i32
    %252 = tpu.dynamic_rotate %218 by %c1_i32_70 dim 1 : vector<8x512xf32>, i32 -> vector<8x512xf32>
    %253 = vector.extract_strided_slice %2 {offsets = [3, 0], sizes = [1, 512], strides = [1, 1]} : vector<8x512xf32> to vector<1x512xf32>
    %254 = vector.broadcast %253 : vector<1x512xf32> to vector<8x512xf32>
    %255 = arith.mulf %252, %254 : vector<8x512xf32>
    %256 = vector.extract_strided_slice %220 {offsets = [0, 3], sizes = [8, 1], strides = [1, 1]} : vector<8x9xf32> to vector<8x1xf32>
    %257 = vector.broadcast %256 : vector<8x1xf32> to vector<8x512xf32>
    %258 = arith.mulf %255, %257 : vector<8x512xf32>
    %259 = arith.addf %251, %258 : vector<8x512xf32>
    %c511_i32_71 = arith.constant 511 : i32
    %260 = tpu.dynamic_rotate %218 by %c511_i32_71 dim 1 : vector<8x512xf32>, i32 -> vector<8x512xf32>
    %261 = vector.extract_strided_slice %2 {offsets = [4, 0], sizes = [1, 512], strides = [1, 1]} : vector<8x512xf32> to vector<1x512xf32>
    %262 = vector.broadcast %261 : vector<1x512xf32> to vector<8x512xf32>
    %263 = arith.mulf %260, %262 : vector<8x512xf32>
    %264 = vector.extract_strided_slice %220 {offsets = [0, 5], sizes = [8, 1], strides = [1, 1]} : vector<8x9xf32> to vector<8x1xf32>
    %265 = vector.broadcast %264 : vector<8x1xf32> to vector<8x512xf32>
    %266 = arith.mulf %263, %265 : vector<8x512xf32>
    %267 = arith.addf %259, %266 : vector<8x512xf32>
    %c497_i32_72 = arith.constant 497 : i32
    %268 = tpu.dynamic_rotate %218 by %c497_i32_72 dim 1 : vector<8x512xf32>, i32 -> vector<8x512xf32>
    %269 = vector.extract_strided_slice %2 {offsets = [5, 0], sizes = [1, 512], strides = [1, 1]} : vector<8x512xf32> to vector<1x512xf32>
    %270 = vector.broadcast %269 : vector<1x512xf32> to vector<8x512xf32>
    %271 = arith.mulf %268, %270 : vector<8x512xf32>
    %272 = vector.extract_strided_slice %220 {offsets = [0, 6], sizes = [8, 1], strides = [1, 1]} : vector<8x9xf32> to vector<8x1xf32>
    %273 = vector.broadcast %272 : vector<8x1xf32> to vector<8x512xf32>
    %274 = arith.mulf %271, %273 : vector<8x512xf32>
    %275 = arith.addf %267, %274 : vector<8x512xf32>
    %c496_i32_73 = arith.constant 496 : i32
    %276 = tpu.dynamic_rotate %218 by %c496_i32_73 dim 1 : vector<8x512xf32>, i32 -> vector<8x512xf32>
    %277 = vector.extract_strided_slice %2 {offsets = [6, 0], sizes = [1, 512], strides = [1, 1]} : vector<8x512xf32> to vector<1x512xf32>
    %278 = vector.broadcast %277 : vector<1x512xf32> to vector<8x512xf32>
    %279 = arith.mulf %276, %278 : vector<8x512xf32>
    %280 = vector.extract_strided_slice %220 {offsets = [0, 7], sizes = [8, 1], strides = [1, 1]} : vector<8x9xf32> to vector<8x1xf32>
    %281 = vector.broadcast %280 : vector<8x1xf32> to vector<8x512xf32>
    %282 = arith.mulf %279, %281 : vector<8x512xf32>
    %283 = arith.addf %275, %282 : vector<8x512xf32>
    %c495_i32_74 = arith.constant 495 : i32
    %284 = tpu.dynamic_rotate %218 by %c495_i32_74 dim 1 : vector<8x512xf32>, i32 -> vector<8x512xf32>
    %285 = vector.extract_strided_slice %2 {offsets = [7, 0], sizes = [1, 512], strides = [1, 1]} : vector<8x512xf32> to vector<1x512xf32>
    %286 = vector.broadcast %285 : vector<1x512xf32> to vector<8x512xf32>
    %287 = arith.mulf %284, %286 : vector<8x512xf32>
    %288 = vector.extract_strided_slice %220 {offsets = [0, 8], sizes = [8, 1], strides = [1, 1]} : vector<8x9xf32> to vector<8x1xf32>
    %289 = vector.broadcast %288 : vector<8x1xf32> to vector<8x512xf32>
    %290 = arith.mulf %287, %289 : vector<8x512xf32>
    %291 = arith.addf %283, %290 : vector<8x512xf32>
    %292 = arith.mulf %291, %109 : vector<8x512xf32>
    %c2 = arith.constant 2 : index
    %c0_75 = arith.constant 0 : index
    %c0_76 = arith.constant 0 : index
    %293 = vector.load %arg5[%c2, %c0_75, %c0_76] : memref<3x8x9xf32, #tpu.memory_space<vmem>>, vector<1x8x9xf32>
    %294 = vector.shape_cast %293 : vector<1x8x9xf32> to vector<8x9xf32>
    %c2_77 = arith.constant 2 : index
    %c0_78 = arith.constant 0 : index
    %c0_79 = arith.constant 0 : index
    %295 = vector.load %arg6[%c2_77, %c0_78, %c0_79] : memref<3x8x1xf32, #tpu.memory_space<vmem>>, vector<1x8x1xf32>
    %296 = vector.shape_cast %295 : vector<1x8x1xf32> to vector<8x1xf32>
    %297 = vector.extract_strided_slice %294 {offsets = [0, 4], sizes = [8, 1], strides = [1, 1]} : vector<8x9xf32> to vector<8x1xf32>
    %298 = vector.broadcast %297 : vector<8x1xf32> to vector<8x512xf32>
    %299 = arith.mulf %292, %298 : vector<8x512xf32>
    %300 = vector.broadcast %296 : vector<8x1xf32> to vector<8x512xf32>
    %301 = arith.addf %299, %300 : vector<8x512xf32>
    %c17_i32_80 = arith.constant 17 : i32
    %302 = tpu.dynamic_rotate %292 by %c17_i32_80 dim 1 : vector<8x512xf32>, i32 -> vector<8x512xf32>
    %303 = vector.extract_strided_slice %2 {offsets = [0, 0], sizes = [1, 512], strides = [1, 1]} : vector<8x512xf32> to vector<1x512xf32>
    %304 = vector.broadcast %303 : vector<1x512xf32> to vector<8x512xf32>
    %305 = arith.mulf %302, %304 : vector<8x512xf32>
    %306 = vector.extract_strided_slice %294 {offsets = [0, 0], sizes = [8, 1], strides = [1, 1]} : vector<8x9xf32> to vector<8x1xf32>
    %307 = vector.broadcast %306 : vector<8x1xf32> to vector<8x512xf32>
    %308 = arith.mulf %305, %307 : vector<8x512xf32>
    %309 = arith.addf %301, %308 : vector<8x512xf32>
    %c16_i32_81 = arith.constant 16 : i32
    %310 = tpu.dynamic_rotate %292 by %c16_i32_81 dim 1 : vector<8x512xf32>, i32 -> vector<8x512xf32>
    %311 = vector.extract_strided_slice %2 {offsets = [1, 0], sizes = [1, 512], strides = [1, 1]} : vector<8x512xf32> to vector<1x512xf32>
    %312 = vector.broadcast %311 : vector<1x512xf32> to vector<8x512xf32>
    %313 = arith.mulf %310, %312 : vector<8x512xf32>
    %314 = vector.extract_strided_slice %294 {offsets = [0, 1], sizes = [8, 1], strides = [1, 1]} : vector<8x9xf32> to vector<8x1xf32>
    %315 = vector.broadcast %314 : vector<8x1xf32> to vector<8x512xf32>
    %316 = arith.mulf %313, %315 : vector<8x512xf32>
    %317 = arith.addf %309, %316 : vector<8x512xf32>
    %c15_i32_82 = arith.constant 15 : i32
    %318 = tpu.dynamic_rotate %292 by %c15_i32_82 dim 1 : vector<8x512xf32>, i32 -> vector<8x512xf32>
    %319 = vector.extract_strided_slice %2 {offsets = [2, 0], sizes = [1, 512], strides = [1, 1]} : vector<8x512xf32> to vector<1x512xf32>
    %320 = vector.broadcast %319 : vector<1x512xf32> to vector<8x512xf32>
    %321 = arith.mulf %318, %320 : vector<8x512xf32>
    %322 = vector.extract_strided_slice %294 {offsets = [0, 2], sizes = [8, 1], strides = [1, 1]} : vector<8x9xf32> to vector<8x1xf32>
    %323 = vector.broadcast %322 : vector<8x1xf32> to vector<8x512xf32>
    %324 = arith.mulf %321, %323 : vector<8x512xf32>
    %325 = arith.addf %317, %324 : vector<8x512xf32>
    %c1_i32_83 = arith.constant 1 : i32
    %326 = tpu.dynamic_rotate %292 by %c1_i32_83 dim 1 : vector<8x512xf32>, i32 -> vector<8x512xf32>
    %327 = vector.extract_strided_slice %2 {offsets = [3, 0], sizes = [1, 512], strides = [1, 1]} : vector<8x512xf32> to vector<1x512xf32>
    %328 = vector.broadcast %327 : vector<1x512xf32> to vector<8x512xf32>
    %329 = arith.mulf %326, %328 : vector<8x512xf32>
    %330 = vector.extract_strided_slice %294 {offsets = [0, 3], sizes = [8, 1], strides = [1, 1]} : vector<8x9xf32> to vector<8x1xf32>
    %331 = vector.broadcast %330 : vector<8x1xf32> to vector<8x512xf32>
    %332 = arith.mulf %329, %331 : vector<8x512xf32>
    %333 = arith.addf %325, %332 : vector<8x512xf32>
    %c511_i32_84 = arith.constant 511 : i32
    %334 = tpu.dynamic_rotate %292 by %c511_i32_84 dim 1 : vector<8x512xf32>, i32 -> vector<8x512xf32>
    %335 = vector.extract_strided_slice %2 {offsets = [4, 0], sizes = [1, 512], strides = [1, 1]} : vector<8x512xf32> to vector<1x512xf32>
    %336 = vector.broadcast %335 : vector<1x512xf32> to vector<8x512xf32>
    %337 = arith.mulf %334, %336 : vector<8x512xf32>
    %338 = vector.extract_strided_slice %294 {offsets = [0, 5], sizes = [8, 1], strides = [1, 1]} : vector<8x9xf32> to vector<8x1xf32>
    %339 = vector.broadcast %338 : vector<8x1xf32> to vector<8x512xf32>
    %340 = arith.mulf %337, %339 : vector<8x512xf32>
    %341 = arith.addf %333, %340 : vector<8x512xf32>
    %c497_i32_85 = arith.constant 497 : i32
    %342 = tpu.dynamic_rotate %292 by %c497_i32_85 dim 1 : vector<8x512xf32>, i32 -> vector<8x512xf32>
    %343 = vector.extract_strided_slice %2 {offsets = [5, 0], sizes = [1, 512], strides = [1, 1]} : vector<8x512xf32> to vector<1x512xf32>
    %344 = vector.broadcast %343 : vector<1x512xf32> to vector<8x512xf32>
    %345 = arith.mulf %342, %344 : vector<8x512xf32>
    %346 = vector.extract_strided_slice %294 {offsets = [0, 6], sizes = [8, 1], strides = [1, 1]} : vector<8x9xf32> to vector<8x1xf32>
    %347 = vector.broadcast %346 : vector<8x1xf32> to vector<8x512xf32>
    %348 = arith.mulf %345, %347 : vector<8x512xf32>
    %349 = arith.addf %341, %348 : vector<8x512xf32>
    %c496_i32_86 = arith.constant 496 : i32
    %350 = tpu.dynamic_rotate %292 by %c496_i32_86 dim 1 : vector<8x512xf32>, i32 -> vector<8x512xf32>
    %351 = vector.extract_strided_slice %2 {offsets = [6, 0], sizes = [1, 512], strides = [1, 1]} : vector<8x512xf32> to vector<1x512xf32>
    %352 = vector.broadcast %351 : vector<1x512xf32> to vector<8x512xf32>
    %353 = arith.mulf %350, %352 : vector<8x512xf32>
    %354 = vector.extract_strided_slice %294 {offsets = [0, 7], sizes = [8, 1], strides = [1, 1]} : vector<8x9xf32> to vector<8x1xf32>
    %355 = vector.broadcast %354 : vector<8x1xf32> to vector<8x512xf32>
    %356 = arith.mulf %353, %355 : vector<8x512xf32>
    %357 = arith.addf %349, %356 : vector<8x512xf32>
    %c495_i32_87 = arith.constant 495 : i32
    %358 = tpu.dynamic_rotate %292 by %c495_i32_87 dim 1 : vector<8x512xf32>, i32 -> vector<8x512xf32>
    %359 = vector.extract_strided_slice %2 {offsets = [7, 0], sizes = [1, 512], strides = [1, 1]} : vector<8x512xf32> to vector<1x512xf32>
    %360 = vector.broadcast %359 : vector<1x512xf32> to vector<8x512xf32>
    %361 = arith.mulf %358, %360 : vector<8x512xf32>
    %362 = vector.extract_strided_slice %294 {offsets = [0, 8], sizes = [8, 1], strides = [1, 1]} : vector<8x9xf32> to vector<8x1xf32>
    %363 = vector.broadcast %362 : vector<8x1xf32> to vector<8x512xf32>
    %364 = arith.mulf %361, %363 : vector<8x512xf32>
    %365 = arith.addf %357, %364 : vector<8x512xf32>
    %c48 = arith.constant 48 : index
    %c0_88 = arith.constant 0 : index
    %366 = vector.load %arg11[%c48, %c0_88] : memref<56x8xf32, #tpu.memory_space<vmem>>, vector<8x8xf32>
    %cst_89 = arith.constant dense<0.000000e+00> : vector<8x512xf32>
    %367 = tpu.matmul %366, %365, %cst_89 {dimension_numbers = #tpu.dot_dimension_numbers<[1], [0], [0], [1], [0, 0, 1, 1], [], []>} : vector<8x8xf32>, vector<8x512xf32>, vector<8x512xf32> -> vector<8x512xf32>
    %c48_90 = arith.constant 48 : index
    %c0_91 = arith.constant 0 : index
    %368 = vector.load %arg12[%c48_90, %c0_91] : memref<56x1xf32, #tpu.memory_space<vmem>>, vector<8x1xf32>
    %369 = vector.broadcast %368 : vector<8x1xf32> to vector<8x512xf32>
    %370 = arith.addf %367, %369 : vector<8x512xf32>
    %cst_92 = arith.constant 0.000000e+00 : f32
    %371 = vector.broadcast %cst_92 : f32 to vector<8x512xf32>
    %372 = arith.maximumf %370, %371 : vector<8x512xf32>
    %373 = arith.addf %372, %14 : vector<8x512xf32>
    %c0_93 = arith.constant 0 : index
    %c0_94 = arith.constant 0 : index
    %c0_95 = arith.constant 0 : index
    %374 = vector.load %arg15[%c0_93, %c0_94, %c0_95] : memref<1x8x512xf32, #tpu.memory_space<vmem>>, vector<1x8x512xf32>
    %375 = vector.shape_cast %374 : vector<1x8x512xf32> to vector<8x512xf32>
    %376 = vector.shape_cast %373 : vector<8x512xf32> to vector<1x8x512xf32>
    tpu.vector_store %arg15[%c0_93, %c0_94, %c0_95], %376 {strides = array<i32>} : memref<1x8x512xf32, #tpu.memory_space<vmem>>, vector<1x8x512xf32>,
    return
  }
  func.func @transform_0(%arg0: i32) -> (i32, i32, i32) {
    %c0_i32 = arith.constant 0 : i32
    %c0_i32_0 = arith.constant 0 : i32
    %c0_i32_1 = arith.constant 0 : i32
    return %arg0, %c0_i32, %c0_i32_0 : i32, i32, i32
  }
  func.func @transform_1(%arg0: i32) -> (i32, i32) {
    %c0_i32 = arith.constant 0 : i32
    %c0_i32_0 = arith.constant 0 : i32
    %c0_i32_1 = arith.constant 0 : i32
    return %c0_i32, %c0_i32_0 : i32, i32
  }
  func.func @transform_2(%arg0: i32) -> (i32, i32) {
    %c0_i32 = arith.constant 0 : i32
    %c0_i32_0 = arith.constant 0 : i32
    %c0_i32_1 = arith.constant 0 : i32
    return %c0_i32, %c0_i32_0 : i32, i32
  }
  func.func @transform_3(%arg0: i32) -> (i32, i32) {
    %c0_i32 = arith.constant 0 : i32
    %c0_i32_0 = arith.constant 0 : i32
    %c0_i32_1 = arith.constant 0 : i32
    return %c0_i32, %c0_i32_0 : i32, i32
  }
  func.func @transform_4(%arg0: i32) -> (i32, i32, i32) {
    %c0_i32 = arith.constant 0 : i32
    %c0_i32_0 = arith.constant 0 : i32
    %c0_i32_1 = arith.constant 0 : i32
    %c0_i32_2 = arith.constant 0 : i32
    return %c0_i32, %c0_i32_0, %c0_i32_1 : i32, i32, i32
  }
  func.func @transform_5(%arg0: i32) -> (i32, i32, i32) {
    %c0_i32 = arith.constant 0 : i32
    %c0_i32_0 = arith.constant 0 : i32
    %c0_i32_1 = arith.constant 0 : i32
    %c0_i32_2 = arith.constant 0 : i32
    return %c0_i32, %c0_i32_0, %c0_i32_1 : i32, i32, i32
  }
  func.func @transform_6(%arg0: i32) -> (i32, i32) {
    %c0_i32 = arith.constant 0 : i32
    %c0_i32_0 = arith.constant 0 : i32
    %c0_i32_1 = arith.constant 0 : i32
    return %c0_i32, %c0_i32_0 : i32, i32
  }
  func.func @transform_7(%arg0: i32) -> (i32, i32) {
    %c0_i32 = arith.constant 0 : i32
    %c0_i32_0 = arith.constant 0 : i32
    %c0_i32_1 = arith.constant 0 : i32
    return %c0_i32, %c0_i32_0 : i32, i32
  }
  func.func @transform_8(%arg0: i32) -> (i32, i32) {
    %c0_i32 = arith.constant 0 : i32
    %c0_i32_0 = arith.constant 0 : i32
    %c0_i32_1 = arith.constant 0 : i32
    return %c0_i32, %c0_i32_0 : i32, i32
  }
  func.func @transform_9(%arg0: i32) -> (i32, i32) {
    %c0_i32 = arith.constant 0 : i32
    %c0_i32_0 = arith.constant 0 : i32
    %c0_i32_1 = arith.constant 0 : i32
    return %c0_i32, %c0_i32_0 : i32, i32
  }
  func.func @transform_10(%arg0: i32) -> (i32, i32) {
    %c0_i32 = arith.constant 0 : i32
    %c0_i32_0 = arith.constant 0 : i32
    %c0_i32_1 = arith.constant 0 : i32
    return %c0_i32, %c0_i32_0 : i32, i32
  }
  func.func @transform_11(%arg0: i32) -> (i32, i32) {
    %c0_i32 = arith.constant 0 : i32
    %c0_i32_0 = arith.constant 0 : i32
    %c0_i32_1 = arith.constant 0 : i32
    return %c0_i32, %c0_i32_0 : i32, i32
  }
  func.func @transform_12(%arg0: i32) -> (i32, i32) {
    %c0_i32 = arith.constant 0 : i32
    %c0_i32_0 = arith.constant 0 : i32
    %c0_i32_1 = arith.constant 0 : i32
    return %c0_i32, %c0_i32_0 : i32, i32
  }
  func.func @transform_13(%arg0: i32) -> (i32, i32) {
    %c0_i32 = arith.constant 0 : i32
    %c0_i32_0 = arith.constant 0 : i32
    %c0_i32_1 = arith.constant 0 : i32
    return %c0_i32, %c0_i32_0 : i32, i32
  }
  func.func @transform_14(%arg0: i32) -> (i32, i32, i32) {
    %c0_i32 = arith.constant 0 : i32
    %c0_i32_0 = arith.constant 0 : i32
    %c0_i32_1 = arith.constant 0 : i32
    return %arg0, %c0_i32, %c0_i32_0 : i32, i32, i32
  }
}

</mosaic_0001>

<bundles_post_ra>
// kernel: tpu_custom_call.1
= control target key start
LH: loop header
LB: loop body
LE: loop exit
PB: predicated region body
PF: predicated region fallthrough
CT: control target
= control target key end

     0   :  { %v6221_v7 = vmov 0.0   ;;  %v6215_v12 = vmov 0   ;;  %vm140_vm0 = vcmask 130048   ;;  %s6188_s0 = inlined_call_operand.vmem [shape: f32[1,16,512], index: 0, kind: input, shape index: {}]   ;;  %s6189_s1 = inlined_call_operand.vmem [shape: f32[8,512], index: 1, kind: input, shape index: {}]   ;;  %s6190_s2 = inlined_call_operand.vmem [shape: f32[512,2], index: 2, kind: input, shape index: {}]   ;;  %s6191_s3 = inlined_call_operand.vmem [shape: f32[2,512], index: 3, kind: input, shape index: {}]   ;;  %s6192_s4 = inlined_call_operand.vmem [shape: f32[3,8,9], index: 4, kind: input, shape index: {}]   ;;  %s6193_s5 = inlined_call_operand.vmem [shape: f32[3,8,1], index: 5, kind: input, shape index: {}]   ;;  %s6194_s6 = inlined_call_operand.vmem [shape: f32[16,9], index: 6, kind: input, shape index: {}]   ;;  %s6195_s7 = inlined_call_operand.vmem [shape: f32[16,1], index: 7, kind: input, shape index: {}]   ;;  %s6196_s8 = inlined_call_operand.vmem [shape: f32[2,16], index: 8, kind: input, shape index: {}]   ;;  %s6197_s9 = inlined_call_operand.vmem [shape: f32[2,1], index: 9, kind: input, shape index: {}]   ;;  %s6198_s10 = inlined_call_operand.vmem [shape: f32[56,8], index: 10, kind: input, shape index: {}]   ;;  %s6199_s11 = inlined_call_operand.vmem [shape: f32[56,1], index: 11, kind: input, shape index: {}]   ;;  %s6200_s12 = inlined_call_operand.vmem [shape: f32[16,16], index: 12, kind: input, shape index: {}]   ;;  %s6201_s13 = inlined_call_operand.vmem [shape: f32[16,1], index: 13, kind: input, shape index: {}]   ;;  %s6202_s14 = inlined_call_operand.hbm [shape: f32[1,8,512], index: 14, kind: output, shape index: {}]  }
   0x1   :  { %v49_v0 = vld [vmem:[%s6188_s0 + $0x8] sm:$0xff]  ;;  %v51_v2 = vld [vmem:[%s6188_s0 + $0x18] sm:$0xff]  ;;  %v48_v5 = vld [vmem:[%s6188_s0] sm:$0xff]  ;;  %211 = vmatprep.mubr.f32.mxu0 %v6221_v7  ;;  %288 = vmatprep.mubr.f32.mxu1 %v6221_v7 }
   0x2   :  { %v53_v1 = vld [vmem:[%s6188_s0 + $0x28] sm:$0xff]  ;;  %v55_v4 = vld [vmem:[%s6188_s0 + $0x38] sm:$0xff]  ;;  %v52_v6 = vld [vmem:[%s6188_s0 + $0x20] sm:$0xff]  ;;  %3708 = vset.pattern.permute.xlu0 %v6215_v12  ;;  %3710 = vset.pattern.permute.xlu1 %v6215_v12 }
   0x3   :  { %v3543_v3 = vpack.c.bf16 %v53_v1, %v49_v0  ;;  %v3547_v8 = vpack.c.bf16 %v55_v4, %v51_v2  ;;  %v3545_v9 = vpack.c.bf16 %v52_v6, %v48_v5  ;;  %v50_v10 = vld [vmem:[%s6188_s0 + $0x10] sm:$0xff]  ;;  %v128_v14 = vld [vmem:[%s6201_s13] sm:$0xff] }
   0x4   :  { %v54_v11 = vld [vmem:[%s6188_s0 + $0x30] sm:$0xff]  ;;  %v306_v15 = vld [vmem:[%s6193_s5] sm:$0xff] }
   0x5   :  { %3544 = vmatprep.subr.bf16.mxu0 %v3543_v3  ;;  %v3549_v13 = vpack.c.bf16 %v54_v11, %v50_v10  ;;  %3548 = vmatprep.subr.bf16.mxu1 %v3547_v8  ;;  %v126_v16 = vld [vmem:[%s6200_s12] sm:$0xff] }
   0x6   :  { %3546 = vmatpush1.bf16.msra.mxu0 %v3545_v9 }
   0x7   :  { %19 = vsyncpa [#allocation3], 0  ;;  %3550 = vmatpush1.bf16.msra.mxu1 %v3549_v13  ;;  %132 = vperm.xlu0 %3708, %v128_v14   ;;  %v305_v17 = vld [vmem:[%s6192_s4] sm:$0xff]  ;;  %v6219_v18 = vmov 4   ;;  %v6213_v19 = vmov 2   ;;  %v6217_v20 = vmov 1   ;;  %v333_v62 = vlaneseq }
   0x8   :  { %318 = vperm.xlu1 %3710, %v306_v15   ;;  %v6211_v21 = vmov 3   ;;  %v6209_v22 = vmov 5   ;;  %v6207_v23 = vmov 6   ;;  %v6205_v24 = vmov 7   ;;  %s3817_s20 = smov 16   ;;  %s3818_s21 = smov 17  }
   0x9   :  { %3347 = vmatmul.mubr.msk.f32.vlgmr.msra.gmra.mrb[0].mxu0 %vm140_vm0, %v126_v16  ;;  %v6203_v25 = vmov 8   ;;  %s3819_s22 = smov 15   ;;  %s3820_s23 = smov 1   ;;  %v127_v39 = vld [vmem:[%s6200_s12 + $0x8] sm:$0xff]  ;;  %v692_v40 = vld [vmem:[%s6199_s11] sm:$0xff]  ;;  %v4058_v1 = vshrl.u32 %v333_v62, 7 }
   0xa   :  { %3349 = vmatmul.mubr.msk.f32.vlgmr.msra.gmra.mrb[0].mxu1 %vm140_vm0, %v126_v16  ;;  %217 = vmatprep.mubr.f32.mxu0 %v6221_v7  ;;  %s3821_s24 = smov 127   ;;  %s3822_s25 = smov 113   ;;  %v4064_v8 = vand.u32 127, %v333_v62  ;;  %v4072_v10 = vld [vmem:[%s6189_s1 + $0x8] sm:$0xff]  ;;  %v4079_v13 = vld [vmem:[%s6189_s1 + $0x10] sm:$0xff]  ;;  %v4084_v14 = vld [vmem:[%s6189_s1] sm:$0xff] }
   0xb   :  { %3709 = vset.pattern.permute.xlu0 %v6219_v18  ;;  %294 = vmatprep.mubr.f32.mxu1 %v6221_v7  ;;  %s3823_s26 = smov 112   ;;  %s3824_s27 = smov 111   ;;  %v4067_v9 = vsub.s32 0, %v4058_v1  ;;  %v4089_v15 = vld [vmem:[%s6189_s1 + $0x18] sm:$0xff]  ;;  %v4092_v16 = vsub.s32 1, %v4058_v1  ;;  %vm698_vm9 = vcmask 64512  }
   0xc   :  { %309 = vperm.xlu0 %3709, %v305_v17   ;;  %361 = vperm.xlu1 %3710, %v305_v17   ;;  %vm335_vm1 = vcmp.lt.s32.totalorder %v4064_v8, 17  ;;  %vm380_vm2 = vcmp.lt.s32.totalorder %v4064_v8, 16  ;;  %vm425_vm3 = vcmp.lt.s32.totalorder %v4064_v8, 15  ;;  %vm470_vm4 = vcmp.lt.s32.totalorder %v4064_v8, 1 }
   0xd   :  { %3348 = vmatmul.mubr.msk.f32.gmra.mrb[2].mxu0 %vm140_vm0, %v127_v39  ;;  %6386 = vst [vmem:[#allocation9_spill] sm:$0xff] %v4067_v9  ;;  %6387 = vst [vmem:[#allocation10_spill] sm:$0xff] %v4092_v16  ;;  %vm515_vm5 = vcmp.lt.s32.totalorder %v4064_v8, 127  ;;  %vm560_vm6 = vcmp.lt.s32.totalorder %v4064_v8, 113  ;;  %vm605_vm7 = vcmp.lt.s32.totalorder %v4064_v8, 112  ;;  %vm650_vm8 = vcmp.lt.s32.totalorder %v4064_v8, 111 }
   0xe   :  { %3350 = vmatmul.mubr.msk.f32.gmra.mrb[2].mxu1 %vm140_vm0, %v127_v39  ;;  %766 = vmatprep.mubr.f32.mxu0 %v6221_v7  ;;  %v522_v39 = vsub.s32 4, %v4058_v1  ;;  %vm3825_vm10 = vmmov 0   ;;  %vm1437_vm11 = vcmask 1041408   ;;  %vm1433_vm12 = vcmask 15360  }
   0xf   :  { %837 = vmatprep.mubr.f32.mxu1 %v6221_v7 }
  0x10   :  { %3712 = vset.pattern.permute.xlu0 %v6213_v19  ;;  %3711 = vset.pattern.permute.xlu1 %v6217_v20  ;;  %v4180_v20 = vrot.slane %v4084_v14, %v522_v39  ;;  %v4190_v7 = vrot.slane %v4089_v15, %v522_v39 }
  0x11   :  { %451 = vperm.xlu0 %3712, %v305_v17   ;;  %406 = vperm.xlu1 %3711, %v305_v17  }
  0x12   :  { %6400 = vst [vmem:[#allocation23_spill] sm:$0xff] %v4180_v20  ;;  %6402 = vst [vmem:[#allocation25_spill] sm:$0xff] %v4190_v7 }
  0x15   :  { %3713 = vset.pattern.permute.xlu0 %v6211_v21  ;;  %3719 = vset.pattern.permute.xlu1 %v6215_v12 }
  0x16   :  { %496 = vperm.xlu0 %3713, %v305_v17  }
  0x1a   :  { %3714 = vset.pattern.permute.xlu0 %v6209_v22  ;;  %v612_v22 = vsub.s32 6, %v4058_v1 }
  0x1b   :  { %541 = vperm.xlu0 %3714, %v305_v17  }
  0x1f   :  { %3715 = vset.pattern.permute.xlu0 %v6207_v23 }
  0x20   :  { %586 = vperm.xlu0 %3715, %v305_v17  }
  0x24   :  { %3716 = vset.pattern.permute.xlu0 %v6205_v24 }
  0x25   :  { %631 = vperm.xlu0 %3716, %v305_v17  }
  0x29   :  { %3717 = vset.pattern.permute.xlu0 %v6203_v25 }
  0x2a   :  { %676 = vperm.xlu0 %3717, %v305_v17  }
  0x2e   :  { %3718 = vset.pattern.permute.xlu0 %v6215_v12 }
  0x86   :  { %v133_v26 = vpop.permute.xlu0 %132 }
  0x87   :  { %v319_v42 = vpop.permute.xlu1 %318 }
  0x8b   :  { %v310_v41 = vpop.permute.xlu0 %309  ;;  %v4022_v44 = vpop.permute.xlu1 %361 }
  0x90   :  { %v4020_v43 = vpop.permute.xlu0 %451  ;;  %v4024_v45 = vpop.permute.xlu1 %406 }
  0x95   :  { %v4026_v46 = vpop.permute.xlu0 %496 }
  0x9a   :  { %v4030_v48 = vpop.permute.xlu0 %541 }
  0x9b   :  { %6382 = vst [vmem:[#allocation5_spill] sm:$0xff] %v4030_v48 }
  0x9f   :  { %v4034_v50 = vpop.permute.xlu0 %586 }
  0xa0   :  { %6383 = vst [vmem:[#allocation6_spill] sm:$0xff] %v4034_v50 }
  0xa4   :  { %v4040_v53 = vpop.permute.xlu0 %631 }
  0xa5   :  { %6384 = vst [vmem:[#allocation7_spill] sm:$0xff] %v4040_v53 }
  0xa9   :  { %v4044_v55 = vpop.permute.xlu0 %676 }
  0xaa   :  { %6385 = vst [vmem:[#allocation8_spill] sm:$0xff] %v4044_v55 }
  0xdc   :  { %v213_v27 = vpop.f32.mrb[0].mxu0 }
  0xdd   :  { %v214_v28 = vadd.f32 %v213_v27, %v133_v26  ;;  %v290_v29 = vpop.f32.mrb[0].mxu1  ;;  %v215_v30 = vpop.f32.mrb[1].mxu0 }
  0xde   :  { %v292_v31 = vpop.f32.mrb[1].mxu1  ;;  %v291_v33 = vadd.f32 %v290_v29, %v133_v26  ;;  %v216_v35 = vadd.f32 %v215_v30, %v133_v26  ;;  %v4107_v30 = vrot.slane %v4072_v10, %v4067_v9 }
  0xdf   :  { %v3957_v32 = vmax.f32 %v214_v28, 0.0  ;;  %v293_v37 = vadd.f32 %v292_v31, %v133_v26  ;;  %v432_v31 = vsub.s32 2, %v4058_v1 }
  0xe0   :  { %v3963_v34 = vmax.f32 %v291_v33, 0.0  ;;  %v302_v36 = vmax.f32 %v216_v35, 0.0  ;;  %6388 = vst [vmem:[#allocation11_spill] sm:$0xff] %v4107_v30  ;;  %v4116_v33 = vrot.slane %v4084_v14, %v4067_v9  ;;  %v477_v35 = vsub.s32 3, %v4058_v1 }
  0xe1   :  { %372 = vrot.lane.b32.xlu1 %v3957_v32, %s3817_s20  ;;  %325 = vrot.lane.b32.xlu0 %v3957_v32, %s3818_s21  ;;  %v304_v38 = vmax.f32 %v293_v37, 0.0  ;;  %v312_v3 = vmul.f32 %v310_v41, %v3957_v32  ;;  %v4130_v37 = vrot.slane %v4079_v13, %v4092_v16 }
  0xe2   :  { %v313_v4 = vmul.f32 %v310_v41, %v302_v36  ;;  %v314_v5 = vmul.f32 %v310_v41, %v3963_v34  ;;  %6390 = vst [vmem:[#allocation13_spill] sm:$0xff] %v4116_v33  ;;  %v4165_v23 = vrot.slane %v4072_v10, %v477_v35  ;;  %v4169_v21 = vrot.slane %v4079_v13, %v477_v35 }
  0xe3   :  { %v315_v6 = vmul.f32 %v310_v41, %v304_v38  ;;  %v4096_v26 = vadd.f32 %v319_v42, %v312_v3  ;;  %6393 = vst [vmem:[#allocation16_spill] sm:$0xff] %v4130_v37  ;;  %v4141_v41 = vrot.slane %v4089_v15, %v4092_v16  ;;  %v4148_v3 = vrot.slane %v4072_v10, %v432_v31 }
  0xe4   :  { %v4098_v27 = vadd.f32 %v319_v42, %v313_v4  ;;  %v4100_v28 = vadd.f32 %v319_v42, %v314_v5  ;;  %v4151_v4 = vrot.slane %v4079_v13, %v432_v31  ;;  %v4154_v5 = vrot.slane %v4084_v14, %v432_v31  ;;  %6396 = vst [vmem:[#allocation19_spill] sm:$0xff] %v4165_v23 }
  0xe5   :  { %417 = vrot.lane.b32.xlu1 %v3957_v32, %s3819_s22  ;;  %329 = vrot.lane.b32.xlu0 %v3963_v34, %s3818_s21  ;;  %v4102_v29 = vadd.f32 %v319_v42, %v315_v6  ;;  %6395 = vst [vmem:[#allocation18_spill] sm:$0xff] %v4141_v41  ;;  %v567_v42 = vsub.s32 5, %v4058_v1  ;;  %v4157_v6 = vrot.slane %v4089_v15, %v432_v31  ;;  %6397 = vst [vmem:[#allocation20_spill] sm:$0xff] %v4169_v21 }
  0xe6   :  { %v4172_v19 = vrot.slane %v4084_v14, %v477_v35  ;;  %v4175_v31 = vrot.slane %v4089_v15, %v477_v35 }
  0xe7   :  { %v4205_v50 = vrot.slane %v4072_v10, %v567_v42  ;;  %v4211_v48 = vrot.slane %v4089_v15, %v567_v42 }
  0xe8   :  { %6398 = vst [vmem:[#allocation21_spill] sm:$0xff] %v4172_v19  ;;  %6399 = vst [vmem:[#allocation22_spill] sm:$0xff] %v4175_v31 }
  0xe9   :  { %462 = vrot.lane.b32.xlu1 %v3957_v32, %s3820_s23  ;;  %376 = vrot.lane.b32.xlu0 %v3963_v34, %s3817_s20  ;;  %6404 = vst [vmem:[#allocation27_spill] sm:$0xff] %v4205_v50  ;;  %6406 = vst [vmem:[#allocation29_spill] sm:$0xff] %v4211_v48 }
  0xed   :  { %507 = vrot.lane.b32.xlu1 %v3957_v32, %s3821_s24  ;;  %421 = vrot.lane.b32.xlu0 %v3963_v34, %s3819_s22 }
  0xf1   :  { %552 = vrot.lane.b32.xlu1 %v3957_v32, %s3822_s25  ;;  %466 = vrot.lane.b32.xlu0 %v3963_v34, %s3820_s23 }
  0xf5   :  { %597 = vrot.lane.b32.xlu1 %v3957_v32, %s3823_s26  ;;  %511 = vrot.lane.b32.xlu0 %v3963_v34, %s3821_s24 }
  0xf9   :  { %327 = vrot.lane.b32.xlu1 %v302_v36, %s3818_s21  ;;  %556 = vrot.lane.b32.xlu0 %v3963_v34, %s3822_s25 }
  0xfd   :  { %331 = vrot.lane.b32.xlu1 %v304_v38, %s3818_s21  ;;  %601 = vrot.lane.b32.xlu0 %v3963_v34, %s3823_s26 }
 0x101   :  { %374 = vrot.lane.b32.xlu1 %v302_v36, %s3817_s20  ;;  %642 = vrot.lane.b32.xlu0 %v3957_v32, %s3824_s27  ;;  %v4112_v32 = vrot.slane %v4079_v13, %v4067_v9 }
 0x103   :  { %6389 = vst [vmem:[#allocation12_spill] sm:$0xff] %v4112_v32 }
 0x105   :  { %378 = vrot.lane.b32.xlu1 %v304_v38, %s3817_s20  ;;  %646 = vrot.lane.b32.xlu0 %v3963_v34, %s3824_s27  ;;  %v4120_v34 = vrot.slane %v4089_v15, %v4067_v9 }
 0x107   :  { %6391 = vst [vmem:[#allocation14_spill] sm:$0xff] %v4120_v34 }
 0x109   :  { %419 = vrot.lane.b32.xlu1 %v302_v36, %s3819_s22  ;;  %695 = vperm.xlu0 %3718, %v692_v40   ;;  %v4137_v40 = vrot.slane %v4084_v14, %v4092_v16 }
 0x10b   :  { %6394 = vst [vmem:[#allocation17_spill] sm:$0xff] %v4137_v40 }
 0x10d   :  { %423 = vrot.lane.b32.xlu1 %v304_v38, %s3819_s22  ;;  %3721 = vset.pattern.permute.xlu0 %v6219_v18  ;;  %v4187_v18 = vrot.slane %v4079_v13, %v522_v39 }
 0x10f   :  { %6401 = vst [vmem:[#allocation24_spill] sm:$0xff] %v4187_v18 }
 0x111   :  { %464 = vrot.lane.b32.xlu1 %v302_v36, %s3820_s23 }
 0x115   :  { %468 = vrot.lane.b32.xlu1 %v304_v38, %s3820_s23 }
 0x119   :  { %509 = vrot.lane.b32.xlu1 %v302_v36, %s3821_s24 }
 0x11d   :  { %513 = vrot.lane.b32.xlu1 %v304_v38, %s3821_s24 }
 0x121   :  { %554 = vrot.lane.b32.xlu1 %v302_v36, %s3822_s25 }
 0x125   :  { %558 = vrot.lane.b32.xlu1 %v304_v38, %s3822_s25 }
 0x129   :  { %599 = vrot.lane.b32.xlu1 %v302_v36, %s3823_s26 }
 0x12d   :  { %603 = vrot.lane.b32.xlu1 %v304_v38, %s3823_s26 }
 0x131   :  { %644 = vrot.lane.b32.xlu1 %v302_v36, %s3824_s27  ;;  %v4126_v36 = vrot.slane %v4072_v10, %v4092_v16  ;;  %v4193_v16 = vrot.slane %v4084_v14, %v567_v42 }
 0x133   :  { %6392 = vst [vmem:[#allocation15_spill] sm:$0xff] %v4126_v36  ;;  %6403 = vst [vmem:[#allocation26_spill] sm:$0xff] %v4193_v16 }
 0x135   :  { %648 = vrot.lane.b32.xlu1 %v304_v38, %s3824_s27 }
 0x153   :  { %v4028_v47 = vpop.permute.xlu1 %372  ;;  %v4048_v58 = vpop.permute.xlu0 %325 }
 0x157   :  { %v4032_v49 = vpop.permute.xlu1 %417  ;;  %v330_v60 = vpop.permute.xlu0 %329 }
 0x15b   :  { %v4036_v51 = vpop.permute.xlu1 %462  ;;  %v4056_v0 = vpop.permute.xlu0 %376 }
 0x15f   :  { %v4038_v52 = vpop.permute.xlu1 %507  ;;  %v4074_v11 = vpop.permute.xlu0 %421 }
 0x163   :  { %v4042_v54 = vpop.permute.xlu1 %552  ;;  %v4145_v62 = vpop.permute.xlu0 %466 }
 0x167   :  { %v4046_v56 = vpop.permute.xlu1 %597 }
 0x16b   :  { %v328_v57 = vpop.permute.xlu1 %327 }
 0x16c   :  { %v337_v25 = vsel %vm335_vm1, %v328_v57, %v330_v60  ;;  %v338_v24 = vsel %vm335_vm1, %v4048_v58, %v328_v57  ;;  %v4184_v57 = vrot.slane %v4072_v10, %v522_v39  ;;  %v4208_v39 = vrot.slane %v4079_v13, %v567_v42 }
 0x16d   :  { %v357_v35 = vmul.f32 %v4107_v30, %v338_v24  ;;  %v358_v9 = vmul.f32 %v4112_v32, %v337_v25  ;;  %v4214_v24 = vrot.slane %v4084_v14, %v612_v22  ;;  %v4216_v25 = vpop.permute.xlu0 %511  ;;  %v4229_v42 = vrot.slane %v4072_v10, %v612_v22 }
 0x16e   :  { %6405 = vst [vmem:[#allocation28_spill] sm:$0xff] %v4208_v39  ;;  %v657_v32 = vsub.s32 7, %v4058_v1 }
 0x16f   :  { %v4050_v59 = vpop.permute.xlu1 %331  ;;  %6407 = vst [vmem:[#allocation30_spill] sm:$0xff] %v4214_v24  ;;  %6408 = vst [vmem:[#allocation31_spill] sm:$0xff] %v4229_v42  ;;  %v365_v24 = vmul.f32 %v4022_v44, %v357_v35  ;;  %v366_v42 = vmul.f32 %v4022_v44, %v358_v9 }
 0x170   :  { %v336_v55 = vsel %vm335_vm1, %v330_v60, %v4050_v59  ;;  %v339_v53 = vsel %vm335_vm1, %v4050_v59, %v4048_v58 }
 0x171   :  { %v356_v30 = vmul.f32 %v4116_v33, %v339_v53  ;;  %v359_v48 = vmul.f32 %v4120_v34, %v336_v55 }
 0x173   :  { %v4052_v61 = vpop.permute.xlu1 %374 }
 0x174   :  { %v382_v60 = vsel %vm380_vm2, %v4052_v61, %v4056_v0  ;;  %v383_v58 = vsel %vm380_vm2, %v4028_v47, %v4052_v61 }
 0x177   :  { %v4054_v63 = vpop.permute.xlu1 %378 }
 0x178   :  { %v381_v39 = vsel %vm380_vm2, %v4056_v0, %v4054_v63  ;;  %v384_v61 = vsel %vm380_vm2, %v4054_v63, %v4028_v47  ;;  %v402_v0 = vmul.f32 %v4126_v36, %v383_v58  ;;  %v403_v47 = vmul.f32 %v4130_v37, %v382_v60 }
 0x179   :  { %v401_v35 = vmul.f32 %v4137_v40, %v384_v61  ;;  %v4267_v58 = vrot.slane %v4079_v13, %v612_v22  ;;  %v4270_v60 = vrot.slane %v4089_v15, %v612_v22  ;;  %v367_v37 = vmul.f32 %v4022_v44, %v359_v48 }
 0x17a   :  { %v4283_v22 = vrot.slane %v4072_v10, %v657_v32  ;;  %v410_v48 = vmul.f32 %v4024_v45, %v402_v0 }
 0x17b   :  { %v4060_v2 = vpop.permute.xlu1 %419  ;;  %6409 = vst [vmem:[#allocation32_spill] sm:$0xff] %v4267_v58  ;;  %6410 = vst [vmem:[#allocation33_spill] sm:$0xff] %v4270_v60 }
 0x17c   :  { %v427_v53 = vsel %vm425_vm3, %v4060_v2, %v4074_v11  ;;  %v428_v55 = vsel %vm425_vm3, %v4032_v49, %v4060_v2  ;;  %v404_v2 = vmul.f32 %v4141_v41, %v381_v39  ;;  %v4280_v41 = vrot.slane %v4084_v14, %v657_v32  ;;  %6412 = vst [vmem:[#allocation35_spill] sm:$0xff] %v4283_v22 }
 0x17d   :  { %v447_v36 = vmul.f32 %v4148_v3, %v428_v55  ;;  %v409_v55 = vmul.f32 %v4024_v45, %v401_v35 }
 0x17e   :  { %6411 = vst [vmem:[#allocation34_spill] sm:$0xff] %v4280_v41 }
 0x17f   :  { %v4094_v17 = vpop.permute.xlu1 %423 }
 0x180   :  { %v426_v63 = vsel %vm425_vm3, %v4074_v11, %v4094_v17  ;;  %v429_v9 = vsel %vm425_vm3, %v4094_v17, %v4032_v49  ;;  %v364_v11 = vmul.f32 %v4022_v44, %v356_v30  ;;  %v448_v49 = vmul.f32 %v4151_v4, %v427_v53  ;;  %v557_v17 = vpop.permute.xlu0 %556 }
 0x181   :  { %v446_v39 = vmul.f32 %v4154_v5, %v429_v9  ;;  %v449_v61 = vmul.f32 %v4157_v6, %v426_v63  ;;  %v369_v30 = vadd.f32 %v365_v24, %v4098_v27  ;;  %v370_v44 = vadd.f32 %v366_v42, %v4100_v28 }
 0x182   :  { %v411_v53 = vmul.f32 %v4024_v45, %v403_v47  ;;  %v412_v63 = vmul.f32 %v4024_v45, %v404_v2  ;;  %v368_v28 = vadd.f32 %v364_v11, %v4096_v26  ;;  %v371_v24 = vadd.f32 %v367_v37, %v4102_v29 }
 0x183   :  { %v4132_v38 = vpop.permute.xlu1 %464  ;;  %v455_v42 = vmul.f32 %v4020_v43, %v447_v36  ;;  %v456_v0 = vmul.f32 %v4020_v43, %v448_v49  ;;  %v454_v45 = vmul.f32 %v4020_v43, %v446_v39  ;;  %v457_v47 = vmul.f32 %v4020_v43, %v449_v61 }
 0x184   :  { %v472_v14 = vsel %vm470_vm4, %v4132_v38, %v4145_v62  ;;  %v473_v10 = vsel %vm470_vm4, %v4036_v51, %v4132_v38  ;;  %v4316_v37 = vrot.slane %v4079_v13, %v657_v32  ;;  %v4319_v38 = vrot.slane %v4089_v15, %v657_v32  ;;  %v602_v43 = vpop.permute.xlu0 %601 }
 0x185   :  { %v492_v29 = vmul.f32 %v4165_v23, %v473_v10  ;;  %v493_v36 = vmul.f32 %v4169_v21, %v472_v14  ;;  %v414_v35 = vadd.f32 %v410_v48, %v369_v30  ;;  %v415_v2 = vadd.f32 %v411_v53, %v370_v44 }
 0x186   :  { %6413 = vst [vmem:[#allocation36_spill] sm:$0xff] %v4316_v37  ;;  %6414 = vst [vmem:[#allocation37_spill] sm:$0xff] %v4319_v38  ;;  %v413_v11 = vadd.f32 %v409_v55, %v368_v28 }
 0x187   :  { %v4177_v12 = vpop.permute.xlu1 %468  ;;  %v459_v15 = vadd.f32 %v455_v42, %v414_v35  ;;  %v460_v32 = vadd.f32 %v456_v0, %v415_v2  ;;  %v500_v44 = vmul.f32 %v4026_v46, %v492_v29  ;;  %v501_v48 = vmul.f32 %v4026_v46, %v493_v36  ;;  %v6415_v36 = vld [vmem:[#allocation5_spill] sm:$0xff] }
 0x188   :  { %v471_v9 = vsel %vm470_vm4, %v4145_v62, %v4177_v12  ;;  %v474_v26 = vsel %vm470_vm4, %v4177_v12, %v4036_v51  ;;  %v416_v62 = vadd.f32 %v412_v63, %v371_v24  ;;  %v458_v61 = vadd.f32 %v454_v45, %v413_v11  ;;  %v643_v45 = vpop.permute.xlu0 %642  ;;  %v6416_v11 = vld [vmem:[#allocation30_spill] sm:$0xff] }
 0x189   :  { %v491_v39 = vmul.f32 %v4172_v19, %v474_v26  ;;  %v494_v12 = vmul.f32 %v4175_v31, %v471_v9  ;;  %v505_v9 = vadd.f32 %v501_v48, %v460_v32 }
 0x18a   :  { %v461_v30 = vadd.f32 %v457_v47, %v416_v62 }
 0x18b   :  { %v4226_v59 = vpop.permute.xlu1 %509  ;;  %v499_v24 = vmul.f32 %v4026_v46, %v491_v39  ;;  %v502_v42 = vmul.f32 %v4026_v46, %v494_v12  ;;  %v504_v46 = vadd.f32 %v500_v44, %v459_v15  ;;  %v6417_v39 = vld [vmem:[#allocation31_spill] sm:$0xff]  ;;  %v6420_v44 = vld [vmem:[#allocation6_spill] sm:$0xff] }
 0x18c   :  { %v517_v51 = vsel %vm515_vm5, %v4226_v59, %v4216_v25  ;;  %v518_v13 = vsel %vm515_vm5, %v4038_v52, %v4226_v59 }
 0x18d   :  { %v536_v63 = vmul.f32 %v4180_v20, %v518_v13  ;;  %v537_v59 = vmul.f32 %v4184_v57, %v517_v51  ;;  %v503_v15 = vadd.f32 %v499_v24, %v458_v61  ;;  %v506_v32 = vadd.f32 %v502_v42, %v461_v30 }
 0x18f   :  { %v514_v34 = vpop.permute.xlu1 %513  ;;  %v544_v35 = vmul.f32 %v6415_v36, %v536_v63  ;;  %v545_v2 = vmul.f32 %v6415_v36, %v537_v59 }
 0x190   :  { %v516_v14 = vsel %vm515_vm5, %v4216_v25, %v514_v34  ;;  %v519_v10 = vsel %vm515_vm5, %v514_v34, %v4038_v52 }
 0x191   :  { %v538_v26 = vmul.f32 %v4187_v18, %v516_v14  ;;  %v539_v29 = vmul.f32 %v4190_v7, %v519_v10 }
 0x193   :  { %v555_v27 = vpop.permute.xlu1 %554  ;;  %v546_v59 = vmul.f32 %v6415_v36, %v538_v26  ;;  %v547_v14 = vmul.f32 %v6415_v36, %v539_v29 }
 0x194   :  { %v562_v53 = vsel %vm560_vm6, %v555_v27, %v557_v17  ;;  %v563_v55 = vsel %vm560_vm6, %v4042_v54, %v555_v27 }
 0x195   :  { %v581_v47 = vmul.f32 %v4193_v16, %v563_v55  ;;  %v582_v25 = vmul.f32 %v4205_v50, %v562_v53  ;;  %v6419_v53 = vld [vmem:[#allocation29_spill] sm:$0xff]  ;;  %v550_v36 = vadd.f32 %v546_v59, %v505_v9 }
 0x197   :  { %v559_v49 = vpop.permute.xlu1 %558  ;;  %v589_v48 = vmul.f32 %v6420_v44, %v581_v47  ;;  %v590_v63 = vmul.f32 %v6420_v44, %v582_v25 }
 0x198   :  { %v561_v52 = vsel %vm560_vm6, %v557_v17, %v559_v49  ;;  %v564_v34 = vsel %vm560_vm6, %v559_v49, %v4042_v54  ;;  %v6418_v17 = vld [vmem:[#allocation28_spill] sm:$0xff] }
 0x199   :  { %v583_v13 = vmul.f32 %v6418_v17, %v561_v52  ;;  %v584_v55 = vmul.f32 %v6419_v53, %v564_v34  ;;  %v6421_v52 = vld [vmem:[#allocation7_spill] sm:$0xff]  ;;  %v1005_v17 = vld [vmem:[%s6199_s11 + $0x20] sm:$0xff] }
 0x19b   :  { %v600_v28 = vpop.permute.xlu1 %599  ;;  %v591_v30 = vmul.f32 %v6420_v44, %v583_v13  ;;  %v592_v24 = vmul.f32 %v6420_v44, %v584_v55 }
 0x19c   :  { %v607_v27 = vsel %vm605_vm7, %v600_v28, %v602_v43  ;;  %v608_v0 = vsel %vm605_vm7, %v4046_v56, %v600_v28 }
 0x19d   :  { %v626_v62 = vmul.f32 %v6416_v11, %v608_v0  ;;  %v627_v12 = vmul.f32 %v6417_v39, %v607_v27  ;;  %v647_v27 = vpop.permute.xlu0 %646  ;;  %v549_v0 = vadd.f32 %v545_v2, %v504_v46 }
 0x19f   :  { %v604_v51 = vpop.permute.xlu1 %603  ;;  %v634_v34 = vmul.f32 %v6421_v52, %v626_v62  ;;  %v594_v29 = vadd.f32 %v590_v63, %v549_v0 }
 0x1a0   :  { %v606_v54 = vsel %vm605_vm7, %v602_v43, %v604_v51  ;;  %v609_v49 = vsel %vm605_vm7, %v604_v51, %v4046_v56  ;;  %v548_v43 = vadd.f32 %v544_v35, %v503_v15  ;;  %v635_v56 = vmul.f32 %v6421_v52, %v627_v12  ;;  %v6422_v51 = vld [vmem:[#allocation8_spill] sm:$0xff] }
 0x1a1   :  { %v628_v10 = vmul.f32 %v4267_v58, %v606_v54  ;;  %v629_v28 = vmul.f32 %v4270_v60, %v609_v49  ;;  %v551_v35 = vadd.f32 %v547_v14, %v506_v32  ;;  %v595_v15 = vadd.f32 %v591_v30, %v550_v36 }
 0x1a2   :  { %v593_v25 = vadd.f32 %v589_v48, %v548_v43  ;;  %v639_v54 = vadd.f32 %v635_v56, %v594_v29  ;;  %v1004_v29 = vld [vmem:[%s6199_s11 + $0x18] sm:$0xff]  ;;  %v6428_v36 = vmov 4  }
 0x1a3   :  { %v645_v61 = vpop.permute.xlu1 %644  ;;  %v636_v2 = vmul.f32 %v6421_v52, %v628_v10  ;;  %v637_v62 = vmul.f32 %v6421_v52, %v629_v28  ;;  %v596_v9 = vadd.f32 %v592_v24, %v551_v35  ;;  %v6423_v24 = vmov 0.0   ;;  %v696_v35 = vpop.permute.xlu0 %695 }
 0x1a4   :  { %v652_v42 = vsel %vm650_vm8, %v645_v61, %v647_v27  ;;  %v653_v47 = vsel %vm650_vm8, %v643_v45, %v645_v61  ;;  %v638_v12 = vadd.f32 %v634_v34, %v593_v25  ;;  %v4413_v25 = vpop.f32.mrb[2].mxu1 }
 0x1a5   :  { %v671_v26 = vmul.f32 %v4280_v41, %v653_v47  ;;  %v672_v46 = vmul.f32 %v4283_v22, %v652_v42  ;;  %v640_v10 = vadd.f32 %v636_v2, %v595_v15  ;;  %v641_v28 = vadd.f32 %v637_v62, %v596_v9  ;;  %v4409_v42 = vpop.f32.mrb[2].mxu0  ;;  %6426 = vst [vmem:[#allocation7_spill] sm:$0xff] %v4413_v25  ;;  %v69_v25 = vld [vmem:[%s6190_s2 + $0x48] sm:$0xff] }
 0x1a6   :  { %6424 = vst [vmem:[#allocation5_spill] sm:$0xff] %v4409_v42  ;;  %v4411_v47 = vpop.f32.mrb[3].mxu0 }
 0x1a7   :  { %v679_v13 = vmul.f32 %v6422_v51, %v671_v26  ;;  %v649_v55 = vpop.permute.xlu1 %648  ;;  %v680_v49 = vmul.f32 %v6422_v51, %v672_v46  ;;  %6425 = vst [vmem:[#allocation6_spill] sm:$0xff] %v4411_v47  ;;  %v4415_v26 = vpop.f32.mrb[3].mxu1  ;;  %v849_v46 = vld [vmem:[%s6199_s11 + $0x8] sm:$0xff] }
 0x1a8   :  { %v651_v44 = vsel %vm650_vm8, %v647_v27, %v649_v55  ;;  %v654_v48 = vsel %vm650_vm8, %v649_v55, %v643_v45  ;;  %v691_v27 = vld [vmem:[%s6198_s10] sm:$0xff]  ;;  %6427 = vst [vmem:[#allocation8_spill] sm:$0xff] %v4415_v26  ;;  %852 = vperm.xlu1 %3719, %v849_v46  }
 0x1a9   :  { %v673_v32 = vmul.f32 %v4316_v37, %v651_v44  ;;  %v674_v63 = vmul.f32 %v4319_v38, %v654_v48  ;;  %v684_v59 = vadd.f32 %v680_v49, %v639_v54  ;;  %v683_v14 = vadd.f32 %v679_v13, %v638_v12  ;;  %v848_v44 = vld [vmem:[%s6198_s10 + $0x8] sm:$0xff]  ;;  %v76_v46 = vld [vmem:[%s6190_s2 + $0x80] sm:$0xff] }
 0x1ab   :  { %v681_v43 = vmul.f32 %v6422_v51, %v673_v32  ;;  %v688_v0 = vmax.f32 %v684_v59, 0.0  ;;  %v687_v52 = vmax.f32 %v683_v14, 0.0  ;;  %v682_v34 = vmul.f32 %v6422_v51, %v674_v63  ;;  %v1593_v63 = vld [vmem:[%s6194_s6 + $0x8] sm:$0xff]  ;;  %v1592_v59 = vld [vmem:[%s6194_s6] sm:$0xff] }
 0x1ac   :  { %1013 = vperm.xlu1 %3719, %v1004_v29   ;;  %1603 = vperm.xlu0 %3721, %v1593_v63   ;;  %v1594_v14 = vld [vmem:[%s6195_s7] sm:$0xff]  ;;  %v77_v29 = vld [vmem:[%s6190_s2 + $0x88] sm:$0xff] }
 0x1ad   :  { %702 = vmatprep.subr.mxu0 %v688_v0  ;;  %v686_v45 = vadd.f32 %v682_v34, %v641_v28  ;;  %v685_v56 = vadd.f32 %v681_v43, %v640_v10  ;;  %v6429_v10 = vmov 1   ;;  %v6430_v28 = vmov 0   ;;  %v1595_v43 = vld [vmem:[%s6195_s7 + $0x8] sm:$0xff] }
 0x1ae   :  { %703 = vmatpush1.msra.mxu0 %v687_v52  ;;  %v6431_v0 = vmov 2   ;;  %v6432_v52 = vmov 3   ;;  %v6433_v34 = vmov 5  }
 0x1af   :  { %3351 = vmatmul.mubr.msk.f32.vlgmr.msra.gmra.mrb[4].mxu0 %vm698_vm9, %v691_v27  ;;  %v690_v61 = vmax.f32 %v686_v45, 0.0  ;;  %v689_v30 = vmax.f32 %v685_v56, 0.0  ;;  %v6435_v45 = vmov 7   ;;  %v6436_v56 = vmov 8  }
 0x1b0   :  { %922 = vmatprep.mubr.f32.mxu0 %v6423_v24  ;;  %3720 = vset.pattern.permute.xlu1 %v6428_v36 }
 0x1b1   :  { %773 = vmatprep.subr.mxu1 %v690_v61  ;;  %1598 = vperm.xlu1 %3720, %v1592_v59   ;;  %v1003_v61 = vld [vmem:[%s6199_s11 + $0x10] sm:$0xff] }
 0x1b2   :  { %774 = vmatpush1.msra.mxu1 %v689_v30  ;;  %3724 = vset.pattern.permute.xlu0 %v6429_v10 }
 0x1b3   :  { %3352 = vmatmul.mubr.msk.f32.vlgmr.msra.gmra.mrb[4].mxu1 %vm698_vm9, %v691_v27  ;;  %1725 = vperm.xlu0 %3724, %v1593_v63   ;;  %v6434_v27 = vmov 6  }
 0x1b4   :  { %993 = vmatprep.mubr.f32.mxu1 %v6423_v24 }
 0x1b5   :  { %3722 = vset.pattern.permute.xlu1 %v6430_v28 }
 0x1b6   :  { %1616 = vperm.xlu1 %3722, %v1594_v14   ;;  %v63_v14 = vld [vmem:[%s6190_s2 + $0x18] sm:$0xff] }
 0x1b7   :  { %3725 = vset.pattern.permute.xlu0 %v6431_v0 }
 0x1b8   :  { %1777 = vperm.xlu0 %3725, %v1592_v59  }
 0x1ba   :  { %1621 = vperm.xlu1 %3722, %v1595_v43  }
 0x1bc   :  { %3728 = vset.pattern.permute.xlu0 %v6432_v52 }
 0x1bd   :  { %1837 = vperm.xlu0 %3728, %v1593_v63  }
 0x1be   :  { %1669 = vperm.xlu1 %3722, %v1593_v63  }
 0x1c1   :  { %3729 = vset.pattern.permute.xlu0 %v6433_v34 }
 0x1c2   :  { %3723 = vset.pattern.permute.xlu1 %v6429_v10  ;;  %1889 = vperm.xlu0 %3729, %v1592_v59  }
 0x1c3   :  { %1721 = vperm.xlu1 %3723, %v1592_v59  }
 0x1c6   :  { %3732 = vset.pattern.permute.xlu0 %v6434_v27 }
 0x1c7   :  { %3726 = vset.pattern.permute.xlu1 %v6431_v0  ;;  %1949 = vperm.xlu0 %3732, %v1593_v63  }
 0x1c8   :  { %1781 = vperm.xlu1 %3726, %v1593_v63  }
 0x1cb   :  { %3733 = vset.pattern.permute.xlu0 %v6435_v45 }
 0x1cc   :  { %3727 = vset.pattern.permute.xlu1 %v6432_v52  ;;  %2001 = vperm.xlu0 %3733, %v1592_v59   ;;  %v70_v52 = vld [vmem:[%s6190_s2 + $0x50] sm:$0xff] }
 0x1cd   :  { %1833 = vperm.xlu1 %3727, %v1592_v59  }
 0x1d0   :  { %3736 = vset.pattern.permute.xlu0 %v6436_v56 }
 0x1d1   :  { %3730 = vset.pattern.permute.xlu1 %v6433_v34  ;;  %2061 = vperm.xlu0 %3736, %v1593_v63  }
 0x1d2   :  { %1893 = vperm.xlu1 %3730, %v1593_v63  }
 0x1d5   :  { %3737 = vset.pattern.permute.xlu0 %v6430_v28 }
 0x1d6   :  { %3731 = vset.pattern.permute.xlu1 %v6434_v27  ;;  %1008 = vperm.xlu0 %3737, %v1003_v61   ;;  %v92_v61 = vld [vmem:[%s6190_s2 + $0x100] sm:$0xff] }
 0x1d7   :  { %1945 = vperm.xlu1 %3731, %v1592_v59  }
 0x1da   :  { %1665 = vperm.xlu0 %3737, %v1592_v59  }
 0x1db   :  { %3734 = vset.pattern.permute.xlu1 %v6435_v45 }
 0x1dc   :  { %2005 = vperm.xlu1 %3734, %v1593_v63   ;;  %v109_v63 = vld [vmem:[%s6190_s2 + $0x188] sm:$0xff] }
 0x1e0   :  { %3735 = vset.pattern.permute.xlu1 %v6436_v56 }
 0x1e1   :  { %2057 = vperm.xlu1 %3735, %v1592_v59   ;;  %v62_v59 = vld [vmem:[%s6190_s2 + $0x10] sm:$0xff] }
 0x1e5   :  { %3738 = vset.pattern.permute.xlu1 %v6428_v36 }
 0x227   :  { %v853_v30 = vpop.permute.xlu1 %852 }
 0x282   :  { %v768_v2 = vpop.f32.mrb[4].mxu0 }
 0x283   :  { %v770_v62 = vpop.f32.mrb[5].mxu0  ;;  %v769_v12 = vadd.f32 %v768_v2, %v696_v35  ;;  %v60_v2 = vld [vmem:[%s6190_s2] sm:$0xff] }
 0x284   :  { %v771_v51 = vadd.f32 %v770_v62, %v696_v35  ;;  %v61_v62 = vld [vmem:[%s6190_s2 + $0x8] sm:$0xff] }
 0x285   :  { %v844_v13 = vmax.f32 %v769_v12, 0.0 }
 0x286   :  { %v845_v55 = vmax.f32 %v771_v51, 0.0  ;;  %v839_v54 = vpop.f32.mrb[4].mxu1 }
 0x287   :  { %v840_v49 = vadd.f32 %v839_v54, %v696_v35  ;;  %v841_v15 = vpop.f32.mrb[5].mxu1 }
 0x288   :  { %v842_v48 = vadd.f32 %v841_v15, %v696_v35  ;;  %858 = vmatprep.subr.mxu0 %v845_v55  ;;  %v79_v55 = vld [vmem:[%s6190_s2 + $0x98] sm:$0xff]  ;;  %v1000_v15 = vld [vmem:[%s6198_s10 + $0x10] sm:$0xff] }
 0x289   :  { %859 = vmatpush1.msra.mxu0 %v844_v13  ;;  %v846_v32 = vmax.f32 %v840_v49, 0.0  ;;  %v78_v13 = vld [vmem:[%s6190_s2 + $0x90] sm:$0xff]  ;;  %v4481_v49 = vpack.c.bf16 %v77_v29, %v76_v46  ;;  %v93_v46 = vld [vmem:[%s6190_s2 + $0x108] sm:$0xff]  ;;  %v80_v29 = vld [vmem:[%s6190_s2 + $0xa0] sm:$0xff] }
 0x28a   :  { %v847_v9 = vmax.f32 %v842_v48, 0.0  ;;  %3353 = vmatmul.mubr.msk.f32.vlgmr.msra.gmra.mrb[6].mxu0 %vm698_vm9, %v848_v44  ;;  %v108_v48 = vld [vmem:[%s6190_s2 + $0x180] sm:$0xff] }
 0x28b   :  { %1094 = vmatprep.mubr.f32.mxu0 %v6423_v24  ;;  %6437 = vst [vmem:[#allocation38_spill] sm:$0xff] %v4481_v49 }
 0x28c   :  { %929 = vmatprep.subr.mxu1 %v847_v9 }
 0x28d   :  { %930 = vmatpush1.msra.mxu1 %v846_v32  ;;  %v4491_v32 = vpack.c.bf16 %v79_v55, %v78_v13  ;;  %v1001_v13 = vld [vmem:[%s6198_s10 + $0x18] sm:$0xff]  ;;  %v4527_v55 = vpack.c.bf16 %v109_v63, %v108_v48  ;;  %v94_v63 = vld [vmem:[%s6190_s2 + $0x110] sm:$0xff] }
 0x28e   :  { %3354 = vmatmul.mubr.msk.f32.vlgmr.msra.gmra.mrb[6].mxu1 %vm698_vm9, %v848_v44  ;;  %v4486_v44 = vpack.c.bf16 %v61_v62, %v60_v2  ;;  %v81_v2 = vld [vmem:[%s6190_s2 + $0xa8] sm:$0xff]  ;;  %v110_v62 = vld [vmem:[%s6190_s2 + $0x190] sm:$0xff] }
 0x28f   :  { %1177 = vmatprep.mubr.f32.mxu1 %v6423_v24  ;;  %6439 = vst [vmem:[#allocation40_spill] sm:$0xff] %v4491_v32  ;;  %6440 = vst [vmem:[#allocation41_spill] sm:$0xff] %v4527_v55  ;;  %v4540_v26 = vpack.c.bf16 %v81_v2, %v80_v29  ;;  %v113_v29 = vld [vmem:[%s6190_s2 + $0x1a8] sm:$0xff]  ;;  %v66_v2 = vld [vmem:[%s6190_s2 + $0x30] sm:$0xff] }
 0x290   :  { %6438 = vst [vmem:[#allocation39_spill] sm:$0xff] %v4486_v44 }
 0x291   :  { %6443 = vst [vmem:[#allocation44_spill] sm:$0xff] %v4540_v26 }
 0x35d   :  { %v924_v35 = vpop.f32.mrb[6].mxu0 }
 0x35e   :  { %v926_v12 = vpop.f32.mrb[7].mxu0  ;;  %v925_v51 = vadd.f32 %v924_v35, %v853_v30 }
 0x35f   :  { %v927_v54 = vadd.f32 %v926_v12, %v853_v30  ;;  %v111_v12 = vld [vmem:[%s6190_s2 + $0x198] sm:$0xff] }
 0x360   :  { %v4542_v48 = vpack.c.bf16 %v111_v12, %v110_v62  ;;  %v67_v62 = vld [vmem:[%s6190_s2 + $0x38] sm:$0xff] }
 0x361   :  { %v995_v9 = vpop.f32.mrb[6].mxu1  ;;  %1030 = vmatprep.subr.mxu0 %v927_v54  ;;  %v4530_v54 = vpack.c.bf16 %v63_v14, %v62_v59  ;;  %v95_v59 = vld [vmem:[%s6190_s2 + $0x118] sm:$0xff]  ;;  %v82_v14 = vld [vmem:[%s6190_s2 + $0xb0] sm:$0xff] }
 0x362   :  { %v997_v43 = vpop.f32.mrb[7].mxu1  ;;  %1031 = vmatpush1.msra.mxu0 %v925_v51  ;;  %v996_v51 = vadd.f32 %v995_v9, %v853_v30  ;;  %v65_v9 = vld [vmem:[%s6190_s2 + $0x28] sm:$0xff]  ;;  %6444 = vst [vmem:[#allocation45_spill] sm:$0xff] %v4542_v48 }
 0x363   :  { %v998_v35 = vadd.f32 %v997_v43, %v853_v30  ;;  %3355 = vmatmul.mubr.msk.f32.vlgmr.msra.gmra.mrb[8].mxu0 %vm698_vm9, %v1000_v15  ;;  %3552 = vmatprep.subr.bf16.mxu0 %v4481_v49  ;;  %6441 = vst [vmem:[#allocation42_spill] sm:$0xff] %v4530_v54  ;;  %v4532_v43 = vpack.c.bf16 %v93_v46, %v92_v61  ;;  %v64_v30 = vld [vmem:[%s6190_s2 + $0x20] sm:$0xff]  ;;  %v83_v61 = vld [vmem:[%s6190_s2 + $0xb8] sm:$0xff] }
 0x364   :  { %1100 = vmatprep.mubr.f32.mxu0 %v6423_v24  ;;  %3554 = vmatpush3.bf16.msra.mxu0 %v4486_v44  ;;  %v112_v46 = vld [vmem:[%s6190_s2 + $0x1a0] sm:$0xff]  ;;  %v4580_v12 = vpack.c.bf16 %v83_v61, %v82_v14  ;;  %v114_v14 = vld [vmem:[%s6190_s2 + $0x1b0] sm:$0xff]  ;;  %v115_v61 = vld [vmem:[%s6190_s2 + $0x1b8] sm:$0xff] }
 0x365   :  { %1113 = vmatprep.subr.mxu1 %v998_v35  ;;  %3556 = vmatprep.subr.bf16.mxu0 %v4491_v32  ;;  %6442 = vst [vmem:[#allocation43_spill] sm:$0xff] %v4532_v43  ;;  %v4570_v35 = vpack.c.bf16 %v95_v59, %v94_v63  ;;  %v84_v63 = vld [vmem:[%s6190_s2 + $0xc0] sm:$0xff]  ;;  %v85_v59 = vld [vmem:[%s6190_s2 + $0xc8] sm:$0xff]  ;;  %v4621_v42 = vpack.c.bf16 %v115_v61, %v114_v14 }
 0x366   :  { %1114 = vmatpush1.msra.mxu1 %v996_v51  ;;  %6447 = vst [vmem:[#allocation48_spill] sm:$0xff] %v4580_v12  ;;  %v4582_v51 = vpack.c.bf16 %v113_v29, %v112_v46  ;;  %v68_v29 = vld [vmem:[%s6190_s2 + $0x40] sm:$0xff]  ;;  %v4619_v47 = vpack.c.bf16 %v85_v59, %v84_v63  ;;  %v117_v59 = vld [vmem:[%s6190_s2 + $0x1c8] sm:$0xff] }
 0x367   :  { %3356 = vmatmul.mubr.msk.f32.gmra.mrb[10].mxu0 %vm698_vm9, %v1001_v13  ;;  %3358 = vmatmul.mubr.msk.f32.vlgmr.msra.gmra.mrb[8].mxu1 %vm698_vm9, %v1000_v15  ;;  %v4568_v15 = vpack.c.bf16 %v65_v9, %v64_v30  ;;  %6446 = vst [vmem:[#allocation47_spill] sm:$0xff] %v4570_v35  ;;  %v96_v30 = vld [vmem:[%s6190_s2 + $0x120] sm:$0xff]  ;;  %v97_v9 = vld [vmem:[%s6190_s2 + $0x128] sm:$0xff]  ;;  %6452 = vst [vmem:[#allocation53_spill] sm:$0xff] %v4621_v42  ;;  %v4643_v14 = vpack.c.bf16 %v69_v25, %v68_v29 }
 0x368   :  { %1183 = vmatprep.mubr.f32.mxu1 %v6423_v24  ;;  %3584 = vmatprep.subr.bf16.mxu1 %v4527_v55  ;;  %6448 = vst [vmem:[#allocation49_spill] sm:$0xff] %v4582_v51  ;;  %v4609_v46 = vpack.c.bf16 %v97_v9, %v96_v30  ;;  %6451 = vst [vmem:[#allocation52_spill] sm:$0xff] %v4619_v47  ;;  %v86_v30 = vld [vmem:[%s6190_s2 + $0xd0] sm:$0xff]  ;;  %v87_v9 = vld [vmem:[%s6190_s2 + $0xd8] sm:$0xff] }
 0x369   :  { %3558 = vmatpush3.bf16.msra.mxu0 %v4530_v54  ;;  %3586 = vmatpush3.bf16.msra.mxu1 %v4532_v43  ;;  %6445 = vst [vmem:[#allocation46_spill] sm:$0xff] %v4568_v15  ;;  %v116_v63 = vld [vmem:[%s6190_s2 + $0x1c0] sm:$0xff]  ;;  %6453 = vst [vmem:[#allocation54_spill] sm:$0xff] %v4643_v14  ;;  %v101_v29 = vld [vmem:[%s6190_s2 + $0x148] sm:$0xff] }
 0x36a   :  { %3560 = vmatprep.subr.bf16.mxu0 %v4540_v26  ;;  %3588 = vmatprep.subr.bf16.mxu1 %v4542_v48  ;;  %6450 = vst [vmem:[#allocation51_spill] sm:$0xff] %v4609_v46  ;;  %v100_v25 = vld [vmem:[%s6190_s2 + $0x140] sm:$0xff] }
 0x36b   :  { %3359 = vmatmul.mubr.msk.f32.gmra.mrb[10].mxu1 %vm698_vm9, %v1001_v13  ;;  %1106 = vmatprep.mubr.f32.mxu0 %v6423_v24  ;;  %v4607_v13 = vpack.c.bf16 %v67_v62, %v66_v2  ;;  %v98_v2 = vld [vmem:[%s6190_s2 + $0x130] sm:$0xff]  ;;  %v99_v62 = vld [vmem:[%s6190_s2 + $0x138] sm:$0xff] }
 0x36c   :  { %1189 = vmatprep.mubr.f32.mxu1 %v6423_v24  ;;  %v4645_v61 = vpack.c.bf16 %v99_v62, %v98_v2  ;;  %v4669_v62 = vpack.c.bf16 %v101_v29, %v100_v25  ;;  %v73_v25 = vld [vmem:[%s6190_s2 + $0x68] sm:$0xff] }
 0x36d   :  { %3562 = vmatpush3.bf16.msra.mxu0 %v4568_v15  ;;  %3590 = vmatpush3.bf16.msra.mxu1 %v4570_v35  ;;  %6449 = vst [vmem:[#allocation50_spill] sm:$0xff] %v4607_v13 }
 0x36e   :  { %3564 = vmatprep.subr.bf16.mxu0 %v4580_v12  ;;  %3592 = vmatprep.subr.bf16.mxu1 %v4582_v51  ;;  %6454 = vst [vmem:[#allocation55_spill] sm:$0xff] %v4645_v61  ;;  %v4652_v51 = vpack.c.bf16 %v87_v9, %v86_v30  ;;  %v4654_v12 = vpack.c.bf16 %v117_v59, %v116_v63  ;;  %6458 = vst [vmem:[#allocation59_spill] sm:$0xff] %v4669_v62  ;;  %v88_v30 = vld [vmem:[%s6190_s2 + $0xe0] sm:$0xff]  ;;  %v89_v9 = vld [vmem:[%s6190_s2 + $0xe8] sm:$0xff] }
 0x36f   :  { %v119_v63 = vld [vmem:[%s6190_s2 + $0x1d8] sm:$0xff]  ;;  %v72_v59 = vld [vmem:[%s6190_s2 + $0x60] sm:$0xff] }
 0x370   :  { %6455 = vst [vmem:[#allocation56_spill] sm:$0xff] %v4652_v51  ;;  %6456 = vst [vmem:[#allocation57_spill] sm:$0xff] %v4654_v12 }
 0x371   :  { %3566 = vmatpush3.bf16.msra.mxu0 %v4607_v13  ;;  %3594 = vmatpush3.bf16.msra.mxu1 %v4609_v46  ;;  %v71_v46 = vld [vmem:[%s6190_s2 + $0x58] sm:$0xff] }
 0x372   :  { %3568 = vmatprep.subr.bf16.mxu0 %v4619_v47  ;;  %3596 = vmatprep.subr.bf16.mxu1 %v4621_v42  ;;  %v4667_v2 = vpack.c.bf16 %v71_v46, %v70_v52  ;;  %v118_v52 = vld [vmem:[%s6190_s2 + $0x1d0] sm:$0xff]  ;;  %v4684_v46 = vpack.c.bf16 %v89_v9, %v88_v30  ;;  %v103_v9 = vld [vmem:[%s6190_s2 + $0x158] sm:$0xff] }
 0x373   :  { %v4695_v29 = vpack.c.bf16 %v119_v63, %v118_v52  ;;  %v102_v30 = vld [vmem:[%s6190_s2 + $0x150] sm:$0xff]  ;;  %v91_v63 = vld [vmem:[%s6190_s2 + $0xf8] sm:$0xff] }
 0x374   :  { %6457 = vst [vmem:[#allocation58_spill] sm:$0xff] %v4667_v2  ;;  %6459 = vst [vmem:[#allocation60_spill] sm:$0xff] %v4684_v46  ;;  %v90_v52 = vld [vmem:[%s6190_s2 + $0xf0] sm:$0xff] }
 0x375   :  { %3570 = vmatpush3.bf16.msra.mxu0 %v4643_v14  ;;  %3598 = vmatpush3.bf16.msra.mxu1 %v4645_v61  ;;  %6460 = vst [vmem:[#allocation61_spill] sm:$0xff] %v4695_v29  ;;  %v1014_v61 = vpop.permute.xlu1 %1013 }
 0x376   :  { %3572 = vmatprep.subr.bf16.mxu0 %v4652_v51  ;;  %3600 = vmatprep.subr.bf16.mxu1 %v4654_v12 }
 0x379   :  { %3574 = vmatpush3.bf16.msra.mxu0 %v4667_v2  ;;  %3602 = vmatpush3.bf16.msra.mxu1 %v4669_v62  ;;  %v4697_v62 = vpack.c.bf16 %v73_v25, %v72_v59  ;;  %v4706_v2 = vpack.c.bf16 %v103_v9, %v102_v30  ;;  %v120_v59 = vld [vmem:[%s6190_s2 + $0x1e0] sm:$0xff]  ;;  %v4720_v25 = vpack.c.bf16 %v91_v63, %v90_v52  ;;  %v121_v30 = vld [vmem:[%s6190_s2 + $0x1e8] sm:$0xff]  ;;  %v74_v9 = vld [vmem:[%s6190_s2 + $0x70] sm:$0xff] }
 0x37a   :  { %3576 = vmatprep.subr.bf16.mxu0 %v4684_v46  ;;  %3604 = vmatprep.subr.bf16.mxu1 %v4695_v29  ;;  %v1002_v29 = vld [vmem:[%s6198_s10 + $0x20] sm:$0xff]  ;;  %v4734_v46 = vpack.c.bf16 %v121_v30, %v120_v59  ;;  %v123_v59 = vld [vmem:[%s6190_s2 + $0x1f8] sm:$0xff] }
 0x37b   :  { %6461 = vst [vmem:[#allocation62_spill] sm:$0xff] %v4697_v62  ;;  %6462 = vst [vmem:[#allocation63_spill] sm:$0xff] %v4706_v2  ;;  %v104_v63 = vld [vmem:[%s6190_s2 + $0x160] sm:$0xff]  ;;  %3357 = vmatmul.mubr.msk.f32.gmra.mrb[12].mxu0 %vm698_vm9, %v1002_v29  ;;  %3360 = vmatmul.mubr.msk.f32.gmra.mrb[12].mxu1 %vm698_vm9, %v1002_v29 }
 0x37c   :  { %6463 = vst [vmem:[#allocation64_spill] sm:$0xff] %v4720_v25  ;;  %6464 = vst [vmem:[#allocation65_spill] sm:$0xff] %v4734_v46 }
 0x37d   :  { %3578 = vmatpush3.bf16.msra.mxu0 %v4697_v62  ;;  %3606 = vmatpush3.bf16.msra.mxu1 %v4706_v2  ;;  %v75_v62 = vld [vmem:[%s6190_s2 + $0x78] sm:$0xff]  ;;  %v105_v2 = vld [vmem:[%s6190_s2 + $0x168] sm:$0xff] }
 0x37e   :  { %v4736_v52 = vpack.c.bf16 %v75_v62, %v74_v9  ;;  %3580 = vmatprep.subr.bf16.mxu0 %v4720_v25  ;;  %v4746_v12 = vpack.c.bf16 %v105_v2, %v104_v63  ;;  %3608 = vmatprep.subr.bf16.mxu1 %v4734_v46  ;;  %v122_v62 = vld [vmem:[%s6190_s2 + $0x1f0] sm:$0xff]  ;;  %v107_v9 = vld [vmem:[%s6190_s2 + $0x178] sm:$0xff] }
 0x37f   :  { %v4757_v30 = vpack.c.bf16 %v123_v59, %v122_v62  ;;  %v106_v2 = vld [vmem:[%s6190_s2 + $0x170] sm:$0xff]  ;;  %v4771_v62 = vpop.permute.xlu0 %1603 }
 0x380   :  { %6465 = vst [vmem:[#allocation66_spill] sm:$0xff] %v4736_v52  ;;  %6466 = vst [vmem:[#allocation67_spill] sm:$0xff] %v4746_v12  ;;  %v4767_v63 = vpack.c.bf16 %v107_v9, %v106_v2 }
 0x381   :  { %3582 = vmatpush3.bf16.msra.mxu0 %v4736_v52  ;;  %3610 = vmatpush3.bf16.msra.mxu1 %v4746_v12  ;;  %6467 = vst [vmem:[#allocation68_spill] sm:$0xff] %v4757_v30  ;;  %6469 = vst [vmem:[#allocation70_spill] sm:$0xff] %v4771_v62 }
 0x382   :  { %3533 = vmatprep.subr.mxu0 %v6423_v24  ;;  %6468 = vst [vmem:[#allocation69_spill] sm:$0xff] %v4767_v63  ;;  %3612 = vmatprep.subr.bf16.mxu1 %v4757_v30 }
 0x383   :  { %v4773_v59 = vpop.permute.xlu0 %1725 }
 0x384   :  { %6470 = vst [vmem:[#allocation71_spill] sm:$0xff] %v4773_v59 }
 0x385   :  { %3614 = vmatpush3.bf16.msra.mxu1 %v4767_v63 }
 0x387   :  { %v4775_v12 = vpop.permute.xlu0 %1777 }
 0x38b   :  { %v4777_v52 = vpop.permute.xlu0 %1837 }
 0x38c   :  { %6471 = vst [vmem:[#allocation72_spill] sm:$0xff] %v4777_v52 }
 0x38f   :  { %v4779_v46 = vpop.permute.xlu0 %1889 }
 0x393   :  { %v4781_v25 = vpop.permute.xlu0 %1949 }
 0x394   :  { %6472 = vst [vmem:[#allocation73_spill] sm:$0xff] %v4781_v25 }
 0x397   :  { %v4783_v51 = vpop.permute.xlu0 %2001 }
 0x398   :  { %6473 = vst [vmem:[#allocation74_spill] sm:$0xff] %v4783_v51 }
 0x39b   :  { %v4785_v29 = vpop.permute.xlu0 %2061 }
 0x39c   :  { %6474 = vst [vmem:[#allocation75_spill] sm:$0xff] %v4785_v29 }
 0x39f   :  { %v1009_v2 = vpop.permute.xlu0 %1008 }
 0x436   :  { %v1096_v9 = vpop.f32.mrb[8].mxu0 }
 0x437   :  { %v4787_v30 = vadd.f32 %v1096_v9, %v1009_v2  ;;  %v1098_v63 = vpop.f32.mrb[9].mxu0 }
 0x439   :  { %6475 = vst [vmem:[#allocation76_spill] sm:$0xff] %v4787_v30  ;;  %1632 = vrot.lane.b32.xlu1 %v4787_v30, %s3818_s21 }
 0x43a   :  { %v1102_v14 = vpop.f32.mrb[10].mxu0  ;;  %v1179_v42 = vpop.f32.mrb[8].mxu1 }
 0x43b   :  { %v4791_v47 = vadd.f32 %v1179_v42, %v1009_v2  ;;  %v1104_v13 = vpop.f32.mrb[11].mxu0  ;;  %v1181_v35 = vpop.f32.mrb[9].mxu1  ;;  %v4795_v48 = vadd.f32 %v1102_v14, %v1014_v61 }
 0x43c   :  { %v4793_v15 = vadd.f32 %v1104_v13, %v1014_v61  ;;  %v4836_v13 = vadd.f32 %v1181_v35, %v1009_v2 }
 0x43d   :  { %6476 = vst [vmem:[#allocation77_spill] sm:$0xff] %v4791_v47  ;;  %1640 = vrot.lane.b32.xlu0 %v4791_v47, %s3818_s21  ;;  %1688 = vrot.lane.b32.xlu1 %v4787_v30, %s3817_s20 }
 0x43e   :  { %v1185_v9 = vpop.f32.mrb[10].mxu1  ;;  %1260 = vmatprep.mubr.f32.mxu0 %v4793_v15  ;;  %6478 = vst [vmem:[#allocation79_spill] sm:$0xff] %v4836_v13 }
 0x43f   :  { %v1187_v26 = vpop.f32.mrb[11].mxu1  ;;  %1261 = vmatmul.mubr.f32.vlgmr.msra.gmra.mrb[14].mxu0 %v4795_v48  ;;  %v4805_v43 = vadd.f32 %v1185_v9, %v1014_v61 }
 0x440   :  { %v4803_v42 = vadd.f32 %v1187_v26, %v1014_v61  ;;  %v4830_v26 = vadd.f32 %v1098_v63, %v1009_v2  ;;  %3535 = vmatprep.mubr.msk.f32.mxu0 %vm3825_vm10, %v6423_v24 }
 0x441   :  { %1752 = vrot.lane.b32.xlu0 %v4791_v47, %s3819_s22  ;;  %1696 = vrot.lane.b32.xlu1 %v4791_v47, %s3817_s20 }
 0x442   :  { %1330 = vmatprep.mubr.f32.mxu1 %v4803_v42  ;;  %6477 = vst [vmem:[#allocation78_spill] sm:$0xff] %v4830_v26 }
 0x443   :  { %1331 = vmatmul.mubr.f32.vlgmr.msra.gmra.mrb[14].mxu1 %v4805_v43 }
 0x444   :  { %1510 = vmatprep.mubr.f32.mxu1 %v6423_v24 }
 0x445   :  { %1864 = vrot.lane.b32.xlu0 %v4791_v47, %s3821_s24  ;;  %1744 = vrot.lane.b32.xlu1 %v4787_v30, %s3819_s22 }
 0x449   :  { %1976 = vrot.lane.b32.xlu0 %v4791_v47, %s3823_s26  ;;  %1800 = vrot.lane.b32.xlu1 %v4787_v30, %s3820_s23 }
 0x44d   :  { %2024 = vrot.lane.b32.xlu0 %v4787_v30, %s3824_s27  ;;  %1808 = vrot.lane.b32.xlu1 %v4791_v47, %s3820_s23 }
 0x44e   :  { %v4870_v35 = vpop.f32.mrb[12].mxu0  ;;  %v4874_v61 = vpop.f32.mrb[12].mxu1 }
 0x44f   :  { %6479 = vst [vmem:[#allocation80_spill] sm:$0xff] %v4870_v35  ;;  %v4872_v14 = vpop.f32.mrb[13].mxu0  ;;  %6481 = vst [vmem:[#allocation82_spill] sm:$0xff] %v4874_v61  ;;  %v4876_v63 = vpop.f32.mrb[13].mxu1  ;;  %v125_v35 = vld [vmem:[%s6198_s10 + $0x28] sm:$0xff] }
 0x450   :  { %6480 = vst [vmem:[#allocation81_spill] sm:$0xff] %v4872_v14  ;;  %6482 = vst [vmem:[#allocation83_spill] sm:$0xff] %v4876_v63  ;;  %v124_v63 = vld [vmem:[%s6191_s3] sm:$0xff]  ;;  %v3826_v61 = vmov 1983009808  }
 0x451   :  { %2032 = vrot.lane.b32.xlu0 %v4791_v47, %s3824_s27  ;;  %1856 = vrot.lane.b32.xlu1 %v4787_v30, %s3821_s24  ;;  %v1418_v14 = vunpack.c.l.s4 %v3826_v61 }
 0x455   :  { %1636 = vrot.lane.b32.xlu0 %v4830_v26, %s3818_s21  ;;  %1912 = vrot.lane.b32.xlu1 %v4787_v30, %s3822_s25 }
 0x459   :  { %1644 = vrot.lane.b32.xlu0 %v4836_v13, %s3818_s21  ;;  %1920 = vrot.lane.b32.xlu1 %v4791_v47, %s3822_s25 }
 0x45d   :  { %1748 = vrot.lane.b32.xlu0 %v4830_v26, %s3819_s22  ;;  %1968 = vrot.lane.b32.xlu1 %v4787_v30, %s3823_s26 }
 0x461   :  { %1756 = vrot.lane.b32.xlu0 %v4836_v13, %s3819_s22  ;;  %1692 = vrot.lane.b32.xlu1 %v4830_v26, %s3817_s20 }
 0x465   :  { %1860 = vrot.lane.b32.xlu0 %v4830_v26, %s3821_s24  ;;  %1700 = vrot.lane.b32.xlu1 %v4836_v13, %s3817_s20 }
 0x469   :  { %1868 = vrot.lane.b32.xlu0 %v4836_v13, %s3821_s24  ;;  %1804 = vrot.lane.b32.xlu1 %v4830_v26, %s3820_s23 }
 0x46d   :  { %1972 = vrot.lane.b32.xlu0 %v4830_v26, %s3823_s26  ;;  %1812 = vrot.lane.b32.xlu1 %v4836_v13, %s3820_s23 }
 0x471   :  { %1980 = vrot.lane.b32.xlu0 %v4836_v13, %s3823_s26  ;;  %1916 = vrot.lane.b32.xlu1 %v4830_v26, %s3822_s25 }
 0x475   :  { %2028 = vrot.lane.b32.xlu0 %v4830_v26, %s3824_s27  ;;  %1924 = vrot.lane.b32.xlu1 %v4836_v13, %s3822_s25 }
 0x512   :  { %v3421_v2 = vpop.f32.mrb[14].mxu0 }
 0x513   :  { %v3422_v9 = vpop.f32.mrb[15].mxu0 }
 0x514   :  { %v3423_v54 = vadd.f32 %v3422_v9, %v3421_v2  ;;  %v1419_v2 = vunpack.c.0.s8 %v1418_v14  ;;  %v1416_v9 = vcombine.high %v124_v63, %v124_v63 }
 0x516   :  { %v3456_v55 = vpop.f32.mrb[14].mxu1 }
 0x517   :  { %v3457_v32 = vpop.f32.mrb[15].mxu1 }
 0x518   :  { %v3458_v44 = vadd.f32 %v3457_v32, %v3456_v55  ;;  %v1422_v32 = vsub.s32 %v1419_v2, %v4058_v1 }
 0x51a   :  { %v1333_v49 = vadd.f32 %v3458_v44, %v3423_v54  ;;  %v4889_v44 = vrot.slane %v124_v63, %v1422_v32  ;;  %v4891_v55 = vrot.slane %v1416_v9, %v1422_v32  ;;  %v4913_v9 = vpop.permute.xlu1 %1598 }
 0x51c   :  { %3534 = vmatpush3.msra.mxu0 %v1333_v49  ;;  %6483 = vst [vmem:[#allocation84_spill] sm:$0xff] %v4889_v44  ;;  %6484 = vst [vmem:[#allocation85_spill] sm:$0xff] %v4891_v55  ;;  %v4895_v49 = vcombine.high %v4889_v44, %v4889_v44  ;;  %v4899_v54 = vcombine.high %v4891_v55, %v4891_v55 }
 0x51d   :  { %3536 = vmatmul.mubr.msk.f32.vlgmr.msra.gmra.mrb[16].mxu0 %vm698_vm9, %v125_v35 }
 0x51e   :  { %1581 = vmatprep.mubr.f32.mxu0 %v6423_v24  ;;  %6485 = vst [vmem:[#allocation86_spill] sm:$0xff] %v4895_v49  ;;  %6486 = vst [vmem:[#allocation87_spill] sm:$0xff] %v4899_v54  ;;  %3363 = vmatprep.subr.msk.mxu1 %vm1437_vm11, %v4895_v49  ;;  %v4915_v32 = vpop.permute.xlu1 %1616 }
 0x51f   :  { %3366 = vmatprep.subr.msk.mxu0 %vm1437_vm11, %v4899_v54  ;;  %3364 = vmatpush1.msk.msra.mxu1 %vm1437_vm11, %v4889_v44 }
 0x520   :  { %3367 = vmatpush1.msk.msra.mxu0 %vm1437_vm11, %v4891_v55 }
 0x5f0   :  { %v1405_v1 = vpop.f32.mrb[16].mxu0 }
 0x5f1   :  { %v3362_v35 = vmul.f32 -1.442695, %v1405_v1  ;;  %v3537_v14 = vpop.f32.mrb[17].mxu0  ;;  %v4917_v1 = vpop.permute.xlu1 %1621 }
 0x5f2   :  { %6487 = vst [vmem:[#allocation88_spill] sm:$0xff] %v4917_v1 }
 0x5f3   :  { %3758 = vpow2.f32 %v3362_v35 }
 0x5f5   :  { %v4919_v35 = vpop.permute.xlu1 %1669 }
 0x5f6   :  { %6488 = vst [vmem:[#allocation89_spill] sm:$0xff] %v4919_v35  ;;  %v2089_v35 = vld [vmem:[%s6197_s9] sm:$0x3] }
 0x5f9   :  { %v4921_v14 = vpop.permute.xlu1 %1721 }
 0x5fd   :  { %v3759_v61 = vpop.eup %3758 }
 0x5fe   :  { %v1412_v63 = vadd.f32 1.0, %v3759_v61  ;;  %v4923_v61 = vpop.permute.xlu1 %1781 }
 0x5ff   :  { %6489 = vst [vmem:[#allocation90_spill] sm:$0xff] %v4923_v61 }
 0x600   :  { %3760 = vrcp.f32 %v1412_v63 }
 0x602   :  { %v4925_v63 = vpop.permute.xlu1 %1833 }
 0x606   :  { %v4927_v55 = vpop.permute.xlu1 %1893 }
 0x607   :  { %6490 = vst [vmem:[#allocation91_spill] sm:$0xff] %v4927_v55 }
 0x60a   :  { %v3761_v2 = vpop.eup %3760  ;;  %v4936_v29 = vpop.permute.xlu1 %1945 }
 0x60b   :  { %3365 = vmatmul.mubr.msk.f32.vlgmr.msra.gmra.mrb[16].mxu1 %vm1433_vm12, %v3761_v2  ;;  %3368 = vmatmul.mubr.msk.f32.vlgmr.msra.gmra.mrb[18].mxu0 %vm1433_vm12, %v3761_v2 }
 0x60c   :  { %2162 = vmatprep.mubr.f32.mxu1 %v6423_v24  ;;  %2233 = vmatprep.mubr.f32.mxu0 %v6423_v24 }
 0x6de   :  { %v1512_v2 = vpop.f32.mrb[16].mxu1  ;;  %v1583_v54 = vpop.f32.mrb[18].mxu0 }
 0x6df   :  { %v4930_v44 = vmul.f32 %v1512_v2, %v4795_v48  ;;  %v1514_v49 = vpop.f32.mrb[17].mxu1  ;;  %v1585_v24 = vpop.f32.mrb[19].mxu0  ;;  %v4939_v38 = vmul.f32 %v1583_v54, %v4805_v43 }
 0x6e0   :  { %v4945_v48 = vpop.permute.xlu1 %2005  ;;  %v4961_v54 = vpop.permute.xlu0 %1665  ;;  %v4981_v25 = vmul.f32 %v1585_v24, %v4803_v42 }
 0x6e1   :  { %6491 = vst [vmem:[#allocation92_spill] sm:$0xff] %v4930_v44  ;;  %1690 = vrot.lane.b32.xlu0 %v4930_v44, %s3817_s20  ;;  %1634 = vrot.lane.b32.xlu1 %v4930_v44, %s3818_s21  ;;  %6492 = vst [vmem:[#allocation93_spill] sm:$0xff] %v4939_v38 }
 0x6e2   :  { %6493 = vst [vmem:[#allocation94_spill] sm:$0xff] %v4945_v48  ;;  %v4970_v48 = vmul.f32 %v1514_v49, %v4793_v15  ;;  %6496 = vst [vmem:[#allocation97_spill] sm:$0xff] %v4981_v25 }
 0x6e4   :  { %v4955_v43 = vpop.permute.xlu1 %2057  ;;  %6495 = vst [vmem:[#allocation96_spill] sm:$0xff] %v4970_v48  ;;  %v4976_v37 = vpop.permute.xlu0 %1640 }
 0x6e5   :  { %1698 = vrot.lane.b32.xlu0 %v4939_v38, %s3817_s20  ;;  %1642 = vrot.lane.b32.xlu1 %v4939_v38, %s3818_s21  ;;  %6494 = vst [vmem:[#allocation95_spill] sm:$0xff] %v4955_v43 }
 0x6e8   :  { %v4963_v2 = vpop.permute.xlu1 %1632  ;;  %v4987_v15 = vpop.permute.xlu0 %1752 }
 0x6e9   :  { %1802 = vrot.lane.b32.xlu0 %v4930_v44, %s3820_s23  ;;  %1746 = vrot.lane.b32.xlu1 %v4930_v44, %s3819_s22 }
 0x6ec   :  { %v4978_v55 = vpop.permute.xlu1 %1688  ;;  %v4999_v24 = vpop.permute.xlu0 %1864 }
 0x6ed   :  { %1810 = vrot.lane.b32.xlu0 %v4939_v38, %s3820_s23  ;;  %1754 = vrot.lane.b32.xlu1 %v4939_v38, %s3819_s22 }
 0x6f0   :  { %v4989_v49 = vpop.permute.xlu1 %1696  ;;  %v5007_v61 = vpop.permute.xlu0 %1976 }
 0x6f1   :  { %1914 = vrot.lane.b32.xlu0 %v4930_v44, %s3822_s25  ;;  %1858 = vrot.lane.b32.xlu1 %v4930_v44, %s3821_s24 }
 0x6f4   :  { %v5001_v42 = vpop.permute.xlu1 %1744  ;;  %v5022_v59 = vpop.permute.xlu0 %2024 }
 0x6f5   :  { %1922 = vrot.lane.b32.xlu0 %v4939_v38, %s3822_s25  ;;  %1866 = vrot.lane.b32.xlu1 %v4939_v38, %s3821_s24  ;;  %6497 = vst [vmem:[#allocation98_spill] sm:$0xff] %v5022_v59 }
 0x6f8   :  { %v5009_v52 = vpop.permute.xlu1 %1800  ;;  %v5033_v62 = vpop.permute.xlu0 %2032 }
 0x6f9   :  { %1694 = vrot.lane.b32.xlu0 %v4970_v48, %s3817_s20  ;;  %1970 = vrot.lane.b32.xlu1 %v4930_v44, %s3823_s26  ;;  %6499 = vst [vmem:[#allocation100_spill] sm:$0xff] %v5033_v62 }
 0x6fc   :  { %v5024_v1 = vpop.permute.xlu1 %1808 }
 0x6fd   :  { %1702 = vrot.lane.b32.xlu0 %v4981_v25, %s3817_s20  ;;  %1978 = vrot.lane.b32.xlu1 %v4939_v38, %s3823_s26 }
 0x701   :  { %1806 = vrot.lane.b32.xlu0 %v4970_v48, %s3820_s23  ;;  %2026 = vrot.lane.b32.xlu1 %v4930_v44, %s3824_s27  ;;  %v5031_v44 = vld [vmem:[%s6192_s4 + $0x8] sm:$0xff] }
 0x702   :  { %6498 = vst [vmem:[#allocation99_spill] sm:$0xff] %v5031_v44 }
 0x705   :  { %1814 = vrot.lane.b32.xlu0 %v4981_v25, %s3820_s23  ;;  %2034 = vrot.lane.b32.xlu1 %v4939_v38, %s3824_s27  ;;  %v5035_v38 = vpop.permute.xlu1 %1856 }
 0x709   :  { %1918 = vrot.lane.b32.xlu0 %v4970_v48, %s3822_s25  ;;  %1638 = vrot.lane.b32.xlu1 %v4970_v48, %s3818_s21  ;;  %v5044_v60 = vpop.permute.xlu1 %1912 }
 0x70d   :  { %1926 = vrot.lane.b32.xlu0 %v4981_v25, %s3822_s25  ;;  %1646 = vrot.lane.b32.xlu1 %v4981_v25, %s3818_s21  ;;  %v5050_v43 = vpop.permute.xlu1 %1920 }
 0x711   :  { %2036 = vrot.lane.b32.xlu0 %v4836_v13, %s3824_s27  ;;  %1750 = vrot.lane.b32.xlu1 %v4970_v48, %s3819_s22  ;;  %v5060_v53 = vpop.permute.xlu1 %1968 }
 0x712   :  { %6500 = vst [vmem:[#allocation101_spill] sm:$0xff] %v5060_v53 }
 0x715   :  { %2092 = vperm.xlu0 %3737, %v2089_v35   ;;  %1758 = vrot.lane.b32.xlu1 %v4981_v25, %s3819_s22  ;;  %v1637_v35 = vpop.permute.xlu0 %1636  ;;  %v1693_v41 = vpop.permute.xlu1 %1692 }
 0x719   :  { %2712 = vperm.xlu0 %3737, %v5031_v44   ;;  %1862 = vrot.lane.b32.xlu1 %v4970_v48, %s3821_s24  ;;  %v1645_v58 = vpop.permute.xlu0 %1644 }
 0x71d   :  { %1870 = vrot.lane.b32.xlu1 %v4981_v25, %s3821_s24  ;;  %3741 = vset.pattern.permute.xlu0 %v6433_v34  ;;  %v5058_v34 = vpop.permute.xlu0 %1748 }
 0x71e   :  { %2824 = vperm.xlu0 %3741, %v5031_v44  }
 0x721   :  { %1974 = vrot.lane.b32.xlu1 %v4970_v48, %s3823_s26 }
 0x722   :  { %3742 = vset.pattern.permute.xlu0 %v6434_v27  ;;  %v5066_v27 = vpop.permute.xlu0 %1756 }
 0x723   :  { %2852 = vperm.xlu0 %3742, %v5031_v44  }
 0x725   :  { %1982 = vrot.lane.b32.xlu1 %v4981_v25, %s3823_s26 }
 0x727   :  { %3743 = vset.pattern.permute.xlu0 %v6435_v45  ;;  %v3384_v45 = vld [vmem:[%s6193_s5 + $0x8] sm:$0xff] }
 0x728   :  { %2880 = vperm.xlu0 %3743, %v5031_v44  }
 0x729   :  { %2030 = vrot.lane.b32.xlu1 %v4970_v48, %s3824_s27 }
 0x72c   :  { %3744 = vset.pattern.permute.xlu0 %v6436_v56  ;;  %v5075_v56 = vpop.permute.xlu0 %1860 }
 0x72d   :  { %2038 = vrot.lane.b32.xlu1 %v4981_v25, %s3824_s27  ;;  %2908 = vperm.xlu0 %3744, %v5031_v44   ;;  %v5077_v25 = vpop.permute.xlu1 %1700 }
 0x730   :  { %v5081_v48 = vpop.permute.xlu0 %1868 }
 0x731   :  { %2679 = vperm.xlu1 %3738, %v5031_v44   ;;  %3745 = vset.pattern.permute.xlu0 %v6431_v0  ;;  %v5083_v0 = vpop.permute.xlu1 %1804 }
 0x732   :  { %2768 = vperm.xlu0 %3745, %v5031_v44  }
 0x735   :  { %3739 = vset.pattern.permute.xlu1 %v6430_v28  ;;  %v5091_v51 = vpop.permute.xlu1 %1812 }
 0x736   :  { %2688 = vperm.xlu1 %3739, %v3384_v45   ;;  %v5089_v45 = vpop.permute.xlu0 %1972 }
 0x73a   :  { %3740 = vset.pattern.permute.xlu1 %v6429_v10  ;;  %v5094_v10 = vpop.permute.xlu0 %1980 }
 0x73b   :  { %2740 = vperm.xlu1 %3740, %v5031_v44   ;;  %6501 = vst [vmem:[#allocation102_spill] sm:$0xff] %v5094_v10  ;;  %v5096_v44 = vpop.permute.xlu1 %1916  ;;  %v1654_v10 = vsel %vm335_vm1, %v1645_v58, %v4963_v2 }
 0x73e   :  { %v5098_v7 = vpop.permute.xlu0 %2028 }
 0x73f   :  { %3746 = vset.pattern.permute.xlu1 %v6430_v28  ;;  %6502 = vst [vmem:[#allocation103_spill] sm:$0xff] %v5098_v7  ;;  %v5100_v11 = vpop.permute.xlu1 %1924 }
 0x740   :  { %1018 = vperm.xlu1 %3746, %v1005_v17   ;;  %6503 = vst [vmem:[#allocation104_spill] sm:$0xff] %v5100_v11 }
 0x744   :  { %3747 = vset.pattern.permute.xlu1 %v6428_v36  ;;  %v1652_v36 = vsel %vm335_vm1, %v4963_v2, %v1637_v35  ;;  %v1650_v2 = vsel %vm335_vm1, %v1637_v35, %v4976_v37  ;;  %v6513_v35 = vld [vmem:[#allocation12_spill] sm:$0xff] }
 0x745   :  { %v1658_v62 = vmul.f32 %v1650_v2, %v6513_v35 }
 0x753   :  { %v5102_v18 = vpop.permute.xlu0 %1690  ;;  %v5104_v22 = vpop.permute.xlu1 %1634 }
 0x754   :  { %6504 = vst [vmem:[#allocation105_spill] sm:$0xff] %v5102_v18  ;;  %6505 = vst [vmem:[#allocation106_spill] sm:$0xff] %v5104_v22  ;;  %v1606_v18 = vmul.f32 %v4913_v9, %v4787_v30  ;;  %v6510_v22 = vld [vmem:[#allocation11_spill] sm:$0xff]  ;;  %v1710_v30 = vsel %vm380_vm2, %v5077_v25, %v4978_v55 }
 0x755   :  { %v1657_v11 = vmul.f32 %v1652_v36, %v6510_v22  ;;  %v1608_v36 = vmul.f32 %v4913_v9, %v4791_v47  ;;  %v6511_v22 = vld [vmem:[#allocation15_spill] sm:$0xff] }
 0x756   :  { %v1624_v47 = vadd.f32 %v4915_v32, %v1606_v18  ;;  %v1820_v18 = vsel %vm470_vm4, %v5009_v52, %v5083_v0 }
 0x757   :  { %v5106_v28 = vpop.permute.xlu0 %1698  ;;  %v5108_v17 = vpop.permute.xlu1 %1642  ;;  %v1626_v2 = vadd.f32 %v4915_v32, %v1608_v36  ;;  %v1674_v36 = vmul.f32 %v4961_v54, %v1658_v62  ;;  %v1760_v62 = vsel %vm425_vm3, %v4987_v15, %v5066_v27 }
 0x758   :  { %6506 = vst [vmem:[#allocation107_spill] sm:$0xff] %v5106_v28  ;;  %6507 = vst [vmem:[#allocation108_spill] sm:$0xff] %v5108_v17  ;;  %v1708_v17 = vsel %vm380_vm2, %v4978_v55, %v1693_v41  ;;  %v1607_v28 = vmul.f32 %v4913_v9, %v4830_v26  ;;  %v1648_v55 = vsel %vm335_vm1, %v4976_v37, %v1645_v58  ;;  %v6514_v37 = vld [vmem:[#allocation14_spill] sm:$0xff] }
 0x759   :  { %v1713_v53 = vmul.f32 %v1708_v17, %v6511_v22  ;;  %v1766_v58 = vsel %vm425_vm3, %v5066_v27, %v5001_v42  ;;  %v1876_v27 = vsel %vm515_vm5, %v5035_v38, %v5075_v56 }
 0x75b   :  { %v5116_v59 = vpop.permute.xlu0 %1802  ;;  %v5118_v39 = vpop.permute.xlu1 %1746 }
 0x75c   :  { %6508 = vst [vmem:[#allocation109_spill] sm:$0xff] %v5116_v59  ;;  %6509 = vst [vmem:[#allocation110_spill] sm:$0xff] %v5118_v39  ;;  %v1656_v59 = vmul.f32 %v1654_v10, %v4116_v33  ;;  %v1609_v39 = vmul.f32 %v4913_v9, %v4836_v13  ;;  %v1673_v10 = vmul.f32 %v4961_v54, %v1657_v11 }
 0x75d   :  { %v1712_v33 = vmul.f32 %v1710_v30, %v4137_v40  ;;  %v1625_v9 = vadd.f32 %v4915_v32, %v1607_v28  ;;  %v1764_v13 = vsel %vm425_vm3, %v5001_v42, %v5058_v34  ;;  %v1659_v28 = vmul.f32 %v1648_v55, %v6514_v37 }
 0x75e   :  { %v1672_v17 = vmul.f32 %v4961_v54, %v1656_v59  ;;  %v1627_v11 = vadd.f32 %v4915_v32, %v1609_v39  ;;  %v1706_v30 = vsel %vm380_vm2, %v1693_v41, %v4989_v49  ;;  %v1729_v59 = vmul.f32 %v4921_v14, %v1713_v53 }
 0x75f   :  { %v5141_v26 = vpop.permute.xlu0 %1810  ;;  %v5143_v7 = vpop.permute.xlu1 %1754  ;;  %v1822_v39 = vsel %vm470_vm4, %v5091_v51, %v5009_v52  ;;  %v1769_v55 = vmul.f32 %v1764_v13, %v4148_v3  ;;  %v1728_v37 = vmul.f32 %v4921_v14, %v1712_v33  ;;  %v1762_v41 = vsel %vm425_vm3, %v5058_v34, %v4987_v15 }
 0x760   :  { %6512 = vst [vmem:[#allocation111_spill] sm:$0xff] %v5143_v7  ;;  %v1681_v7 = vadd.f32 %v1673_v10, %v1625_v9  ;;  %v1680_v35 = vadd.f32 %v1672_v17, %v1624_v47  ;;  %v1768_v53 = vmul.f32 %v1766_v58, %v4154_v5  ;;  %v1825_v52 = vmul.f32 %v1820_v18, %v4165_v23  ;;  %v6515_v10 = vld [vmem:[#allocation16_spill] sm:$0xff] }
 0x761   :  { %v1714_v9 = vmul.f32 %v1706_v30, %v6515_v10  ;;  %v1704_v33 = vsel %vm380_vm2, %v4989_v49, %v5077_v25  ;;  %v1824_v47 = vmul.f32 %v1822_v39, %v4172_v19  ;;  %v1675_v34 = vmul.f32 %v4961_v54, %v1659_v28  ;;  %v6516_v30 = vld [vmem:[#allocation18_spill] sm:$0xff] }
 0x762   :  { %v1737_v13 = vadd.f32 %v1729_v59, %v1681_v7  ;;  %v1874_v17 = vsel %vm515_vm5, %v5075_v56, %v4999_v24  ;;  %v1770_v58 = vmul.f32 %v1762_v41, %v4151_v4  ;;  %v1785_v25 = vmul.f32 %v4775_v12, %v1769_v55 }
 0x763   :  { %v5177_v32 = vpop.permute.xlu0 %1914  ;;  %v5179_v42 = vpop.permute.xlu1 %1858  ;;  %v1736_v49 = vadd.f32 %v1728_v37, %v1680_v35  ;;  %v1930_v7 = vsel %vm560_vm6, %v5096_v44, %v5050_v43  ;;  %v1771_v18 = vmul.f32 %v1760_v62, %v4157_v6  ;;  %v1784_v28 = vmul.f32 %v4775_v12, %v1768_v53 }
 0x764   :  { %v1715_v56 = vmul.f32 %v1704_v33, %v6516_v30  ;;  %v1841_v59 = vmul.f32 %v4925_v63, %v1825_v52  ;;  %v1730_v39 = vmul.f32 %v4921_v14, %v1714_v9  ;;  %v1880_v55 = vmul.f32 %v1876_v27, %v4180_v20 }
 0x765   :  { %v1881_v35 = vmul.f32 %v1874_v17, %v4184_v57  ;;  %v1840_v37 = vmul.f32 %v4925_v63, %v1824_v47  ;;  %v1793_v41 = vadd.f32 %v1785_v25, %v1737_v13  ;;  %v1818_v62 = vsel %vm470_vm4, %v5083_v0, %v5024_v1 }
 0x766   :  { %v1932_v53 = vsel %vm560_vm6, %v5044_v60, %v5096_v44  ;;  %v1937_v52 = vmul.f32 %v1930_v7, %v4205_v50  ;;  %v1682_v33 = vadd.f32 %v1674_v36, %v1626_v2  ;;  %v1683_v27 = vadd.f32 %v1675_v34, %v1627_v11 }
 0x767   :  { %v5209_v15 = vpop.permute.xlu1 %1866  ;;  %v5217_v54 = vpop.permute.xlu0 %1922  ;;  %v1786_v17 = vmul.f32 %v4775_v12, %v1770_v58  ;;  %v1792_v47 = vadd.f32 %v1784_v28, %v1736_v49  ;;  %v1787_v13 = vmul.f32 %v4775_v12, %v1771_v18  ;;  %v1731_v25 = vmul.f32 %v4921_v14, %v1715_v56  ;;  %v6517_v28 = vld [vmem:[#allocation100_spill] sm:$0xff]  ;;  %v6518_v56 = vld [vmem:[#allocation103_spill] sm:$0xff] }
 0x768   :  { %v1849_v20 = vadd.f32 %v1841_v59, %v1793_v41  ;;  %v1816_v0 = vsel %vm470_vm4, %v5024_v1, %v5091_v51  ;;  %v1826_v44 = vmul.f32 %v1818_v62, %v4169_v21  ;;  %v1986_v2 = vsel %vm605_vm7, %v5089_v45, %v5007_v61 }
 0x769   :  { %v1848_v11 = vadd.f32 %v1840_v37, %v1792_v47  ;;  %v1936_v36 = vmul.f32 %v1932_v53, %v4193_v16  ;;  %v1738_v12 = vadd.f32 %v1730_v39, %v1682_v33  ;;  %v1896_v14 = vmul.f32 %v4779_v46, %v1880_v55  ;;  %v6519_v55 = vld [vmem:[#allocation101_spill] sm:$0xff]  ;;  %v6520_v37 = vld [vmem:[#allocation31_spill] sm:$0xff] }
 0x76a   :  { %v1897_v58 = vmul.f32 %v4779_v46, %v1881_v35  ;;  %v1953_v49 = vmul.f32 %v4936_v29, %v1937_v52  ;;  %v1872_v1 = vsel %vm515_vm5, %v4999_v24, %v5081_v48  ;;  %v1878_v7 = vsel %vm515_vm5, %v5081_v48, %v5035_v38  ;;  %v6521_v48 = vld [vmem:[#allocation104_spill] sm:$0xff] }
 0x76b   :  { %v5236_v9 = vpop.permute.xlu1 %1970  ;;  %v5251_v34 = vpop.permute.xlu0 %1694  ;;  %v1827_v18 = vmul.f32 %v1816_v0, %v4175_v31  ;;  %v2042_v59 = vsel %vm650_vm8, %v6518_v56, %v6517_v28  ;;  %v1739_v39 = vadd.f32 %v1731_v25, %v1683_v27  ;;  %v1988_v35 = vsel %vm605_vm7, %v6519_v55, %v5089_v45  ;;  %v6522_v27 = vld [vmem:[#allocation98_spill] sm:$0xff]  ;;  %v6523_v45 = vld [vmem:[#allocation35_spill] sm:$0xff] }
 0x76c   :  { %v1993_v24 = vmul.f32 %v1986_v2, %v6520_v37  ;;  %v1905_v41 = vadd.f32 %v1897_v58, %v1849_v20  ;;  %v1842_v62 = vmul.f32 %v4925_v63, %v1826_v44  ;;  %v1904_v53 = vadd.f32 %v1896_v14, %v1848_v11  ;;  %v6525_v44 = vld [vmem:[#allocation24_spill] sm:$0xff]  ;;  %v6530_v28 = vld [vmem:[#allocation102_spill] sm:$0xff] }
 0x76d   :  { %v1952_v38 = vmul.f32 %v4936_v29, %v1936_v36  ;;  %v1928_v52 = vsel %vm560_vm6, %v5050_v43, %v6521_v48  ;;  %v2044_v47 = vsel %vm650_vm8, %v6522_v27, %v6518_v56  ;;  %v2049_v25 = vmul.f32 %v2042_v59, %v6523_v45  ;;  %v6526_v36 = vld [vmem:[#allocation30_spill] sm:$0xff]  ;;  %v6529_v45 = vld [vmem:[#allocation28_spill] sm:$0xff] }
 0x76e   :  { %v1961_v33 = vadd.f32 %v1953_v49, %v1905_v41  ;;  %v1934_v20 = vsel %vm560_vm6, %v6521_v48, %v5044_v60  ;;  %v1882_v2 = vmul.f32 %v1872_v1, %v6525_v44  ;;  %v1794_v11 = vadd.f32 %v1786_v17, %v1738_v12  ;;  %v6527_v49 = vld [vmem:[#allocation25_spill] sm:$0xff]  ;;  %v6528_v56 = vld [vmem:[#allocation74_spill] sm:$0xff] }
 0x76f   :  { %v5256_v51 = vpop.permute.xlu1 %1978  ;;  %v1992_v43 = vmul.f32 %v1988_v35, %v6526_v36  ;;  %v1843_v14 = vmul.f32 %v4925_v63, %v1827_v18  ;;  %v1703_v58 = vpop.permute.xlu0 %1702  ;;  %v1883_v41 = vmul.f32 %v1878_v7, %v6527_v49  ;;  %v2009_v37 = vmul.f32 %v6528_v56, %v1993_v24  ;;  %v6531_v1 = vld [vmem:[#allocation34_spill] sm:$0xff]  ;;  %v6532_v12 = vld [vmem:[#allocation29_spill] sm:$0xff]  ;;  %v6533_v7 = vld [vmem:[#allocation95_spill] sm:$0xff] }
 0x770   :  { %v1795_v59 = vadd.f32 %v1787_v13, %v1739_v39  ;;  %v1938_v27 = vmul.f32 %v1928_v52, %v6529_v45  ;;  %v1984_v60 = vsel %vm605_vm7, %v5007_v61, %v6530_v28  ;;  %v1960_v48 = vadd.f32 %v1952_v38, %v1904_v53  ;;  %v6534_v38 = vld [vmem:[#allocation32_spill] sm:$0xff] }
 0x771   :  { %v2048_v17 = vmul.f32 %v2044_v47, %v6531_v1  ;;  %v1939_v35 = vmul.f32 %v1934_v20, %v6532_v12  ;;  %v1990_v63 = vsel %vm605_vm7, %v6530_v28, %v6519_v55  ;;  %v2065_v13 = vmul.f32 %v6533_v7, %v2049_v25  ;;  %v6535_v20 = vld [vmem:[#allocation33_spill] sm:$0xff] }
 0x772   :  { %v2017_v39 = vadd.f32 %v2009_v37, %v1961_v33  ;;  %v2008_v24 = vmul.f32 %v6528_v56, %v1992_v43  ;;  %v1851_v52 = vadd.f32 %v1843_v14, %v1795_v59  ;;  %v1898_v61 = vmul.f32 %v4779_v46, %v1882_v2 }
 0x773   :  { %v5291_v0 = vpop.permute.xlu1 %2026  ;;  %v1899_v53 = vmul.f32 %v4779_v46, %v1883_v41  ;;  %v1994_v47 = vmul.f32 %v1984_v60, %v6534_v38  ;;  %v2064_v28 = vmul.f32 %v6533_v7, %v2048_v17  ;;  %v1955_v55 = vmul.f32 %v4936_v29, %v1939_v35  ;;  %v1807_v25 = vpop.permute.xlu0 %1806  ;;  %v6537_v60 = vld [vmem:[#allocation107_spill] sm:$0xff] }
 0x774   :  { %6524 = vst [vmem:[#allocation103_spill] sm:$0xff] %v5291_v0  ;;  %v1850_v0 = vadd.f32 %v1842_v62, %v1794_v11  ;;  %v1954_v62 = vmul.f32 %v4936_v29, %v1938_v27  ;;  %v1995_v11 = vmul.f32 %v1990_v63, %v6535_v20  ;;  %v2016_v1 = vadd.f32 %v2008_v24, %v1960_v48  ;;  %v6538_v29 = vld [vmem:[#allocation105_spill] sm:$0xff] }
 0x775   :  { %v5320_v43 = vadd.f32 %v2065_v13, %v2017_v39  ;;  %v1907_v14 = vadd.f32 %v1899_v53, %v1851_v52  ;;  %v2010_v46 = vmul.f32 %v6528_v56, %v1994_v47  ;;  %v1707_v48 = vsel %vm380_vm2, %v5251_v34, %v6537_v60  ;;  %v6539_v13 = vld [vmem:[#allocation93_spill] sm:$0xff]  ;;  %v6540_v39 = vld [vmem:[#allocation70_spill] sm:$0xff]  ;;  %v6541_v52 = vld [vmem:[#allocation92_spill] sm:$0xff] }
 0x776   :  { %v1906_v37 = vadd.f32 %v1898_v61, %v1850_v0  ;;  %v2011_v41 = vmul.f32 %v6528_v56, %v1995_v11  ;;  %v5324_v59 = vadd.f32 %v2064_v28, %v2016_v1  ;;  %v1709_v0 = vsel %vm380_vm2, %v6538_v29, %v5251_v34  ;;  %v6542_v53 = vld [vmem:[#allocation106_spill] sm:$0xff]  ;;  %v6543_v47 = vld [vmem:[#allocation96_spill] sm:$0xff]  ;;  %v6544_v28 = vld [vmem:[#allocation97_spill] sm:$0xff] }
 0x777   :  { %v5310_v18 = vpop.permute.xlu1 %2034  ;;  %v1963_v27 = vadd.f32 %v1955_v55, %v1907_v14  ;;  %v1711_v17 = vsel %vm380_vm2, %v1703_v58, %v6538_v29  ;;  %v1705_v1 = vsel %vm380_vm2, %v6537_v60, %v1703_v58  ;;  %v1815_v63 = vpop.permute.xlu0 %1814  ;;  %v1612_v24 = vmul.f32 %v6540_v39, %v6539_v13 }
 0x778   :  { %v1962_v2 = vadd.f32 %v1954_v62, %v1906_v37  ;;  %6536 = vst [vmem:[#allocation101_spill] sm:$0xff] %v5324_v59  ;;  %v1610_v61 = vmul.f32 %v6540_v39, %v6541_v52  ;;  %v1611_v62 = vmul.f32 %v6540_v39, %v6543_v47  ;;  %v1613_v58 = vmul.f32 %v6540_v39, %v6544_v28  ;;  %v6545_v47 = vld [vmem:[#allocation108_spill] sm:$0xff]  ;;  %v6554_v59 = vld [vmem:[#allocation110_spill] sm:$0xff] }
 0x779   :  { %v1717_v37 = vmul.f32 %v1709_v0, %v6511_v22  ;;  %v1718_v14 = vmul.f32 %v1707_v48, %v6515_v10  ;;  %v1716_v60 = vmul.f32 %v1711_v17, %v4137_v40  ;;  %v5360_v29 = vadd.f32 %v2011_v41, %v1963_v27  ;;  %v6547_v48 = vld [vmem:[#allocation88_spill] sm:$0xff]  ;;  %v6548_v17 = vld [vmem:[#allocation11_spill] sm:$0xff]  ;;  %v6552_v22 = vld [vmem:[#allocation14_spill] sm:$0xff] }
 0x77a   :  { %v5355_v55 = vadd.f32 %v2010_v46, %v1962_v2  ;;  %v1719_v56 = vmul.f32 %v1705_v1, %v6516_v30  ;;  %v6546_v2 = vld [vmem:[#allocation13_spill] sm:$0xff]  ;;  %v1630_v10 = vadd.f32 %v6547_v48, %v1612_v24  ;;  %v1628_v27 = vadd.f32 %v6547_v48, %v1610_v61  ;;  %v6551_v61 = vld [vmem:[#allocation12_spill] sm:$0xff] }
 0x77b   :  { %v1639_v33 = vpop.permute.xlu1 %1638  ;;  %v1819_v1 = vsel %vm470_vm4, %v1807_v25, %v5141_v26 }
 0x77c   :  { %v1653_v11 = vsel %vm335_vm1, %v6542_v53, %v1639_v33  ;;  %v1651_v13 = vsel %vm335_vm1, %v1639_v33, %v6545_v47  ;;  %v6549_v33 = vld [vmem:[#allocation109_spill] sm:$0xff] }
 0x77d   :  { %v1661_v41 = vmul.f32 %v1653_v11, %v6548_v17  ;;  %v1821_v30 = vsel %vm470_vm4, %v6549_v33, %v1807_v25  ;;  %v1823_v24 = vsel %vm470_vm4, %v1815_v63, %v6549_v33  ;;  %v1919_v11 = vpop.permute.xlu0 %1918  ;;  %v1662_v40 = vmul.f32 %v1651_v13, %v6551_v61 }
 0x77f   :  { %v1647_v35 = vpop.permute.xlu1 %1646 }
 0x780   :  { %v1655_v34 = vsel %vm335_vm1, %v1647_v35, %v6542_v53  ;;  %v1649_v39 = vsel %vm335_vm1, %v6545_v47, %v1647_v35  ;;  %v1629_v35 = vadd.f32 %v6547_v48, %v1611_v62  ;;  %v6550_v47 = vld [vmem:[#allocation71_spill] sm:$0xff]  ;;  %v6553_v62 = vld [vmem:[#allocation89_spill] sm:$0xff] }
 0x781   :  { %v1660_v46 = vmul.f32 %v1655_v34, %v6546_v2  ;;  %v1631_v34 = vadd.f32 %v6547_v48, %v1613_v58  ;;  %v1733_v0 = vmul.f32 %v6550_v47, %v1717_v37  ;;  %v1663_v17 = vmul.f32 %v1649_v39, %v6552_v22  ;;  %v6556_v22 = vld [vmem:[#allocation72_spill] sm:$0xff] }
 0x782   :  { %v1734_v2 = vmul.f32 %v6550_v47, %v1718_v14  ;;  %v1732_v28 = vmul.f32 %v6550_v47, %v1716_v60  ;;  %v1735_v25 = vmul.f32 %v6550_v47, %v1719_v56  ;;  %v1829_v37 = vmul.f32 %v1821_v30, %v4165_v23 }
 0x783   :  { %v1751_v53 = vpop.permute.xlu1 %1750  ;;  %v1676_v52 = vmul.f32 %v6553_v62, %v1660_v46  ;;  %v1830_v48 = vmul.f32 %v1819_v1, %v4169_v21  ;;  %v1677_v33 = vmul.f32 %v6553_v62, %v1661_v41  ;;  %v1817_v14 = vsel %vm470_vm4, %v5141_v26, %v1815_v63  ;;  %v6555_v1 = vld [vmem:[#allocation111_spill] sm:$0xff] }
 0x784   :  { %v1765_v13 = vsel %vm425_vm3, %v6554_v59, %v1751_v53  ;;  %v1828_v60 = vmul.f32 %v1823_v24, %v4172_v19  ;;  %v1933_v56 = vsel %vm560_vm6, %v5177_v32, %v1919_v11  ;;  %v1931_v39 = vsel %vm560_vm6, %v1919_v11, %v5217_v54 }
 0x785   :  { %v1678_v46 = vmul.f32 %v6553_v62, %v1662_v40  ;;  %v1679_v41 = vmul.f32 %v6553_v62, %v1663_v17  ;;  %v1684_v63 = vadd.f32 %v1676_v52, %v1628_v27  ;;  %v1763_v47 = vsel %vm425_vm3, %v1751_v53, %v6555_v1  ;;  %v6557_v53 = vld [vmem:[#allocation90_spill] sm:$0xff] }
 0x786   :  { %v1773_v24 = vmul.f32 %v1765_v13, %v4148_v3  ;;  %v1845_v11 = vmul.f32 %v6556_v22, %v1829_v37  ;;  %v1831_v40 = vmul.f32 %v1817_v14, %v4175_v31  ;;  %v1940_v17 = vmul.f32 %v1933_v56, %v4193_v16  ;;  %v6558_v16 = vld [vmem:[#allocation73_spill] sm:$0xff] }
 0x787   :  { %v1759_v58 = vpop.permute.xlu1 %1758  ;;  %v1685_v62 = vadd.f32 %v1677_v33, %v1629_v35  ;;  %v1846_v52 = vmul.f32 %v6556_v22, %v1830_v48  ;;  %v1844_v27 = vmul.f32 %v6556_v22, %v1828_v60  ;;  %v1774_v37 = vmul.f32 %v1763_v47, %v4151_v4 }
 0x788   :  { %v1767_v30 = vsel %vm425_vm3, %v1759_v58, %v6554_v59  ;;  %v1761_v59 = vsel %vm425_vm3, %v6555_v1, %v1759_v58  ;;  %v1941_v58 = vmul.f32 %v1931_v39, %v4205_v50  ;;  %v1686_v48 = vadd.f32 %v1678_v46, %v1630_v10  ;;  %v6559_v50 = vld [vmem:[#allocation23_spill] sm:$0xff] }
 0x789   :  { %v1772_v26 = vmul.f32 %v1767_v30, %v4154_v5  ;;  %v1927_v30 = vpop.permute.xlu0 %1926  ;;  %v1775_v14 = vmul.f32 %v1761_v59, %v4157_v6  ;;  %v1687_v33 = vadd.f32 %v1679_v41, %v1631_v34  ;;  %v1789_v60 = vmul.f32 %v6557_v53, %v1773_v24 }
 0x78a   :  { %v1740_v56 = vadd.f32 %v1732_v28, %v1684_v63  ;;  %v1847_v1 = vmul.f32 %v6556_v22, %v1831_v40  ;;  %v1956_v31 = vmul.f32 %v6558_v16, %v1940_v17  ;;  %v1741_v23 = vadd.f32 %v1733_v0, %v1685_v62 }
 0x78b   :  { %v1863_v21 = vpop.permute.xlu1 %1862  ;;  %v1788_v19 = vmul.f32 %v6557_v53, %v1772_v26  ;;  %v1957_v28 = vmul.f32 %v6558_v16, %v1941_v58  ;;  %v1929_v22 = vsel %vm560_vm6, %v5217_v54, %v1927_v30  ;;  %v1790_v0 = vmul.f32 %v6557_v53, %v1774_v37 }
 0x78c   :  { %v1875_v13 = vsel %vm515_vm5, %v1863_v21, %v5209_v15  ;;  %v1877_v35 = vsel %vm515_vm5, %v5179_v42, %v1863_v21  ;;  %v1935_v34 = vsel %vm560_vm6, %v1927_v30, %v5177_v32  ;;  %v1797_v41 = vadd.f32 %v1789_v60, %v1741_v23  ;;  %v6560_v30 = vld [vmem:[#allocation91_spill] sm:$0xff] }
 0x78d   :  { %v1885_v39 = vmul.f32 %v1875_v13, %v4184_v57  ;;  %v1796_v47 = vadd.f32 %v1788_v19, %v1740_v56  ;;  %v1884_v59 = vmul.f32 %v1877_v35, %v6559_v50  ;;  %v1791_v19 = vmul.f32 %v6557_v53, %v1775_v14  ;;  %v2037_v46 = vpop.permute.xlu0 %2036  ;;  %v6562_v13 = vld [vmem:[#allocation98_spill] sm:$0xff] }
 0x78e   :  { %v1743_v63 = vadd.f32 %v1735_v25, %v1687_v33  ;;  %v1942_v62 = vmul.f32 %v1929_v22, %v6529_v45  ;;  %v6561_v25 = vld [vmem:[#allocation100_spill] sm:$0xff]  ;;  %v2046_v58 = vsel %vm650_vm8, %v2037_v46, %v6562_v13  ;;  %v1943_v35 = vmul.f32 %v1935_v34, %v6532_v12 }
 0x78f   :  { %v1871_v26 = vpop.permute.xlu1 %1870  ;;  %v1852_v32 = vadd.f32 %v1844_v27, %v1796_v47  ;;  %v1901_v23 = vmul.f32 %v6560_v30, %v1885_v39  ;;  %v2040_v53 = vsel %vm650_vm8, %v6561_v25, %v2037_v46  ;;  %v6563_v27 = vld [vmem:[#allocation31_spill] sm:$0xff] }
 0x790   :  { %v1873_v21 = vsel %vm515_vm5, %v5209_v15, %v1871_v26  ;;  %v1879_v10 = vsel %vm515_vm5, %v1871_v26, %v5179_v42  ;;  %v1742_v15 = vadd.f32 %v1734_v2, %v1686_v48  ;;  %v1900_v2 = vmul.f32 %v6560_v30, %v1884_v59 }
 0x791   :  { %v1886_v42 = vmul.f32 %v1873_v21, %v6525_v44  ;;  %v1887_v40 = vmul.f32 %v1879_v10, %v6527_v49  ;;  %v1799_v14 = vadd.f32 %v1791_v19, %v1743_v63  ;;  %v1853_v48 = vadd.f32 %v1845_v11, %v1797_v41  ;;  %v6564_v21 = vld [vmem:[#allocation36_spill] sm:$0xff]  ;;  %v6565_v11 = vld [vmem:[#allocation37_spill] sm:$0xff] }
 0x792   :  { %v1798_v37 = vadd.f32 %v1790_v0, %v1742_v15  ;;  %v2050_v10 = vmul.f32 %v2040_v53, %v6564_v21  ;;  %v2051_v22 = vmul.f32 %v2046_v58, %v6565_v11  ;;  %v1908_v0 = vadd.f32 %v1900_v2, %v1852_v32  ;;  %v6568_v2 = vld [vmem:[#allocation34_spill] sm:$0xff] }
 0x793   :  { %v1975_v24 = vpop.permute.xlu1 %1974  ;;  %v1902_v26 = vmul.f32 %v6560_v30, %v1886_v42  ;;  %v1903_v39 = vmul.f32 %v6560_v30, %v1887_v40  ;;  %v1909_v19 = vadd.f32 %v1901_v23, %v1853_v48  ;;  %v1855_v46 = vadd.f32 %v1847_v1, %v1799_v14  ;;  %v6567_v1 = vld [vmem:[#allocation103_spill] sm:$0xff] }
 0x794   :  { %v1987_v54 = vsel %vm605_vm7, %v1975_v24, %v5256_v51  ;;  %v1989_v17 = vsel %vm605_vm7, %v5236_v9, %v1975_v24  ;;  %v1854_v34 = vadd.f32 %v1846_v52, %v1798_v37  ;;  %v1958_v63 = vmul.f32 %v6558_v16, %v1942_v62  ;;  %v6566_v24 = vld [vmem:[#allocation94_spill] sm:$0xff]  ;;  %v6569_v23 = vld [vmem:[#allocation35_spill] sm:$0xff] }
 0x795   :  { %v1996_v33 = vmul.f32 %v1989_v17, %v6526_v36  ;;  %v1997_v60 = vmul.f32 %v1987_v54, %v6563_v27  ;;  %v1911_v17 = vadd.f32 %v1903_v39, %v1855_v46  ;;  %v1964_v30 = vadd.f32 %v1956_v31, %v1908_v0 }
 0x796   :  { %v1910_v54 = vadd.f32 %v1902_v26, %v1854_v34  ;;  %v1965_v25 = vadd.f32 %v1957_v28, %v1909_v19  ;;  %v2066_v53 = vmul.f32 %v6533_v7, %v2050_v10  ;;  %v2067_v13 = vmul.f32 %v6533_v7, %v2051_v22 }
 0x797   :  { %v1983_v56 = vpop.permute.xlu1 %1982  ;;  %v2012_v42 = vmul.f32 %v6566_v24, %v1996_v33 }
 0x798   :  { %v1985_v47 = vsel %vm605_vm7, %v5256_v51, %v1983_v56  ;;  %v1991_v59 = vsel %vm605_vm7, %v1983_v56, %v5236_v9  ;;  %v1959_v51 = vmul.f32 %v6558_v16, %v1943_v35  ;;  %v2013_v9 = vmul.f32 %v6566_v24, %v1997_v60  ;;  %v6570_v35 = vld [vmem:[#allocation75_spill] sm:$0xff] }
 0x799   :  { %v1998_v15 = vmul.f32 %v1985_v47, %v6534_v38  ;;  %v1999_v41 = vmul.f32 %v1991_v59, %v6535_v20  ;;  %v2020_v14 = vadd.f32 %v2012_v42, %v1964_v30  ;;  %v1966_v56 = vadd.f32 %v1958_v63, %v1910_v54  ;;  %v6572_v42 = vld [vmem:[#allocation101_spill] sm:$0xff] }
 0x79a   :  { %v2021_v31 = vadd.f32 %v2013_v9, %v1965_v25  ;;  %v1967_v26 = vadd.f32 %v1959_v51, %v1911_v17  ;;  %v2074_v22 = vadd.f32 %v2066_v53, %v5355_v55  ;;  %v2075_v34 = vadd.f32 %v2067_v13, %v5360_v29  ;;  %v2088_v29 = vld [vmem:[%s6196_s8] sm:$0x3]  ;;  %v6578_v53 = vld [vmem:[#allocation42_spill] sm:$0xff]  ;;  %v6579_v13 = vld [vmem:[#allocation43_spill] sm:$0xff] }
 0x79b   :  { %v2031_v40 = vpop.permute.xlu1 %2030  ;;  %v2014_v58 = vmul.f32 %v6566_v24, %v1998_v15  ;;  %v2015_v37 = vmul.f32 %v6566_v24, %v1999_v41  ;;  %v6571_v51 = vmax.f32 %v5320_v43, 0.0  ;;  %v6573_v9 = vmax.f32 %v6572_v42, 0.0  ;;  %v6575_v43 = vld [vmem:[#allocation39_spill] sm:$0xff]  ;;  %v6577_v25 = vld [vmem:[#allocation41_spill] sm:$0xff]  ;;  %v6607_v42 = vld [vmem:[#allocation86_spill] sm:$0xff] }
 0x79c   :  { %v2043_v52 = vsel %vm650_vm8, %v2031_v40, %v5310_v18  ;;  %v2045_v32 = vsel %vm650_vm8, %v6567_v1, %v2031_v40  ;;  %v2082_v17 = vmax.f32 %v2074_v22, 0.0  ;;  %v6596_v22 = vld [vmem:[#allocation60_spill] sm:$0xff] }
 0x79d   :  { %v2052_v62 = vmul.f32 %v2045_v32, %v6568_v2  ;;  %v2053_v16 = vmul.f32 %v2043_v52, %v6569_v23  ;;  %v2022_v0 = vadd.f32 %v2014_v58, %v1966_v56  ;;  %v2023_v19 = vadd.f32 %v2015_v37, %v1967_v26  ;;  %v6580_v58 = vld [vmem:[#allocation44_spill] sm:$0xff]  ;;  %v6581_v37 = vld [vmem:[#allocation45_spill] sm:$0xff]  ;;  %v6591_v26 = vld [vmem:[#allocation55_spill] sm:$0xff] }
 0x79e   :  { %v2083_v52 = vmax.f32 %v2075_v34, 0.0  ;;  %v6588_v56 = vld [vmem:[#allocation52_spill] sm:$0xff]  ;;  %v6599_v34 = vld [vmem:[#allocation63_spill] sm:$0xff] }
 0x79f   :  { %v2068_v48 = vmul.f32 %v6570_v35, %v2052_v62  ;;  %v2069_v33 = vmul.f32 %v6570_v35, %v2053_v16  ;;  %v2039_v60 = vpop.permute.xlu1 %2038  ;;  %v6574_v62 = vld [vmem:[#allocation38_spill] sm:$0xff]  ;;  %v6576_v16 = vld [vmem:[#allocation40_spill] sm:$0xff] }
 0x7a0   :  { %v2041_v28 = vsel %vm650_vm8, %v5310_v18, %v2039_v60  ;;  %v2047_v7 = vsel %vm650_vm8, %v2039_v60, %v6567_v1  ;;  %v6586_v60 = vld [vmem:[#allocation50_spill] sm:$0xff] }
 0x7a1   :  { %v2076_v39 = vadd.f32 %v2068_v48, %v2020_v14  ;;  %v2054_v47 = vmul.f32 %v2041_v28, %v6564_v21  ;;  %v2055_v59 = vmul.f32 %v2047_v7, %v6565_v11  ;;  %v2077_v10 = vadd.f32 %v2069_v33, %v2021_v31  ;;  %v6582_v14 = vld [vmem:[#allocation46_spill] sm:$0xff]  ;;  %v6584_v48 = vld [vmem:[#allocation48_spill] sm:$0xff]  ;;  %v6585_v33 = vld [vmem:[#allocation49_spill] sm:$0xff] }
 0x7a2   :  { %v6587_v31 = vld [vmem:[#allocation51_spill] sm:$0xff]  ;;  %v6589_v28 = vld [vmem:[#allocation53_spill] sm:$0xff]  ;;  %v6590_v7 = vld [vmem:[#allocation54_spill] sm:$0xff] }
 0x7a3   :  { %v2084_v46 = vmax.f32 %v2076_v39, 0.0  ;;  %v2070_v18 = vmul.f32 %v6570_v35, %v2054_v47  ;;  %v2071_v15 = vmul.f32 %v6570_v35, %v2055_v59  ;;  %v2085_v41 = vmax.f32 %v2077_v10, 0.0  ;;  %v6583_v35 = vld [vmem:[#allocation47_spill] sm:$0xff]  ;;  %v6592_v39 = vld [vmem:[#allocation56_spill] sm:$0xff]  ;;  %v6593_v47 = vld [vmem:[#allocation57_spill] sm:$0xff] }
 0x7a4   :  { %v6594_v59 = vld [vmem:[#allocation58_spill] sm:$0xff]  ;;  %v6595_v10 = vld [vmem:[#allocation59_spill] sm:$0xff]  ;;  %v6638_v21 = vld [vmem:[#allocation17_spill] sm:$0xff] }
 0x7a5   :  { %v2078_v63 = vadd.f32 %v2070_v18, %v2022_v0  ;;  %v3615_v24 = vpack.c.bf16 %v2085_v41, %v6571_v51  ;;  %v3617_v40 = vpack.c.bf16 %v2084_v46, %v6573_v9  ;;  %v2079_v54 = vadd.f32 %v2071_v15, %v2023_v19  ;;  %v6597_v0 = vld [vmem:[#allocation61_spill] sm:$0xff]  ;;  %v6598_v19 = vld [vmem:[#allocation62_spill] sm:$0xff]  ;;  %v6600_v46 = vld [vmem:[#allocation64_spill] sm:$0xff]  ;;  %v2093_v9 = vpop.permute.xlu0 %2092 }
 0x7a6   :  { %v6601_v18 = vld [vmem:[#allocation65_spill] sm:$0xff]  ;;  %v6602_v15 = vld [vmem:[#allocation66_spill] sm:$0xff]  ;;  %v6603_v41 = vld [vmem:[#allocation67_spill] sm:$0xff] }
 0x7a7   :  { %v2086_v55 = vmax.f32 %v2078_v63, 0.0  ;;  %3616 = vmatprep.subr.bf16.mxu1 %v3615_v24  ;;  %v2087_v1 = vmax.f32 %v2079_v54, 0.0  ;;  %v6604_v63 = vmov 0.0   ;;  %v6605_v51 = vld [vmem:[#allocation68_spill] sm:$0xff]  ;;  %v6606_v24 = vld [vmem:[#allocation69_spill] sm:$0xff] }
 0x7a8   :  { %3618 = vmatpush1.bf16.msra.mxu1 %v3617_v40 }
 0x7a9   :  { %v3619_v32 = vpack.c.bf16 %v2087_v1, %v2083_v52  ;;  %v3621_v30 = vpack.c.bf16 %v2086_v55, %v2082_v17  ;;  %3624 = vmatprep.subr.bf16.mxu1 %v6574_v62 }
 0x7ab   :  { %3369 = vmatmul.mubr.msk.f32.vlgmr.msra.gmra.mrb[18].mxu1 %vm140_vm0, %v2088_v29  ;;  %3620 = vmatprep.subr.bf16.mxu0 %v3619_v32 }
 0x7ac   :  { %3622 = vmatpush1.bf16.msra.mxu0 %v3621_v30  ;;  %3626 = vmatpush3.bf16.msra.mxu1 %v6575_v43 }
 0x7ad   :  { %3628 = vmatprep.subr.bf16.mxu1 %v6576_v16  ;;  %3656 = vmatprep.subr.bf16.mxu0 %v6577_v25 }
 0x7af   :  { %3370 = vmatmul.mubr.msk.f32.vlgmr.msra.gmra.mrb[20].mxu0 %vm140_vm0, %v2088_v29 }
 0x7b0   :  { %3630 = vmatpush3.bf16.msra.mxu1 %v6578_v53  ;;  %3658 = vmatpush3.bf16.msra.mxu0 %v6579_v13 }
 0x7b1   :  { %3632 = vmatprep.subr.bf16.mxu1 %v6580_v58  ;;  %3660 = vmatprep.subr.bf16.mxu0 %v6581_v37 }
 0x7b4   :  { %3634 = vmatpush3.bf16.msra.mxu1 %v6582_v14  ;;  %3662 = vmatpush3.bf16.msra.mxu0 %v6583_v35 }
 0x7b5   :  { %3636 = vmatprep.subr.bf16.mxu1 %v6584_v48  ;;  %3664 = vmatprep.subr.bf16.mxu0 %v6585_v33 }
 0x7b8   :  { %3638 = vmatpush3.bf16.msra.mxu1 %v6586_v60  ;;  %3666 = vmatpush3.bf16.msra.mxu0 %v6587_v31  ;;  %v6608_v31 = vld [vmem:[#allocation9_spill] sm:$0xff] }
 0x7b9   :  { %3640 = vmatprep.subr.bf16.mxu1 %v6588_v56  ;;  %3668 = vmatprep.subr.bf16.mxu0 %v6589_v28 }
 0x7bc   :  { %3642 = vmatpush3.bf16.msra.mxu1 %v6590_v7  ;;  %3670 = vmatpush3.bf16.msra.mxu0 %v6591_v26  ;;  %v6609_v26 = vld [vmem:[#allocation78_spill] sm:$0xff] }
 0x7bd   :  { %3644 = vmatprep.subr.bf16.mxu1 %v6592_v39  ;;  %3672 = vmatprep.subr.bf16.mxu0 %v6593_v47 }
 0x7c0   :  { %3646 = vmatpush3.bf16.msra.mxu1 %v6594_v59  ;;  %3674 = vmatpush3.bf16.msra.mxu0 %v6595_v10  ;;  %v6610_v59 = vld [vmem:[#allocation76_spill] sm:$0xff] }
 0x7c1   :  { %3648 = vmatprep.subr.bf16.mxu1 %v6596_v22  ;;  %3676 = vmatprep.subr.bf16.mxu0 %v6597_v0 }
 0x7c4   :  { %3650 = vmatpush3.bf16.msra.mxu1 %v6598_v19  ;;  %3678 = vmatpush3.bf16.msra.mxu0 %v6599_v34  ;;  %v6611_v19 = vld [vmem:[#allocation79_spill] sm:$0xff] }
 0x7c5   :  { %3652 = vmatprep.subr.bf16.mxu1 %v6600_v46  ;;  %3680 = vmatprep.subr.bf16.mxu0 %v6601_v18  ;;  %v6612_v46 = vld [vmem:[#allocation77_spill] sm:$0xff] }
 0x7c8   :  { %3654 = vmatpush3.bf16.msra.mxu1 %v6602_v15  ;;  %3682 = vmatpush3.bf16.msra.mxu0 %v6603_v41  ;;  %v6613_v15 = vld [vmem:[#allocation84_spill] sm:$0xff] }
 0x7c9   :  { %3538 = vmatprep.subr.mxu1 %v6604_v63  ;;  %3684 = vmatprep.subr.bf16.mxu0 %v6605_v51 }
 0x7cc   :  { %3686 = vmatpush3.bf16.msra.mxu0 %v6606_v24 }
 0x7cd   :  { %3377 = vmatprep.subr.msk.mxu0 %vm1437_vm11, %v6607_v42 }
 0x87e   :  { %v2164_v40 = vpop.f32.mrb[18].mxu1 }
 0x87f   :  { %v2165_v54 = vadd.f32 %v2164_v40, %v2093_v9  ;;  %v2166_v17 = vpop.f32.mrb[19].mxu1 }
 0x880   :  { %v2167_v55 = vadd.f32 %v2166_v17, %v2093_v9  ;;  %v3782_v17 = vld [vmem:[%s6198_s10 + $0x28] sm:$0xff] }
 0x881   :  { %v3371_v52 = vmul.f32 -1.442695, %v2165_v54 }
 0x882   :  { %v3372_v1 = vmul.f32 -1.442695, %v2167_v55  ;;  %v2235_v29 = vpop.f32.mrb[20].mxu0  ;;  %v6614_v55 = vld [vmem:[#allocation87_spill] sm:$0xff] }
 0x883   :  { %3762 = vpow2.f32 %v3371_v52  ;;  %v2236_v32 = vadd.f32 %v2235_v29, %v2093_v9  ;;  %v2237_v30 = vpop.f32.mrb[21].mxu0  ;;  %v6615_v52 = vld [vmem:[#allocation85_spill] sm:$0xff]  ;;  %v6616_v29 = vmov 0  }
 0x884   :  { %3764 = vpow2.f32 %v3372_v1  ;;  %v2238_v62 = vadd.f32 %v2237_v30, %v2093_v9  ;;  %v5593_v1 = vld [vmem:[%s6192_s4 + $0x10] sm:$0xff] }
 0x885   :  { %v3373_v43 = vmul.f32 -1.442695, %v2236_v32  ;;  %2929 = vperm.xlu1 %3747, %v5593_v1   ;;  %3018 = vperm.xlu0 %3745, %v5593_v1   ;;  %v6617_v32 = vmov 3   ;;  %v6618_v30 = vld [vmem:[#allocation99_spill] sm:$0xff] }
 0x886   :  { %v3374_v16 = vmul.f32 -1.442695, %v2238_v62  ;;  %v6619_v62 = vmov 1  }
 0x887   :  { %3766 = vpow2.f32 %v3373_v43 }
 0x888   :  { %3768 = vpow2.f32 %v3374_v16 }
 0x889   :  { %3748 = vset.pattern.permute.xlu1 %v6616_v29  ;;  %3750 = vset.pattern.permute.xlu0 %v6617_v32 }
 0x88a   :  { %2962 = vperm.xlu1 %3748, %v5593_v1   ;;  %2796 = vperm.xlu0 %3750, %v6618_v30  }
 0x88d   :  { %v3763_v25 = vpop.eup %3762 }
 0x88e   :  { %v3765_v53 = vpop.eup %3764  ;;  %v2252_v13 = vadd.f32 1.0, %v3763_v25  ;;  %3749 = vset.pattern.permute.xlu1 %v6619_v62 }
 0x88f   :  { %v2253_v58 = vadd.f32 1.0, %v3765_v53  ;;  %2990 = vperm.xlu1 %3749, %v5593_v1  }
 0x890   :  { %3770 = vrcp.f32 %v2252_v13 }
 0x891   :  { %v3767_v37 = vpop.eup %3766  ;;  %3772 = vrcp.f32 %v2253_v58 }
 0x892   :  { %v3769_v14 = vpop.eup %3768  ;;  %v2254_v35 = vadd.f32 1.0, %v3767_v37  ;;  %v6620_v37 = vld [vmem:[#allocation10_spill] sm:$0xff] }
 0x893   :  { %v2255_v48 = vadd.f32 1.0, %v3769_v14  ;;  %3756 = vset.pattern.permute.xlu1 %v6616_v29 }
 0x894   :  { %3774 = vrcp.f32 %v2254_v35 }
 0x895   :  { %3776 = vrcp.f32 %v2255_v48 }
 0x89a   :  { %v3771_v33 = vpop.eup %3770 }
 0x89b   :  { %v5562_v60 = vpop.eup %3772  ;;  %v2267_v56 = vrot.slane %v3771_v33, %v6608_v31  ;;  %v2287_v14 = vrot.slane %v3771_v33, %v6620_v37 }
 0x89c   :  { %v2271_v28 = vrot.slane %v5562_v60, %v6608_v31  ;;  %v2291_v48 = vrot.slane %v5562_v60, %v6620_v37 }
 0x89d   :  { %v2280_v10 = vmul.f32 %v2267_v56, %v6610_v59 }
 0x89e   :  { %v3775_v7 = vpop.eup %3774  ;;  %v2281_v39 = vmul.f32 %v2271_v28, %v6609_v26  ;;  %v6621_v26 = vld [vmem:[#allocation92_spill] sm:$0xff] }
 0x89f   :  { %v5568_v47 = vpop.eup %3776  ;;  %v2275_v22 = vrot.slane %v3775_v7, %v6608_v31  ;;  %v2295_v35 = vrot.slane %v3775_v7, %v6620_v37  ;;  %v2300_v59 = vmul.f32 %v2287_v14, %v6621_v26  ;;  %v6624_v7 = vld [vmem:[#allocation97_spill] sm:$0xff] }
 0x8a0   :  { %2368 = vmatprep.mubr.f32.mxu1 %v2281_v39  ;;  %v2279_v0 = vrot.slane %v5568_v47, %v6608_v31  ;;  %v2299_v31 = vrot.slane %v5568_v47, %v6620_v37 }
 0x8a1   :  { %2369 = vmatmul.mubr.f32.vlgmr.msra.gmra.mrb[20].mxu1 %v2280_v10  ;;  %v2282_v18 = vmul.f32 %v2275_v22, %v6612_v46 }
 0x8a2   :  { %v2283_v34 = vmul.f32 %v2279_v0, %v6611_v19  ;;  %3540 = vmatprep.mubr.msk.f32.mxu1 %vm3825_vm10, %v6604_v63  ;;  %v6622_v0 = vld [vmem:[#allocation93_spill] sm:$0xff] }
 0x8a3   :  { %v2302_v19 = vmul.f32 %v2295_v35, %v6622_v0 }
 0x8a4   :  { %2438 = vmatprep.mubr.f32.mxu0 %v2283_v34 }
 0x8a5   :  { %2439 = vmatmul.mubr.f32.vlgmr.msra.gmra.mrb[22].mxu0 %v2282_v18 }
 0x8a6   :  { %3378 = vmatpush1.msk.msra.mxu0 %vm1437_vm11, %v6613_v15  ;;  %2587 = vmatprep.mubr.f32.mxu0 %v6604_v63 }
 0x974   :  { %v3493_v41 = vpop.f32.mrb[20].mxu1 }
 0x975   :  { %v3494_v51 = vpop.f32.mrb[21].mxu1 }
 0x976   :  { %v3495_v24 = vadd.f32 %v3494_v51, %v3493_v41  ;;  %v6623_v41 = vld [vmem:[#allocation96_spill] sm:$0xff] }
 0x977   :  { %v2301_v33 = vmul.f32 %v2291_v48, %v6623_v41 }
 0x978   :  { %v3528_v42 = vpop.f32.mrb[22].mxu0 }
 0x979   :  { %v3529_v9 = vpop.f32.mrb[23].mxu0 }
 0x97a   :  { %v3530_v40 = vadd.f32 %v3529_v9, %v3528_v42 }
 0x97c   :  { %v2441_v54 = vadd.f32 %v3530_v40, %v3495_v24  ;;  %v2303_v24 = vmul.f32 %v2299_v31, %v6624_v7 }
 0x97e   :  { %3539 = vmatpush3.msra.mxu1 %v2441_v54  ;;  %v3386_v54 = vld [vmem:[%s6193_s5 + $0x10] sm:$0xff] }
 0x97f   :  { %3541 = vmatmul.mubr.msk.f32.vlgmr.msra.gmra.mrb[22].mxu1 %vm698_vm9, %v3782_v17  ;;  %3380 = vmatprep.subr.msk.mxu1 %vm1437_vm11, %v6614_v55  ;;  %v5699_v17 = vpop.permute.xlu1 %2679 }
 0x980   :  { %3381 = vmatpush1.msk.msra.mxu1 %vm1437_vm11, %v6615_v52  ;;  %2658 = vmatprep.mubr.f32.mxu1 %v6604_v63  ;;  %v5707_v52 = vpop.permute.xlu0 %2712 }
 0x983   :  { %v5703_v55 = vpop.permute.xlu1 %2688 }
 0x984   :  { %v5711_v32 = vpop.permute.xlu0 %2824 }
 0x988   :  { %v5715_v30 = vpop.permute.xlu0 %2852 }
 0xa52   :  { %v2510_v43 = vpop.f32.mrb[22].mxu1 }
 0xa53   :  { %v3376_v16 = vmul.f32 -1.442695, %v2510_v43  ;;  %v3542_v25 = vpop.f32.mrb[23].mxu1  ;;  %v5719_v43 = vpop.permute.xlu0 %2880 }
 0xa55   :  { %3778 = vpow2.f32 %v3376_v16 }
 0xa57   :  { %v5723_v25 = vpop.permute.xlu0 %2908 }
 0xa58   :  { %6632 = vst [vmem:[#allocation74_spill] sm:$0xff] %v5723_v25 }
 0xa5f   :  { %v3779_v53 = vpop.eup %3778 }
 0xa60   :  { %v2517_v13 = vadd.f32 1.0, %v3779_v53 }
 0xa62   :  { %3780 = vrcp.f32 %v2517_v13  ;;  %v5727_v13 = vpop.permute.xlu0 %2768 }
 0xa66   :  { %v5729_v37 = vpop.permute.xlu0 %3018 }
 0xa67   :  { %6634 = vst [vmem:[#allocation95_spill] sm:$0xff] %v5729_v37 }
 0xa6a   :  { %v5733_v48 = vpop.permute.xlu0 %2796 }
 0xa6c   :  { %v3781_v58 = vpop.eup %3780 }
 0xa6d   :  { %3379 = vmatmul.mubr.msk.f32.vlgmr.msra.gmra.mrb[24].mxu0 %vm1433_vm12, %v3781_v58  ;;  %3382 = vmatmul.mubr.msk.f32.vlgmr.msra.gmra.mrb[24].mxu1 %vm1433_vm12, %v3781_v58 }
 0xa6e   :  { %3243 = vmatprep.mubr.f32.mxu0 %v6604_v63  ;;  %3314 = vmatprep.mubr.f32.mxu1 %v6604_v63 }
 0xb40   :  { %v2589_v56 = vpop.f32.mrb[24].mxu0  ;;  %v2660_v28 = vpop.f32.mrb[24].mxu1 }
 0xb41   :  { %v2665_v22 = vmul.f32 %v2589_v56, %v2280_v10  ;;  %v2667_v46 = vmul.f32 %v2660_v28, %v2282_v18  ;;  %v2591_v15 = vpop.f32.mrb[25].mxu0  ;;  %v2662_v63 = vpop.f32.mrb[25].mxu1  ;;  %v6626_v10 = vmov 6   ;;  %v6628_v18 = vmov 8  }
 0xb42   :  { %v2666_v51 = vmul.f32 %v2591_v15, %v2281_v39  ;;  %v2668_v42 = vmul.f32 %v2662_v63, %v2283_v34  ;;  %v6625_v39 = vmov 5   ;;  %v6627_v34 = vmov 7  }
 0xb43   :  { %v5618_v60 = vadd.f32 %v2665_v22, %v2300_v59  ;;  %v5620_v9 = vadd.f32 %v2667_v46, %v2302_v19 }
 0xb44   :  { %v5622_v47 = vadd.f32 %v2666_v51, %v2301_v33  ;;  %v5624_v40 = vadd.f32 %v2668_v42, %v2303_v24  ;;  %v6635_v24 = vld [vmem:[#allocation13_spill] sm:$0xff] }
 0xb45   :  { %2723 = vrot.lane.b32.xlu1 %v5618_v60, %s3817_s20  ;;  %2695 = vrot.lane.b32.xlu0 %v5618_v60, %s3818_s21  ;;  %v2682_v37 = vmul.f32 %v5699_v17, %v5618_v60 }
 0xb47   :  { %v2691_v11 = vadd.f32 %v5703_v55, %v2682_v37 }
 0xb49   :  { %2751 = vrot.lane.b32.xlu1 %v5618_v60, %s3819_s22  ;;  %2699 = vrot.lane.b32.xlu0 %v5620_v9, %s3818_s21 }
 0xb4d   :  { %2779 = vrot.lane.b32.xlu1 %v5618_v60, %s3820_s23  ;;  %2727 = vrot.lane.b32.xlu0 %v5620_v9, %s3817_s20 }
 0xb51   :  { %2807 = vrot.lane.b32.xlu1 %v5618_v60, %s3821_s24  ;;  %2755 = vrot.lane.b32.xlu0 %v5620_v9, %s3819_s22 }
 0xb55   :  { %2835 = vrot.lane.b32.xlu1 %v5618_v60, %s3822_s25  ;;  %2783 = vrot.lane.b32.xlu0 %v5620_v9, %s3820_s23 }
 0xb59   :  { %2863 = vrot.lane.b32.xlu1 %v5618_v60, %s3823_s26  ;;  %2811 = vrot.lane.b32.xlu0 %v5620_v9, %s3821_s24 }
 0xb5d   :  { %2867 = vrot.lane.b32.xlu1 %v5620_v9, %s3823_s26  ;;  %2839 = vrot.lane.b32.xlu0 %v5620_v9, %s3822_s25 }
 0xb61   :  { %2891 = vrot.lane.b32.xlu1 %v5618_v60, %s3824_s27  ;;  %2865 = vrot.lane.b32.xlu0 %v5622_v47, %s3823_s26 }
 0xb65   :  { %2895 = vrot.lane.b32.xlu1 %v5620_v9, %s3824_s27  ;;  %2869 = vrot.lane.b32.xlu0 %v5624_v40, %s3823_s26 }
 0xb69   :  { %2697 = vrot.lane.b32.xlu1 %v5622_v47, %s3818_s21  ;;  %2893 = vrot.lane.b32.xlu0 %v5622_v47, %s3824_s27 }
 0xb6d   :  { %2897 = vrot.lane.b32.xlu0 %v5624_v40, %s3824_s27  ;;  %2701 = vrot.lane.b32.xlu1 %v5624_v40, %s3818_s21 }
 0xb71   :  { %3046 = vperm.xlu0 %3750, %v5593_v1   ;;  %2725 = vrot.lane.b32.xlu1 %v5622_v47, %s3817_s20 }
 0xb75   :  { %2729 = vrot.lane.b32.xlu1 %v5624_v40, %s3817_s20  ;;  %3751 = vset.pattern.permute.xlu0 %v6625_v39 }
 0xb76   :  { %3074 = vperm.xlu0 %3751, %v5593_v1  }
 0xb79   :  { %2753 = vrot.lane.b32.xlu1 %v5622_v47, %s3819_s22 }
 0xb7a   :  { %3752 = vset.pattern.permute.xlu0 %v6626_v10 }
 0xb7b   :  { %3102 = vperm.xlu0 %3752, %v5593_v1  }
 0xb7d   :  { %2757 = vrot.lane.b32.xlu1 %v5624_v40, %s3819_s22 }
 0xb7f   :  { %3753 = vset.pattern.permute.xlu0 %v6627_v34 }
 0xb80   :  { %3130 = vperm.xlu0 %3753, %v5593_v1  }
 0xb81   :  { %2781 = vrot.lane.b32.xlu1 %v5622_v47, %s3820_s23 }
 0xb84   :  { %3754 = vset.pattern.permute.xlu0 %v6628_v18  ;;  %v6636_v18 = vld [vmem:[#allocation11_spill] sm:$0xff] }
 0xb85   :  { %2785 = vrot.lane.b32.xlu1 %v5624_v40, %s3820_s23  ;;  %3158 = vperm.xlu0 %3754, %v5593_v1   ;;  %v5709_v1 = vpop.permute.xlu1 %2740 }
 0xb89   :  { %2809 = vrot.lane.b32.xlu1 %v5622_v47, %s3821_s24  ;;  %3755 = vset.pattern.permute.xlu0 %v6616_v29  ;;  %v5713_v29 = vpop.permute.xlu1 %1018 }
 0xb8a   :  { %2938 = vperm.xlu0 %3755, %v3386_v54   ;;  %6629 = vst [vmem:[#allocation104_spill] sm:$0xff] %v5713_v29 }
 0xb8d   :  { %2813 = vrot.lane.b32.xlu1 %v5624_v40, %s3821_s24  ;;  %v5717_v62 = vpop.permute.xlu1 %2929 }
 0xb8e   :  { %6630 = vst [vmem:[#allocation24_spill] sm:$0xff] %v5717_v62  ;;  %v6637_v62 = vld [vmem:[#allocation15_spill] sm:$0xff] }
 0xb91   :  { %2837 = vrot.lane.b32.xlu1 %v5622_v47, %s3822_s25  ;;  %v5721_v16 = vpop.permute.xlu1 %2962 }
 0xb92   :  { %6631 = vst [vmem:[#allocation25_spill] sm:$0xff] %v5721_v16 }
 0xb95   :  { %2841 = vrot.lane.b32.xlu1 %v5624_v40, %s3822_s25  ;;  %v5725_v53 = vpop.permute.xlu1 %2990 }
 0xb96   :  { %6633 = vst [vmem:[#allocation102_spill] sm:$0xff] %v5725_v53  ;;  %v2683_v53 = vmul.f32 %v5699_v17, %v5622_v47 }
 0xb98   :  { %v2692_v60 = vadd.f32 %v5703_v55, %v2683_v53 }
 0xbb7   :  { %v2724_v58 = vpop.permute.xlu1 %2723  ;;  %v2696_v56 = vpop.permute.xlu0 %2695 }
 0xbbb   :  { %v2752_v14 = vpop.permute.xlu1 %2751  ;;  %v2700_v59 = vpop.permute.xlu0 %2699 }
 0xbbf   :  { %v5731_v35 = vpop.permute.xlu1 %2779  ;;  %v5743_v0 = vpop.permute.xlu0 %2727 }
 0xbc3   :  { %v5735_v31 = vpop.permute.xlu1 %2807  ;;  %v5749_v15 = vpop.permute.xlu0 %2755 }
 0xbc7   :  { %v5737_v28 = vpop.permute.xlu1 %2835  ;;  %v5751_v41 = vpop.permute.xlu0 %2783 }
 0xbcb   :  { %v5739_v26 = vpop.permute.xlu1 %2863  ;;  %v5758_v10 = vpop.permute.xlu0 %2811 }
 0xbcf   :  { %v5741_v22 = vpop.permute.xlu1 %2867 }
 0xbd3   :  { %v5745_v19 = vpop.permute.xlu1 %2891 }
 0xbd7   :  { %v5747_v46 = vpop.permute.xlu1 %2895 }
 0xbdb   :  { %v2698_v63 = vpop.permute.xlu1 %2697 }
 0xbdc   :  { %v2705_v7 = vsel %vm335_vm1, %v2696_v56, %v2698_v63 }
 0xbdd   :  { %v2708_v54 = vmul.f32 %v2705_v7, %v6636_v18  ;;  %v5774_v18 = vpop.permute.xlu0 %2839 }
 0xbdf   :  { %v2702_v33 = vpop.permute.xlu1 %2701 }
 0xbe0   :  { %v2706_v51 = vsel %vm335_vm1, %v2702_v33, %v2696_v56 }
 0xbe1   :  { %v2707_v42 = vmul.f32 %v2706_v51, %v6635_v24  ;;  %v2716_v24 = vmul.f32 %v5707_v52, %v2708_v54  ;;  %v2866_v25 = vpop.permute.xlu0 %2865 }
 0xbe3   :  { %v2726_v39 = vpop.permute.xlu1 %2725  ;;  %v2715_v16 = vmul.f32 %v5707_v52, %v2707_v42 }
 0xbe4   :  { %v2733_v34 = vsel %vm380_vm2, %v2724_v58, %v2726_v39 }
 0xbe5   :  { %v2736_v56 = vmul.f32 %v2733_v34, %v6637_v62  ;;  %v2719_v12 = vadd.f32 %v2715_v16, %v2691_v11  ;;  %v2704_v16 = vsel %vm335_vm1, %v2698_v63, %v2700_v59  ;;  %v2684_v63 = vmul.f32 %v5699_v17, %v5620_v9  ;;  %v6640_v9 = vld [vmem:[#allocation16_spill] sm:$0xff] }
 0xbe7   :  { %v2730_v29 = vpop.permute.xlu1 %2729  ;;  %v2744_v47 = vmul.f32 %v5709_v1, %v2736_v56 }
 0xbe8   :  { %v2734_v51 = vsel %vm380_vm2, %v2730_v29, %v2724_v58  ;;  %v2720_v58 = vadd.f32 %v2716_v24, %v2692_v60  ;;  %v2709_v60 = vmul.f32 %v2704_v16, %v6551_v61 }
 0xbe9   :  { %v2735_v7 = vmul.f32 %v2734_v51, %v6638_v21 }
 0xbea   :  { %v2748_v37 = vadd.f32 %v2744_v47, %v2720_v58 }
 0xbeb   :  { %v2743_v42 = vmul.f32 %v5709_v1, %v2735_v7  ;;  %v2754_v34 = vpop.permute.xlu1 %2753 }
 0xbec   :  { %v2761_v62 = vsel %vm425_vm3, %v2752_v14, %v2754_v34 }
 0xbed   :  { %v2747_v45 = vadd.f32 %v2743_v42, %v2719_v12  ;;  %v2764_v54 = vmul.f32 %v2761_v62, %v4148_v3  ;;  %v2873_v12 = vsel %vm605_vm7, %v5739_v26, %v2866_v25  ;;  %v2732_v62 = vsel %vm380_vm2, %v2726_v39, %v5743_v0 }
 0xbee   :  { %v2685_v42 = vmul.f32 %v5699_v17, %v5624_v40  ;;  %v2760_v39 = vsel %vm425_vm3, %v2754_v34, %v5749_v15 }
 0xbef   :  { %v2772_v51 = vmul.f32 %v5727_v13, %v2764_v54  ;;  %v2758_v21 = vpop.permute.xlu1 %2757  ;;  %v6639_v54 = vld [vmem:[#allocation19_spill] sm:$0xff] }
 0xbf0   :  { %v2762_v11 = vsel %vm425_vm3, %v2758_v21, %v2752_v14  ;;  %v2872_v14 = vsel %vm605_vm7, %v2866_v25, %v5741_v22  ;;  %v2875_v25 = vmul.f32 %v2873_v12, %v6526_v36  ;;  %v2731_v12 = vsel %vm380_vm2, %v5743_v0, %v2730_v29  ;;  %v6643_v0 = vld [vmem:[#allocation20_spill] sm:$0xff] }
 0xbf1   :  { %v2776_v53 = vadd.f32 %v2772_v51, %v2748_v37  ;;  %v2763_v56 = vmul.f32 %v2762_v11, %v4154_v5  ;;  %v2870_v51 = vpop.permute.xlu0 %2869  ;;  %v2737_v11 = vmul.f32 %v2732_v62, %v6640_v9  ;;  %v2876_v16 = vmul.f32 %v2872_v14, %v6563_v27  ;;  %v6641_v14 = vld [vmem:[#allocation21_spill] sm:$0xff] }
 0xbf2   :  { %v2765_v62 = vmul.f32 %v2760_v39, %v4151_v4 }
 0xbf3   :  { %v2771_v24 = vmul.f32 %v5727_v13, %v2763_v56  ;;  %v2782_v7 = vpop.permute.xlu1 %2781  ;;  %v2703_v56 = vsel %vm335_vm1, %v2700_v59, %v2702_v33  ;;  %v2693_v59 = vadd.f32 %v5703_v55, %v2684_v63  ;;  %v2694_v33 = vadd.f32 %v5703_v55, %v2685_v42 }
 0xbf4   :  { %v2789_v47 = vsel %vm470_vm4, %v5731_v35, %v2782_v7  ;;  %v2788_v40 = vsel %vm470_vm4, %v2782_v7, %v5751_v41  ;;  %v2745_v29 = vmul.f32 %v5709_v1, %v2737_v11  ;;  %v5837_v36 = vmul.f32 %v5719_v43, %v2876_v16 }
 0xbf5   :  { %v2775_v58 = vadd.f32 %v2771_v24, %v2747_v45  ;;  %v2792_v37 = vmul.f32 %v2789_v47, %v6639_v54  ;;  %v2717_v45 = vmul.f32 %v5707_v52, %v2709_v60  ;;  %v6642_v60 = vld [vmem:[#allocation14_spill] sm:$0xff]  ;;  %v2793_v39 = vmul.f32 %v2788_v40, %v6643_v0 }
 0xbf6   :  { %v2710_v27 = vmul.f32 %v2703_v56, %v6642_v60  ;;  %v2759_v55 = vsel %vm425_vm3, %v5749_v15, %v2758_v21  ;;  %v2773_v56 = vmul.f32 %v5727_v13, %v2765_v62  ;;  %v2871_v40 = vsel %vm605_vm7, %v5741_v22, %v2870_v51 }
 0xbf7   :  { %v2800_v17 = vmul.f32 %v5733_v48, %v2792_v37  ;;  %v2786_v34 = vpop.permute.xlu1 %2785  ;;  %v5831_v37 = vmul.f32 %v5719_v43, %v2875_v25  ;;  %v2721_v42 = vadd.f32 %v2717_v45, %v2693_v59  ;;  %v2894_v25 = vpop.permute.xlu0 %2893  ;;  %v2874_v21 = vsel %vm605_vm7, %v2870_v51, %v5739_v26 }
 0xbf8   :  { %v2790_v24 = vsel %vm470_vm4, %v2786_v34, %v5731_v35  ;;  %v6644_v35 = vld [vmem:[#allocation18_spill] sm:$0xff]  ;;  %v2787_v15 = vsel %vm470_vm4, %v5751_v41, %v2786_v34  ;;  %v2718_v45 = vmul.f32 %v5707_v52, %v2710_v27  ;;  %v2766_v62 = vmul.f32 %v2759_v55, %v4157_v6 }
 0xbf9   :  { %v2804_v7 = vadd.f32 %v2800_v17, %v2776_v53  ;;  %v2791_v47 = vmul.f32 %v2790_v24, %v6641_v14  ;;  %v2738_v54 = vmul.f32 %v2731_v12, %v6644_v35  ;;  %v2749_v12 = vadd.f32 %v2745_v29, %v2721_v42 }
 0xbfa   :  { %v2801_v24 = vmul.f32 %v5733_v48, %v2793_v39  ;;  %v2901_v22 = vsel %vm650_vm8, %v5745_v19, %v2894_v25  ;;  %v2877_v29 = vmul.f32 %v2871_v40, %v6534_v38 }
 0xbfb   :  { %v2799_v53 = vmul.f32 %v5733_v48, %v2791_v47  ;;  %v2810_v63 = vpop.permute.xlu1 %2809  ;;  %v2746_v59 = vmul.f32 %v5709_v1, %v2738_v54  ;;  %v2777_v41 = vadd.f32 %v2773_v56, %v2749_v12  ;;  %v2900_v1 = vsel %vm650_vm8, %v2894_v25, %v5747_v46  ;;  %v2898_v42 = vpop.permute.xlu0 %2897 }
 0xbfc   :  { %v2816_v11 = vsel %vm515_vm5, %v2810_v63, %v5758_v10  ;;  %v2817_v16 = vsel %vm515_vm5, %v5735_v31, %v2810_v63  ;;  %v2903_v55 = vmul.f32 %v2901_v22, %v6568_v2  ;;  %v2774_v63 = vmul.f32 %v5727_v13, %v2766_v62  ;;  %v6646_v62 = vld [vmem:[#allocation26_spill] sm:$0xff]  ;;  %v6647_v22 = vld [vmem:[#allocation27_spill] sm:$0xff] }
 0xbfd   :  { %v2803_v17 = vadd.f32 %v2799_v53, %v2775_v58  ;;  %v2819_v26 = vmul.f32 %v2817_v16, %v6559_v50  ;;  %v2820_v51 = vmul.f32 %v2816_v11, %v4184_v57  ;;  %v6645_v58 = vld [vmem:[#allocation22_spill] sm:$0xff]  ;;  %v2722_v53 = vadd.f32 %v2718_v45, %v2694_v33 }
 0xbfe   :  { %v2794_v34 = vmul.f32 %v2787_v15, %v6645_v58  ;;  %v2878_v45 = vmul.f32 %v2874_v21, %v6535_v20 }
 0xbff   :  { %v2814_v47 = vpop.permute.xlu1 %2813  ;;  %v2827_v56 = vmul.f32 %v5711_v32, %v2819_v26  ;;  %v2750_v40 = vadd.f32 %v2746_v59, %v2722_v53  ;;  %v2902_v59 = vsel %vm650_vm8, %v2898_v42, %v5745_v19 }
 0xc00   :  { %v2815_v27 = vsel %vm515_vm5, %v5758_v10, %v2814_v47  ;;  %v2818_v52 = vsel %vm515_vm5, %v2814_v47, %v5735_v31  ;;  %v2805_v10 = vadd.f32 %v2801_v24, %v2777_v41  ;;  %v2828_v31 = vmul.f32 %v5711_v32, %v2820_v51 }
 0xc01   :  { %v2821_v54 = vmul.f32 %v2815_v27, %v6525_v44  ;;  %v2822_v39 = vmul.f32 %v2818_v52, %v6527_v49  ;;  %v2802_v15 = vmul.f32 %v5733_v48, %v2794_v34  ;;  %v2899_v48 = vsel %vm650_vm8, %v5747_v46, %v2898_v42  ;;  %v6648_v52 = vld [vmem:[#allocation74_spill] sm:$0xff] }
 0xc02   :  { %v2778_v51 = vadd.f32 %v2774_v63, %v2750_v40  ;;  %v2831_v47 = vadd.f32 %v2827_v56, %v2803_v17  ;;  %v2832_v41 = vadd.f32 %v2828_v31, %v2804_v7  ;;  %v6649_v17 = vld [vmem:[#allocation28_spill] sm:$0xff]  ;;  %v6650_v63 = vld [vmem:[#allocation29_spill] sm:$0xff] }
 0xc03   :  { %v2829_v11 = vmul.f32 %v5711_v32, %v2821_v54  ;;  %v2830_v16 = vmul.f32 %v5711_v32, %v2822_v39  ;;  %v2838_v25 = vpop.permute.xlu1 %2837  ;;  %v2904_v32 = vmul.f32 %v2900_v1, %v6569_v23  ;;  %v2911_v54 = vmul.f32 %v6648_v52, %v2903_v55  ;;  %v6651_v56 = vld [vmem:[#allocation36_spill] sm:$0xff]  ;;  %v6652_v55 = vld [vmem:[#allocation37_spill] sm:$0xff] }
 0xc04   :  { %v2844_v33 = vsel %vm560_vm6, %v2838_v25, %v5774_v18  ;;  %v2845_v13 = vsel %vm560_vm6, %v5737_v28, %v2838_v25  ;;  %v2806_v39 = vadd.f32 %v2802_v15, %v2778_v51  ;;  %v2905_v31 = vmul.f32 %v2899_v48, %v6651_v56 }
 0xc05   :  { %v2833_v12 = vadd.f32 %v2829_v11, %v2805_v10  ;;  %v2847_v24 = vmul.f32 %v2845_v13, %v6646_v62  ;;  %v2848_v26 = vmul.f32 %v2844_v33, %v6647_v22  ;;  %v2912_v42 = vmul.f32 %v6648_v52, %v2904_v32  ;;  %v6653_v33 = vld [vmem:[#allocation104_spill] sm:$0xff] }
 0xc06   :  { %v2906_v11 = vmul.f32 %v2902_v59, %v6652_v55  ;;  %v2834_v25 = vadd.f32 %v2830_v16, %v2806_v39  ;;  %v6654_v13 = vld [vmem:[#allocation80_spill] sm:$0xff]  ;;  %v2885_v32 = vmul.f32 %v5719_v43, %v2877_v29  ;;  %v2886_v48 = vmul.f32 %v5719_v43, %v2878_v45  ;;  %v6656_v39 = vld [vmem:[#allocation82_spill] sm:$0xff]  ;;  %v6657_v29 = vld [vmem:[#allocation83_spill] sm:$0xff] }
 0xc07   :  { %v2855_v21 = vmul.f32 %v5715_v30, %v2847_v24  ;;  %v2856_v34 = vmul.f32 %v5715_v30, %v2848_v26  ;;  %v2842_v27 = vpop.permute.xlu1 %2841  ;;  %v1109_v24 = vadd.f32 %v6654_v13, %v6653_v33  ;;  %v6655_v26 = vld [vmem:[#allocation81_spill] sm:$0xff]  ;;  %v1194_v43 = vadd.f32 %v6657_v29, %v6653_v33 }
 0xc08   :  { %v2843_v1 = vsel %vm560_vm6, %v5774_v18, %v2842_v27  ;;  %v2846_v46 = vsel %vm560_vm6, %v2842_v27, %v5737_v28  ;;  %v1111_v51 = vadd.f32 %v6655_v26, %v6653_v33 }
 0xc09   :  { %v2859_v19 = vadd.f32 %v2855_v21, %v2831_v47  ;;  %v2860_v53 = vadd.f32 %v2856_v34, %v2832_v41  ;;  %v2849_v7 = vmul.f32 %v2843_v1, %v6649_v17  ;;  %v2850_v10 = vmul.f32 %v2846_v46, %v6650_v63  ;;  %v3170_v46 = vld [vmem:[%s6199_s11 + $0x30] sm:$0xff] }
 0xc0a   :  { %v2914_v41 = vmul.f32 %v6648_v52, %v2906_v11  ;;  %v1192_v1 = vadd.f32 %v6656_v39, %v6653_v33 }
 0xc0b   :  { %v2887_v40 = vadd.f32 %v5831_v37, %v2859_v19  ;;  %v2888_v18 = vadd.f32 %v5837_v36, %v2860_v53  ;;  %v2857_v15 = vmul.f32 %v5715_v30, %v2849_v7  ;;  %v2858_v28 = vmul.f32 %v5715_v30, %v2850_v10  ;;  %v5998_v19 = vpop.permute.xlu0 %3046  ;;  %v129_v53 = vld [vmem:[%s6201_s13 + $0x8] sm:$0xff] }
 0xc0c   :  { %v2913_v36 = vmul.f32 %v6648_v52, %v2905_v31 }
 0xc0d   :  { %v2915_v59 = vadd.f32 %v2911_v54, %v2887_v40  ;;  %v2916_v16 = vadd.f32 %v2912_v42, %v2888_v18  ;;  %v2861_v47 = vadd.f32 %v2857_v15, %v2833_v12  ;;  %v2862_v37 = vadd.f32 %v2858_v28, %v2834_v25  ;;  %v6659_v18 = vld [vmem:[#allocation24_spill] sm:$0xff] }
 0xc0f   :  { %v5931_v21 = vmul.f32 %v2915_v59, %v1109_v24  ;;  %v5933_v30 = vmul.f32 %v2916_v16, %v1111_v51  ;;  %v2889_v34 = vadd.f32 %v2885_v32, %v2861_v47  ;;  %v2890_v27 = vadd.f32 %v2886_v48, %v2862_v37  ;;  %v6005_v7 = vpop.permute.xlu0 %3074  ;;  %v6660_v51 = vld [vmem:[#allocation25_spill] sm:$0xff] }
 0xc11   :  { %v2917_v45 = vadd.f32 %v2913_v36, %v2889_v34  ;;  %v2918_v54 = vadd.f32 %v2914_v41, %v2890_v27  ;;  %2945 = vrot.lane.b32.xlu0 %v5931_v21, %s3818_s21  ;;  %2947 = vrot.lane.b32.xlu1 %v5933_v30, %s3818_s21 }
 0xc13   :  { %v2921_v12 = vmul.f32 %v2917_v45, %v1192_v1  ;;  %v5943_v52 = vmul.f32 %v2918_v54, %v1194_v43  ;;  %v6007_v10 = vpop.permute.xlu0 %3102 }
 0xc15   :  { %2949 = vrot.lane.b32.xlu0 %v2921_v12, %s3818_s21  ;;  %2951 = vrot.lane.b32.xlu1 %v5943_v52, %s3818_s21  ;;  %v2934_v15 = vmul.f32 %v6659_v18, %v2921_v12 }
 0xc17   :  { %v6009_v42 = vpop.permute.xlu0 %3130 }
 0xc19   :  { %2977 = vrot.lane.b32.xlu0 %v2921_v12, %s3817_s20  ;;  %2973 = vrot.lane.b32.xlu1 %v5931_v21, %s3817_s20 }
 0xc1b   :  { %v6011_v31 = vpop.permute.xlu0 %3158 }
 0xc1c   :  { %6658 = vst [vmem:[#allocation32_spill] sm:$0xff] %v6011_v31 }
 0xc1d   :  { %3005 = vrot.lane.b32.xlu0 %v2921_v12, %s3819_s22  ;;  %2975 = vrot.lane.b32.xlu1 %v5933_v30, %s3817_s20 }
 0xc1f   :  { %v2939_v11 = vpop.permute.xlu0 %2938 }
 0xc20   :  { %v2943_v26 = vadd.f32 %v2939_v11, %v2934_v15 }
 0xc21   :  { %3033 = vrot.lane.b32.xlu0 %v2921_v12, %s3820_s23  ;;  %2979 = vrot.lane.b32.xlu1 %v5943_v52, %s3817_s20 }
 0xc25   :  { %3061 = vrot.lane.b32.xlu0 %v2921_v12, %s3821_s24  ;;  %3001 = vrot.lane.b32.xlu1 %v5931_v21, %s3819_s22 }
 0xc29   :  { %3089 = vrot.lane.b32.xlu0 %v2921_v12, %s3822_s25  ;;  %3003 = vrot.lane.b32.xlu1 %v5933_v30, %s3819_s22 }
 0xc2d   :  { %3117 = vrot.lane.b32.xlu0 %v2921_v12, %s3823_s26  ;;  %3007 = vrot.lane.b32.xlu1 %v5943_v52, %s3819_s22 }
 0xc31   :  { %3141 = vrot.lane.b32.xlu0 %v5931_v21, %s3824_s27  ;;  %3029 = vrot.lane.b32.xlu1 %v5931_v21, %s3820_s23 }
 0xc35   :  { %3145 = vrot.lane.b32.xlu0 %v2921_v12, %s3824_s27  ;;  %3031 = vrot.lane.b32.xlu1 %v5933_v30, %s3820_s23 }
 0xc39   :  { %3173 = vperm.xlu0 %3755, %v3170_v46   ;;  %3035 = vrot.lane.b32.xlu1 %v5943_v52, %s3820_s23  ;;  %v6661_v46 = vld [vmem:[#allocation11_spill] sm:$0xff] }
 0xc3d   :  { %3057 = vrot.lane.b32.xlu1 %v5931_v21, %s3821_s24 }
 0xc41   :  { %3059 = vrot.lane.b32.xlu1 %v5933_v30, %s3821_s24 }
 0xc45   :  { %3063 = vrot.lane.b32.xlu1 %v5943_v52, %s3821_s24 }
 0xc49   :  { %3085 = vrot.lane.b32.xlu1 %v5931_v21, %s3822_s25 }
 0xc4d   :  { %3087 = vrot.lane.b32.xlu1 %v5933_v30, %s3822_s25 }
 0xc51   :  { %3091 = vrot.lane.b32.xlu1 %v5943_v52, %s3822_s25 }
 0xc55   :  { %3113 = vrot.lane.b32.xlu1 %v5931_v21, %s3823_s26 }
 0xc59   :  { %3115 = vrot.lane.b32.xlu1 %v5933_v30, %s3823_s26 }
 0xc5d   :  { %3119 = vrot.lane.b32.xlu1 %v5943_v52, %s3823_s26 }
 0xc61   :  { %3143 = vrot.lane.b32.xlu1 %v5933_v30, %s3824_s27 }
 0xc65   :  { %3147 = vrot.lane.b32.xlu1 %v5943_v52, %s3824_s27 }
 0xc69   :  { %137 = vperm.xlu1 %3756, %v129_v53  }
 0xc83   :  { %v2946_v25 = vpop.permute.xlu0 %2945  ;;  %v2948_v40 = vpop.permute.xlu1 %2947 }
 0xc84   :  { %v2955_v54 = vsel %vm335_vm1, %v2946_v25, %v2948_v40 }
 0xc85   :  { %v2958_v53 = vmul.f32 %v2955_v54, %v6661_v46 }
 0xc87   :  { %v2950_v28 = vpop.permute.xlu0 %2949  ;;  %v2952_v33 = vpop.permute.xlu1 %2951  ;;  %v2966_v56 = vmul.f32 %v6660_v51, %v2958_v53 }
 0xc88   :  { %v2954_v13 = vsel %vm335_vm1, %v2948_v40, %v2950_v28  ;;  %v2953_v15 = vsel %vm335_vm1, %v2950_v28, %v2952_v33  ;;  %v6662_v28 = vld [vmem:[#allocation13_spill] sm:$0xff] }
 0xc89   :  { %v2959_v24 = vmul.f32 %v2954_v13, %v6551_v61  ;;  %v2956_v13 = vsel %vm335_vm1, %v2952_v33, %v2946_v25  ;;  %v2960_v25 = vmul.f32 %v2953_v15, %v6642_v60  ;;  %v2935_v33 = vmul.f32 %v6659_v18, %v5943_v52  ;;  %v6664_v52 = vld [vmem:[#allocation17_spill] sm:$0xff] }
 0xc8a   :  { %v2957_v46 = vmul.f32 %v2956_v13, %v6662_v28  ;;  %v6663_v13 = vld [vmem:[#allocation15_spill] sm:$0xff] }
 0xc8b   :  { %v2967_v32 = vmul.f32 %v6660_v51, %v2959_v24  ;;  %v2974_v48 = vpop.permute.xlu1 %2973  ;;  %v2978_v39 = vpop.permute.xlu0 %2977  ;;  %v2932_v24 = vmul.f32 %v6659_v18, %v5931_v21 }
 0xc8c   :  { %v2965_v23 = vmul.f32 %v6660_v51, %v2957_v46 }
 0xc8d   :  { %v6018_v59 = vadd.f32 %v2967_v32, %v2943_v26  ;;  %v2933_v26 = vmul.f32 %v6659_v18, %v5933_v30 }
 0xc8f   :  { %v2976_v16 = vpop.permute.xlu1 %2975  ;;  %v3006_v29 = vpop.permute.xlu0 %3005 }
 0xc90   :  { %v2982_v32 = vsel %vm380_vm2, %v2976_v16, %v2978_v39  ;;  %v2983_v40 = vsel %vm380_vm2, %v2974_v48, %v2976_v16 }
 0xc91   :  { %v2986_v28 = vmul.f32 %v2983_v40, %v6663_v13  ;;  %v2987_v60 = vmul.f32 %v2982_v32, %v6640_v9  ;;  %v2941_v32 = vadd.f32 %v2939_v11, %v2932_v24 }
 0xc93   :  { %v2980_v47 = vpop.permute.xlu1 %2979  ;;  %v3034_v61 = vpop.permute.xlu0 %3033 }
 0xc94   :  { %v2981_v21 = vsel %vm380_vm2, %v2978_v39, %v2980_v47  ;;  %v2984_v30 = vsel %vm380_vm2, %v2980_v47, %v2974_v48  ;;  %v2942_v47 = vadd.f32 %v2939_v11, %v2933_v26 }
 0xc95   :  { %v2985_v18 = vmul.f32 %v2984_v30, %v6664_v52  ;;  %v2988_v53 = vmul.f32 %v2981_v21, %v6644_v35  ;;  %v6665_v30 = vld [vmem:[#allocation102_spill] sm:$0xff] }
 0xc96   :  { %v2970_v26 = vadd.f32 %v2966_v56, %v2942_v47  ;;  %v2994_v52 = vmul.f32 %v6665_v30, %v2986_v28  ;;  %v2995_v35 = vmul.f32 %v6665_v30, %v2987_v60  ;;  %v6667_v28 = vld [vmem:[#allocation19_spill] sm:$0xff] }
 0xc97   :  { %v3002_v37 = vpop.permute.xlu1 %3001  ;;  %v6039_v55 = vpop.permute.xlu0 %3061  ;;  %v2993_v46 = vmul.f32 %v6665_v30, %v2985_v18 }
 0xc98   :  { %v2999_v47 = vadd.f32 %v2995_v35, %v6018_v59 }
 0xc9b   :  { %v3004_v36 = vpop.permute.xlu1 %3003  ;;  %v3090_v13 = vpop.permute.xlu0 %3089 }
 0xc9c   :  { %v3010_v16 = vsel %vm425_vm3, %v3004_v36, %v3006_v29  ;;  %v3011_v31 = vsel %vm425_vm3, %v3002_v37, %v3004_v36  ;;  %v2968_v36 = vmul.f32 %v6660_v51, %v2960_v25  ;;  %v2996_v51 = vmul.f32 %v6665_v30, %v2988_v53 }
 0xc9d   :  { %v3014_v40 = vmul.f32 %v3011_v31, %v4148_v3  ;;  %v3015_v9 = vmul.f32 %v3010_v16, %v4151_v4 }
 0xc9f   :  { %v3008_v41 = vpop.permute.xlu1 %3007  ;;  %v3118_v53 = vpop.permute.xlu0 %3117 }
 0xca0   :  { %v3009_v39 = vsel %vm425_vm3, %v3006_v29, %v3008_v41  ;;  %v3012_v48 = vsel %vm425_vm3, %v3008_v41, %v3002_v37  ;;  %v2944_v41 = vadd.f32 %v2939_v11, %v2935_v33 }
 0xca1   :  { %v3013_v29 = vmul.f32 %v3012_v48, %v4154_v5  ;;  %v3016_v37 = vmul.f32 %v3009_v39, %v4157_v6  ;;  %v2969_v5 = vadd.f32 %v2965_v23, %v2941_v32  ;;  %v6666_v6 = vld [vmem:[#allocation95_spill] sm:$0xff]  ;;  %v2998_v48 = vadd.f32 %v2994_v52, %v2970_v26 }
 0xca2   :  { %v2972_v24 = vadd.f32 %v2968_v36, %v2944_v41  ;;  %v3022_v11 = vmul.f32 %v6666_v6, %v3014_v40  ;;  %v3023_v56 = vmul.f32 %v6666_v6, %v3015_v9 }
 0xca3   :  { %v3030_v34 = vpop.permute.xlu1 %3029  ;;  %v3021_v25 = vmul.f32 %v6666_v6, %v3013_v29  ;;  %v3024_v21 = vmul.f32 %v6666_v6, %v3016_v37  ;;  %v2997_v18 = vadd.f32 %v2993_v46, %v2969_v5  ;;  %v3142_v46 = vpop.permute.xlu0 %3141  ;;  %v6669_v5 = vld [vmem:[#allocation31_spill] sm:$0xff] }
 0xca4   :  { %v3026_v9 = vadd.f32 %v3022_v11, %v2998_v48 }
 0xca5   :  { %v3025_v29 = vadd.f32 %v3021_v25, %v2997_v18 }
 0xca7   :  { %v3032_v27 = vpop.permute.xlu1 %3031 }
 0xca8   :  { %v3039_v3 = vsel %vm470_vm4, %v3030_v34, %v3032_v27  ;;  %v3038_v33 = vsel %vm470_vm4, %v3032_v27, %v3034_v61  ;;  %v3000_v27 = vadd.f32 %v2996_v51, %v2972_v24 }
 0xca9   :  { %v3042_v60 = vmul.f32 %v3039_v3, %v6667_v28  ;;  %v6668_v3 = vld [vmem:[#allocation30_spill] sm:$0xff] }
 0xcaa   :  { %v3028_v37 = vadd.f32 %v3024_v21, %v3000_v27 }
 0xcab   :  { %v3036_v1 = vpop.permute.xlu1 %3035  ;;  %v3050_v41 = vmul.f32 %v5998_v19, %v3042_v60 }
 0xcac   :  { %v3040_v4 = vsel %vm470_vm4, %v3036_v1, %v3030_v34  ;;  %v3037_v16 = vsel %vm470_vm4, %v3034_v61, %v3036_v1  ;;  %v3043_v1 = vmul.f32 %v3038_v33, %v6643_v0 }
 0xcad   :  { %v3041_v34 = vmul.f32 %v3040_v4, %v6641_v14  ;;  %v3044_v61 = vmul.f32 %v3037_v16, %v6645_v58  ;;  %v3054_v6 = vadd.f32 %v3050_v41, %v3026_v9 }
 0xcae   :  { %v3051_v30 = vmul.f32 %v5998_v19, %v3043_v1 }
 0xcaf   :  { %v6020_v43 = vpop.permute.xlu1 %3057  ;;  %v3049_v0 = vmul.f32 %v5998_v19, %v3041_v34  ;;  %v3052_v52 = vmul.f32 %v5998_v19, %v3044_v61 }
 0xcb1   :  { %v3053_v11 = vadd.f32 %v3049_v0, %v3025_v29  ;;  %v6671_v29 = vld [vmem:[#allocation32_spill] sm:$0xff] }
 0xcb3   :  { %v3060_v45 = vpop.permute.xlu1 %3059 }
 0xcb4   :  { %v3066_v23 = vsel %vm515_vm5, %v3060_v45, %v6039_v55  ;;  %v3067_v39 = vsel %vm515_vm5, %v6020_v43, %v3060_v45  ;;  %v3027_v45 = vadd.f32 %v3023_v56, %v2999_v47 }
 0xcb5   :  { %v3069_v32 = vmul.f32 %v3067_v39, %v6559_v50  ;;  %v3070_v59 = vmul.f32 %v3066_v23, %v4184_v57  ;;  %v3146_v39 = vpop.permute.xlu0 %3145 }
 0xcb7   :  { %v6024_v12 = vpop.permute.xlu1 %3063  ;;  %v3077_v51 = vmul.f32 %v6005_v7, %v3069_v32 }
 0xcb8   :  { %v3065_v58 = vsel %vm515_vm5, %v6039_v55, %v6024_v12 }
 0xcb9   :  { %v3071_v19 = vmul.f32 %v3065_v58, %v6525_v44  ;;  %v3081_v16 = vadd.f32 %v3077_v51, %v3053_v11 }
 0xcbb   :  { %v6041_v54 = vpop.permute.xlu1 %3085  ;;  %v3079_v60 = vmul.f32 %v6005_v7, %v3071_v19 }
 0xcbf   :  { %v3088_v15 = vpop.permute.xlu1 %3087 }
 0xcc0   :  { %v3094_v14 = vsel %vm560_vm6, %v3088_v15, %v3090_v13  ;;  %v3095_v40 = vsel %vm560_vm6, %v6041_v54, %v3088_v15  ;;  %v3068_v15 = vsel %vm515_vm5, %v6024_v12, %v6020_v43  ;;  %v3078_v43 = vmul.f32 %v6005_v7, %v3070_v59 }
 0xcc1   :  { %v3097_v50 = vmul.f32 %v3095_v40, %v6646_v62  ;;  %v3098_v57 = vmul.f32 %v3094_v14, %v6647_v22  ;;  %v3072_v12 = vmul.f32 %v3068_v15, %v6527_v49  ;;  %v6670_v14 = vld [vmem:[#allocation35_spill] sm:$0xff] }
 0xcc2   :  { %v3082_v28 = vadd.f32 %v3078_v43, %v3054_v6 }
 0xcc3   :  { %v3092_v31 = vpop.permute.xlu1 %3091  ;;  %v3105_v56 = vmul.f32 %v6007_v10, %v3097_v50  ;;  %v3106_v25 = vmul.f32 %v6007_v10, %v3098_v57  ;;  %v3080_v34 = vmul.f32 %v6005_v7, %v3072_v12  ;;  %v6672_v57 = vld [vmem:[#allocation36_spill] sm:$0xff] }
 0xcc4   :  { %v3093_v62 = vsel %vm560_vm6, %v3090_v13, %v3092_v31  ;;  %v3096_v22 = vsel %vm560_vm6, %v3092_v31, %v6041_v54  ;;  %v3055_v54 = vadd.f32 %v3051_v30, %v3027_v45  ;;  %v3056_v31 = vadd.f32 %v3052_v52, %v3028_v37  ;;  %v6673_v30 = vld [vmem:[#allocation37_spill] sm:$0xff] }
 0xcc5   :  { %v3099_v13 = vmul.f32 %v3093_v62, %v6649_v17  ;;  %v3100_v33 = vmul.f32 %v3096_v22, %v6650_v63  ;;  %v3109_v63 = vadd.f32 %v3105_v56, %v3081_v16  ;;  %v3110_v48 = vadd.f32 %v3106_v25, %v3082_v28  ;;  %v3174_v22 = vpop.permute.xlu0 %3173  ;;  %v6675_v56 = vld [vmem:[#allocation6_spill] sm:$0xff]  ;;  %v6676_v16 = vld [vmem:[#allocation7_spill] sm:$0xff] }
 0xcc6   :  { %v3083_v9 = vadd.f32 %v3079_v60, %v3055_v54  ;;  %v3084_v45 = vadd.f32 %v3080_v34, %v3056_v31  ;;  %v6677_v34 = vld [vmem:[#allocation8_spill] sm:$0xff] }
 0xcc7   :  { %v3114_v36 = vpop.permute.xlu1 %3113 }
 0xccb   :  { %v3116_v26 = vpop.permute.xlu1 %3115 }
 0xccc   :  { %v3122_v35 = vsel %vm605_vm7, %v3116_v26, %v3118_v53  ;;  %v3123_v55 = vsel %vm605_vm7, %v3114_v36, %v3116_v26 }
 0xccd   :  { %v3125_v4 = vmul.f32 %v3123_v55, %v6668_v3  ;;  %v3126_v24 = vmul.f32 %v3122_v35, %v6669_v5 }
 0xccf   :  { %v3120_v21 = vpop.permute.xlu1 %3119  ;;  %v3133_v23 = vmul.f32 %v6009_v42, %v3125_v4  ;;  %v3134_v17 = vmul.f32 %v6009_v42, %v3126_v24  ;;  %v6674_v24 = vld [vmem:[#allocation5_spill] sm:$0xff] }
 0xcd0   :  { %v3121_v44 = vsel %vm605_vm7, %v3118_v53, %v3120_v21  ;;  %v3124_v49 = vsel %vm605_vm7, %v3120_v21, %v3114_v36  ;;  %v3107_v53 = vmul.f32 %v6007_v10, %v3099_v13  ;;  %v3108_v36 = vmul.f32 %v6007_v10, %v3100_v33 }
 0xcd1   :  { %v3127_v47 = vmul.f32 %v3121_v44, %v6534_v38  ;;  %v3128_v18 = vmul.f32 %v3124_v49, %v6535_v20  ;;  %v3137_v38 = vadd.f32 %v3133_v23, %v3109_v63  ;;  %v3138_v32 = vadd.f32 %v3134_v17, %v3110_v48 }
 0xcd2   :  { %v3111_v0 = vadd.f32 %v3107_v53, %v3083_v9  ;;  %v3112_v58 = vadd.f32 %v3108_v36, %v3084_v45 }
 0xcd3   :  { %v3144_v27 = vpop.permute.xlu1 %3143  ;;  %v3135_v20 = vmul.f32 %v6009_v42, %v3127_v47  ;;  %v3136_v59 = vmul.f32 %v6009_v42, %v3128_v18  ;;  %v3169_v42 = vld [vmem:[%s6198_s10 + $0x30] sm:$0xff]  ;;  %s3827_s10 = smov [#allocation2]  }
 0xcd4   :  { %v3150_v1 = vsel %vm650_vm8, %v3144_v27, %v3146_v39  ;;  %v3151_v7 = vsel %vm650_vm8, %v3142_v46, %v3144_v27  ;;  %s3339_s23 = sshll.u32 %s3827_s10, 4  ;;  %s3340_s23 = int_to_ptr.vmem [resolvable:$true] %s3339_s23 }
 0xcd5   :  { %v3153_v61 = vmul.f32 %v3151_v7, %v6568_v2  ;;  %v3154_v40 = vmul.f32 %v3150_v1, %v6670_v14  ;;  %v3139_v55 = vadd.f32 %v3135_v20, %v3111_v0  ;;  %v3140_v62 = vadd.f32 %v3136_v59, %v3112_v58  ;;  %s3783_s24 = scalar_lea.vmem %s3340_s23, 512  ;;  %p3788_p1 = scmp.lt.s32.totalorder %s3340_s23, %s3340_s23 }
 0xcd6   :  { %p3784_p0 = scmp.ne.s32.totalorder %s3340_s23, %s3783_s24  ;;  %p3789_p2 = scmp.lt.s32.totalorder %s3783_s24, %s3783_s24 }
 0xcd7   :  { %v3161_v10 = vmul.f32 %v6671_v29, %v3153_v61  ;;  %v3162_v37 = vmul.f32 %v6671_v29, %v3154_v40  ;;  %v3148_v41 = vpop.permute.xlu1 %3147 }
 0xcd8   :  { %v3149_v2 = vsel %vm650_vm8, %v3146_v39, %v3148_v41  ;;  %v3152_v15 = vsel %vm650_vm8, %v3148_v41, %v3142_v46  ;;  %p3790_p3 = por %p3789_p2, %p3788_p1 }
 0xcd9   :  { %v3165_v50 = vadd.f32 %v3161_v10, %v3137_v38  ;;  %v3155_v26 = vmul.f32 %v3149_v2, %v6672_v57  ;;  %v3156_v52 = vmul.f32 %v3152_v15, %v6673_v30  ;;  %v3166_v35 = vadd.f32 %v3162_v37, %v3138_v32 }
 0xcda   :  { %p3791_p4 = pnand %p3790_p3, %p3784_p0 }
 0xcdb   :  { %v3163_v51 = vmul.f32 %v6671_v29, %v3155_v26  ;;  %v3164_v43 = vmul.f32 %v6671_v29, %v3156_v52  ;;  %3179 = vmatprep.subr.mxu0 %v3166_v35 }
 0xcdc   :  { %3180 = vmatpush1.msra.mxu0 %v3165_v50 }
 0xcdd   :  { %v3167_v8 = vadd.f32 %v3163_v51, %v3139_v55  ;;  %3387 = vmatmul.mubr.msk.f32.vlgmr.msra.gmra.mrb[26].mxu0 %vm698_vm9, %v3169_v42  ;;  %v3168_v46 = vadd.f32 %v3164_v43, %v3140_v62 }
 0xcdf   :  { %3250 = vmatprep.subr.mxu1 %v3168_v46 }
 0xce0   :  { %3251 = vmatpush1.msra.mxu1 %v3167_v8 }
 0xce1   :  { %3388 = vmatmul.mubr.msk.f32.vlgmr.msra.gmra.mrb[26].mxu1 %vm698_vm9, %v3169_v42 }
 0xce8   :  { %v138_v19 = vpop.permute.xlu1 %137 }
 0xce9   :  { %v220_v6 = vadd.f32 %v6674_v24, %v138_v19  ;;  %v222_v25 = vadd.f32 %v6675_v56, %v138_v19  ;;  %v297_v28 = vadd.f32 %v6676_v16, %v138_v19  ;;  %v299_v23 = vadd.f32 %v6677_v34, %v138_v19 }
 0xdb0   :  { %v3245_v12 = vpop.f32.mrb[26].mxu0 }
 0xdb1   :  { %v3246_v3 = vadd.f32 %v3245_v12, %v3174_v22  ;;  %v3247_v4 = vpop.f32.mrb[27].mxu0 }
 0xdb2   :  { %v3248_v5 = vadd.f32 %v3247_v4, %v3174_v22 }
 0xdb3   :  { %v3321_v11 = vmax.f32 %v3246_v3, 0.0 }
 0xdb4   :  { %v3322_v21 = vmax.f32 %v3248_v5, 0.0  ;;  %v3316_v13 = vpop.f32.mrb[26].mxu1 }
 0xdb5   :  { %v3325_v33 = vadd.f32 %v3321_v11, %v220_v6  ;;  %v3317_v44 = vadd.f32 %v3316_v13, %v3174_v22  ;;  %v3318_v49 = vpop.f32.mrb[27].mxu1 }
 0xdb6   :  { %v3326_v54 = vadd.f32 %v3322_v21, %v222_v25  ;;  %v3319_v31 = vadd.f32 %v3318_v49, %v3174_v22 }
 0xdb7   :  { %3329 = vst [vmem:[#allocation2] sm:$0xff] %v3325_v33  ;;  %v3323_v60 = vmax.f32 %v3317_v44, 0.0 }
 0xdb8   :  { %3330 = vst [vmem:[#allocation2 + $0x8] sm:$0xff] %v3326_v54  ;;  %v3324_v17 = vmax.f32 %v3319_v31, 0.0 }
 0xdb9   :  { %v3327_v39 = vadd.f32 %v3323_v60, %v297_v28 }
 0xdba   :  { %v3328_v63 = vadd.f32 %v3324_v17, %v299_v23 }
 0xdbb   :  { %3331 = vst [vmem:[#allocation2 + $0x10] sm:$0xff] %v3327_v39 }
 0xdbc   :  { %3332 = vst [vmem:[#allocation2 + $0x18] sm:$0xff] %v3328_v63 }
 0xdbd   :  { %3794 = shalt.err (!%p3791_p4)
}
 0xdbe   :  { %s3795_s27 = scalar_lea.hbm %s6202_s14, 512 }
 0xdbf   :  { %p3796_p5 = scmp.ne.s32.totalorder %s6202_s14, %s3795_s27  ;;  %p3799_p6 = scmp.lt.u32.totalorder %s3795_s27, %s6202_s14 }
 0xdc1   :  { %p3801_p7 = pnand %p3799_p6, %p3796_p5 }
 0xdc3   :  { %3804 = shalt.err (!%p3801_p7)
}
 0xdc4   :  { %3342 = dma.vmem_to_hbm [thread:$0]  %s3340_s23, 512, %s6202_s14, [#allocation3]  }
 0xdc5   :  { %3805 = dma.done.wait [#allocation3], 512  }
 0xdc6   :  { %3806 = vsyncadd [#allocation3], 4294966784 }
 0xdc7   :  { %3346 = vsyncpa [#allocation3], 1 }

</bundles_post_ra>
